<compile_context>
chip_gen: v7x
topology: tpu7x:2x2x1
jax: 0.10.0
libtpu: 0.0.40
codegen_flags: <defaults>
</compile_context>

<pallas_src>
import functools

import jax
import jax.numpy as jnp
from jax.experimental import pallas as pl
from jax.experimental.pallas import tpu as pltpu


def _round_up(x, m):
    return (x + m - 1) // m * m


# ----------------------------------------------------------------------------
# Fused Conv5x5(pad=2) + bias + ReLU + MaxPool2x2 kernel
# ----------------------------------------------------------------------------
def _conv_relu_pool_kernel(a_ref, b_ref, bias_ref, o_ref, vmax_ref, *, row_group):
    """One (tm, tn) conv tile -> pooled (tm//4, tn) tile.

    a_ref   : (tm, Kp)  bf16 im2col patches, rows in (n, h, w) row-major order;
              tm is a multiple of row_group = 2*W and tiles are aligned to
              image row-pair starts, so every tile holds whole pooling windows.
    b_ref   : (Kp, tn)  bf16 weights.
    bias_ref: (1, tn)   f32.
    o_ref   : (tm//4, tn) pooled output, rows in (n, h//2, w//2) order.
    vmax_ref: (tm//2, tn) f32 scratch holding the vertical (h) max.
    """
    tm = a_ref.shape[0]
    width = row_group // 2                      # image width W of this stage

    # Single-shot MXU matmul: K fits one step -> no accumulator, no pl.when.
    z = jnp.dot(a_ref[...], b_ref[...], preferred_element_type=jnp.float32)
    z = jnp.maximum(z + bias_ref[...], 0.0)     # bias + ReLU, f32 epilogue

    # Vertical (h) max: within each group of 2*W rows, the first W rows are
    # image row 2r and the next W rows are image row 2r+1 (contiguous slices).
    for g in range(tm // row_group):
        top = z[g * row_group:          g * row_group + width, :]
        bot = z[g * row_group + width: (g + 1) * row_group,   :]
        vmax_ref[g * width:(g + 1) * width, :] = jnp.maximum(top, bot)

    # Horizontal (w) max: adjacent vmax rows are adjacent w positions; compact
    # even/odd rows with stride-2 sublane reads and store once (lane-dense).
    n_out = tm // 4
    even = vmax_ref[pl.ds(0, n_out, stride=2), :]
    odd = vmax_ref[pl.ds(1, n_out, stride=2), :]
    o_ref[...] = jnp.maximum(even, odd).astype(o_ref.dtype)


def _pick_conv_m_tile(m, row_group):
    """Largest whole-row-group tile <=512 rows that divides m exactly (no M
    padding); split in two when possible so >=2 M blocks feed both v7x TCs."""
    assert m % row_group == 0
    groups = m // row_group
    best = groups                                # fallback: one full block
    for g in range(groups, 0, -1):
        tm = g * row_group
        if groups % g == 0 and tm <= 512 and tm % 32 == 0:
            best = g
            break
    tm = best * row_group
    if tm == m and best % 2 == 0 and (tm // 2) % 32 == 0:
        tm //= 2
    return tm


def _im2col_5x5_pad2(x, kp):
    """x: (N, H, W, C) NHWC -> (N*H*W, kp) bf16 'same'-conv patches (k=5, pad=2);
    K = 25*C, zero-padded to kp (multiple of 128)."""
    # TODO(synk): patches are still materialized by XLA (~25x activation blowup);
    # a fully fused in-kernel halo / shifted-window conv would remove it.
    n, h, w, c = x.shape
    x = x.astype(jnp.bfloat16)
    xp = jnp.pad(x, ((0, 0), (2, 2), (2, 2), (0, 0)))
    cols = [xp[:, kh:kh + h, kw:kw + w, :] for kh in range(5) for kw in range(5)]
    p = jnp.stack(cols, axis=3).reshape(n * h * w, 25 * c)
    if kp > 25 * c:
        p = jnp.pad(p, ((0, 0), (0, kp - 25 * c)))
    return p


def conv5x5_relu_pool(x, w_mat, bias, *, cin):
    """maxpool2x2(relu(conv5x5_same(x[..., :cin]) + bias)) in one pallas_call.

    x    : (N, H, W, C>=cin) NHWC (extra channels are zero padding, dropped).
    w_mat: (Kp, Np) bf16, Kp = round_up(25*cin, 128), Np = round_up(Cout, 128).
    bias : (1, Np)  f32.
    Returns (N, H//2, W//2, Np) bf16; channels beyond the real Cout are zero.
    """
    n, h, w = x.shape[:3]
    assert h % 2 == 0 and w % 2 == 0
    kp, np_ = w_mat.shape

    a = _im2col_5x5_pad2(x[..., :cin], kp)       # (N*H*W, Kp) bf16
    m = n * h * w
    row_group = 2 * w                            # rows per 2x2-pool row pair
    tm = _pick_conv_m_tile(m, row_group)
    tn = 256 if np_ % 256 == 0 else 128

    out = pl.pallas_call(
        functools.partial(_conv_relu_pool_kernel, row_group=row_group),
        out_shape=jax.ShapeDtypeStruct((m // 4, np_), jnp.bfloat16),
        grid=(m // tm, np_ // tn),
        in_specs=[
            pl.BlockSpec((tm, kp), lambda i, j: (i, 0)),
            pl.BlockSpec((kp, tn), lambda i, j: (0, j)),
            pl.BlockSpec((1, tn), lambda i, j: (0, j)),
        ],
        out_specs=pl.BlockSpec((tm // 4, tn), lambda i, j: (i, j)),
        scratch_shapes=[pltpu.VMEM((tm // 2, tn), jnp.float32)],
        compiler_params=pltpu.CompilerParams(
            dimension_semantics=("parallel", "parallel")),
    )(a, w_mat, bias)
    return out.reshape(n, h // 2, w // 2, np_)


# ----------------------------------------------------------------------------
# Fused classifier: fc1 -> ReLU -> fc2 -> ReLU -> fc3 in one pallas_call
# ----------------------------------------------------------------------------
def _fc_chain_kernel(x_ref, w1_ref, b1_ref, w2_ref, b2_ref, w3_ref, b3_ref,
                     o_ref):
    h = jnp.dot(x_ref[...], w1_ref[...], preferred_element_type=jnp.float32)
    h = jnp.maximum(h + b1_ref[...], 0.0).astype(jnp.bfloat16)
    # TODO(synk): Dropout(p=0.5) is identity in eval mode, so it is omitted.
    h = jnp.dot(h, w2_ref[...], preferred_element_type=jnp.float32)
    h = jnp.maximum(h + b2_ref[...], 0.0).astype(jnp.bfloat16)
    h = jnp.dot(h, w3_ref[...], preferred_element_type=jnp.float32)
    o_ref[...] = h + b3_ref[...]


def fc_chain(feat, w1, b1, w2, b2, w3, b3):
    """feat: (M, D) -> padded logits (Mp, N3p) f32; caller slices real rows/cols."""
    m, d = feat.shape
    k1p, n1 = w1.shape
    n2 = w2.shape[1]
    n3 = w3.shape[1]
    assert w2.shape[0] == n1 and w3.shape[0] == n2 and k1p >= d

    tm = min(128, _round_up(m, 8))
    mp = _round_up(m, tm)
    x = jnp.pad(feat.astype(jnp.bfloat16), ((0, mp - m), (0, k1p - d)))

    return pl.pallas_call(
        _fc_chain_kernel,
        out_shape=jax.ShapeDtypeStruct((mp, n3), jnp.float32),
        grid=(mp // tm,),
        in_specs=[
            pl.BlockSpec((tm, k1p), lambda i: (i, 0)),
            pl.BlockSpec((k1p, n1), lambda i: (0, 0)),
            pl.BlockSpec((1, n1), lambda i: (0, 0)),
            pl.BlockSpec((n1, n2), lambda i: (0, 0)),
            pl.BlockSpec((1, n2), lambda i: (0, 0)),
            pl.BlockSpec((n2, n3), lambda i: (0, 0)),
            pl.BlockSpec((1, n3), lambda i: (0, 0)),
        ],
        out_specs=pl.BlockSpec((tm, n3), lambda i: (i, 0)),
        compiler_params=pltpu.CompilerParams(dimension_semantics=("parallel",)),
    )(x, w1, b1, w2, b2, w3, b3)


# ----------------------------------------------------------------------------
# Full forward pass
# ----------------------------------------------------------------------------
def convnet_forward(x_nchw, params, *, num_classes):
    # NCHW (PyTorch) -> NHWC (channels -> lanes); tiny permute that XLA fuses
    # with conv1's patch-building glue.
    x = jnp.transpose(x_nchw, (0, 2, 3, 1))

    x = conv5x5_relu_pool(x, params["conv1_w"], params["conv1_b"], cin=3)
    x = conv5x5_relu_pool(x, params["conv2_w"], params["conv2_b"], cin=32)
    x = conv5x5_relu_pool(x, params["conv3_w"], params["conv3_b"], cin=64)

    # conv3 has exactly 128 real channels (== its lane padding), so this
    # flatten is a free reshape; fc1's weights were pre-permuted to match the
    # (h, w, c) feature order.
    n = x.shape[0]
    feat = x.reshape(n, -1)

    logits = fc_chain(feat,
                      params["fc1_w"], params["fc1_b"],
                      params["fc2_w"], params["fc2_b"],
                      params["fc3_w"], params["fc3_b"])
    return logits[:n, :num_classes]


# ----------------------------------------------------------------------------
# Parameter init (PyTorch layouts) + one-time prep into matmul layout
# ----------------------------------------------------------------------------
def init_params(key, input_dim, output_channels):
    c, h, w = input_dim
    flat_dim = 128 * (h // 8) * (w // 8)         # after 3 maxpools, 128 channels
    keys = jax.random.split(key, 6)

    def winit(k, shape, fan_in):
        return jax.random.normal(k, shape, jnp.float32) / jnp.sqrt(fan_in)

    return {
        "conv1_w": winit(keys[0], (32, 3, 5, 5), 3 * 25),
        "conv1_b": jnp.zeros((32,), jnp.float32),
        "conv2_w": winit(keys[1], (64, 32, 5, 5), 32 * 25),
        "conv2_b": jnp.zeros((64,), jnp.float32),
        "conv3_w": winit(keys[2], (128, 64, 5, 5), 64 * 25),
        "conv3_b": jnp.zeros((128,), jnp.float32),
        "fc1_w": winit(keys[3], (1024, flat_dim), flat_dim),
        "fc1_b": jnp.zeros((1024,), jnp.float32),
        "fc2_w": winit(keys[4], (400, 1024), 1024),
        "fc2_b": jnp.zeros((400,), jnp.float32),
        "fc3_w": winit(keys[5], (output_channels, 400), 400),
        "fc3_b": jnp.zeros((output_channels,), jnp.float32),
    }


def prepare_params(raw, *, feature_hw):
    """One-time (outside jit) transform into padded bf16 (K, N) matmul layout."""
    h2, w2 = feature_hw
    c3 = raw["conv3_w"].shape[0]                 # channels of the flattened features

    def conv_mat(w, b):
        cout, cin, kh, kw = w.shape
        k = kh * kw * cin
        kp, np_ = _round_up(k, 128), _round_up(cout, 128)
        wm = jnp.transpose(w, (2, 3, 1, 0)).reshape(k, cout)
        wm = jnp.pad(wm, ((0, kp - k), (0, np_ - cout))).astype(jnp.bfloat16)
        bm = jnp.pad(b, (0, np_ - cout)).reshape(1, np_).astype(jnp.float32)
        return wm, bm

    def fc_mat(w, b):
        n, k = w.shape                           # PyTorch Linear: (out, in)
        kp, np_ = _round_up(k, 128), _round_up(n, 128)
        wm = jnp.pad(w.T, ((0, kp - k), (0, np_ - n))).astype(jnp.bfloat16)
        bm = jnp.pad(b, (0, np_ - n)).reshape(1, np_).astype(jnp.float32)
        return wm, bm

    p = {}
    for name in ("conv1", "conv2", "conv3"):
        p[name + "_w"], p[name + "_b"] = conv_mat(raw[name + "_w"], raw[name + "_b"])

    # fc1: permute K from PyTorch's flattened (C, H, W) order to the (H, W, C)
    # order of our NHWC features -> forward-time flatten is a plain reshape.
    fc1_w = raw["fc1_w"]
    out_f, flat = fc1_w.shape
    fc1_w = fc1_w.reshape(out_f, c3, h2, w2).transpose(0, 2, 3, 1).reshape(out_f, flat)
    p["fc1_w"], p["fc1_b"] = fc_mat(fc1_w, raw["fc1_b"])
    p["fc2_w"], p["fc2_b"] = fc_mat(raw["fc2_w"], raw["fc2_b"])
    p["fc3_w"], p["fc3_b"] = fc_mat(raw["fc3_w"], raw["fc3_b"])
    return p


if __name__ == "__main__":
    key = jax.random.PRNGKey(0)
    k_in, k_par = jax.random.split(key)

    batch = 2
    input_dim = (3, 16, 16)      # (C, H, W) — conv1 expects 3 input channels
    output_channels = 10

    x = jax.random.normal(k_in, (batch,) + input_dim, jnp.float32)  # NCHW
    raw_params = init_params(k_par, input_dim, output_channels)
    params = prepare_params(
        raw_params, feature_hw=(input_dim[1] // 8, input_dim[2] // 8))

    fwd = jax.jit(functools.partial(convnet_forward, num_classes=output_channels))
    out = fwd(x, params)
    jax.block_until_ready(out)

    assert out.shape == (batch, output_channels), out.shape
    print("KERNEL_OK")
</pallas_src>

<mosaic_0001>
module attributes {stable_mosaic.version = 11 : i64} {
  func.func @_conv_relu_pool_kernel(%arg0: i32, %arg1: i32, %arg2: memref<256x128xbf16, #tpu.memory_space<vmem>>, %arg3: memref<128x128xbf16, #tpu.memory_space<vmem>>, %arg4: memref<1x128xf32, #tpu.memory_space<vmem>>, %arg5: memref<64x128xbf16, #tpu.memory_space<vmem>>, %arg6: memref<128x128xf32, #tpu.memory_space<vmem>>) attributes {dimension_semantics = [#tpu.dimension_semantics<parallel>, #tpu.dimension_semantics<parallel>], iteration_bounds = array<i64: 2, 1>, scalar_prefetch = 0 : i64, scratch_operands = 1 : i64, tpu.core_type = #tpu.core_type<tc>, window_params = [{transform_indices = @transform_0, window_bounds = array<i64: 256, 128>}, {transform_indices = @transform_1, window_bounds = array<i64: 128, 128>}, {transform_indices = @transform_2, window_bounds = array<i64: 1, 128>}, {transform_indices = @transform_3, window_bounds = array<i64: 64, 128>}]} {
    %c0 = arith.constant 0 : index
    %c0_0 = arith.constant 0 : index
    %0 = vector.load %arg2[%c0, %c0_0] : memref<256x128xbf16, #tpu.memory_space<vmem>>, vector<256x128xbf16>
    %c0_1 = arith.constant 0 : index
    %c0_2 = arith.constant 0 : index
    %1 = vector.load %arg3[%c0_1, %c0_2] : memref<128x128xbf16, #tpu.memory_space<vmem>>, vector<128x128xbf16>
    %cst = arith.constant dense<0.000000e+00> : vector<256x128xf32>
    %2 = tpu.matmul %0, %1, %cst {dimension_numbers = #tpu.dot_dimension_numbers<[1], [0], [0], [1], [0, 0, 1, 1], [], []>} : vector<256x128xbf16>, vector<128x128xbf16>, vector<256x128xf32> -> vector<256x128xf32>
    %c0_3 = arith.constant 0 : index
    %c0_4 = arith.constant 0 : index
    %3 = vector.load %arg4[%c0_3, %c0_4] : memref<1x128xf32, #tpu.memory_space<vmem>>, vector<1x128xf32>
    %4 = vector.broadcast %3 : vector<1x128xf32> to vector<256x128xf32>
    %5 = arith.addf %2, %4 : vector<256x128xf32>
    %cst_5 = arith.constant 0.000000e+00 : f32
    %6 = vector.broadcast %cst_5 : f32 to vector<256x128xf32>
    %7 = arith.maximumf %5, %6 : vector<256x128xf32>
    %8 = vector.extract_strided_slice %7 {offsets = [0, 0], sizes = [16, 128], strides = [1, 1]} : vector<256x128xf32> to vector<16x128xf32>
    %9 = vector.extract_strided_slice %7 {offsets = [16, 0], sizes = [16, 128], strides = [1, 1]} : vector<256x128xf32> to vector<16x128xf32>
    %10 = arith.maximumf %8, %9 : vector<16x128xf32>
    %c0_6 = arith.constant 0 : index
    %c0_7 = arith.constant 0 : index
    %11 = vector.load %arg6[%c0_6, %c0_7] : memref<128x128xf32, #tpu.memory_space<vmem>>, vector<16x128xf32>
    tpu.vector_store %arg6[%c0_6, %c0_7], %10 {strides = array<i32>} : memref<128x128xf32, #tpu.memory_space<vmem>>, vector<16x128xf32>,
    %12 = vector.extract_strided_slice %7 {offsets = [32, 0], sizes = [16, 128], strides = [1, 1]} : vector<256x128xf32> to vector<16x128xf32>
    %13 = vector.extract_strided_slice %7 {offsets = [48, 0], sizes = [16, 128], strides = [1, 1]} : vector<256x128xf32> to vector<16x128xf32>
    %14 = arith.maximumf %12, %13 : vector<16x128xf32>
    %c16 = arith.constant 16 : index
    %c0_8 = arith.constant 0 : index
    %15 = vector.load %arg6[%c16, %c0_8] : memref<128x128xf32, #tpu.memory_space<vmem>>, vector<16x128xf32>
    tpu.vector_store %arg6[%c16, %c0_8], %14 {strides = array<i32>} : memref<128x128xf32, #tpu.memory_space<vmem>>, vector<16x128xf32>,
    %16 = vector.extract_strided_slice %7 {offsets = [64, 0], sizes = [16, 128], strides = [1, 1]} : vector<256x128xf32> to vector<16x128xf32>
    %17 = vector.extract_strided_slice %7 {offsets = [80, 0], sizes = [16, 128], strides = [1, 1]} : vector<256x128xf32> to vector<16x128xf32>
    %18 = arith.maximumf %16, %17 : vector<16x128xf32>
    %c32 = arith.constant 32 : index
    %c0_9 = arith.constant 0 : index
    %19 = vector.load %arg6[%c32, %c0_9] : memref<128x128xf32, #tpu.memory_space<vmem>>, vector<16x128xf32>
    tpu.vector_store %arg6[%c32, %c0_9], %18 {strides = array<i32>} : memref<128x128xf32, #tpu.memory_space<vmem>>, vector<16x128xf32>,
    %20 = vector.extract_strided_slice %7 {offsets = [96, 0], sizes = [16, 128], strides = [1, 1]} : vector<256x128xf32> to vector<16x128xf32>
    %21 = vector.extract_strided_slice %7 {offsets = [112, 0], sizes = [16, 128], strides = [1, 1]} : vector<256x128xf32> to vector<16x128xf32>
    %22 = arith.maximumf %20, %21 : vector<16x128xf32>
    %c48 = arith.constant 48 : index
    %c0_10 = arith.constant 0 : index
    %23 = vector.load %arg6[%c48, %c0_10] : memref<128x128xf32, #tpu.memory_space<vmem>>, vector<16x128xf32>
    tpu.vector_store %arg6[%c48, %c0_10], %22 {strides = array<i32>} : memref<128x128xf32, #tpu.memory_space<vmem>>, vector<16x128xf32>,
    %24 = vector.extract_strided_slice %7 {offsets = [128, 0], sizes = [16, 128], strides = [1, 1]} : vector<256x128xf32> to vector<16x128xf32>
    %25 = vector.extract_strided_slice %7 {offsets = [144, 0], sizes = [16, 128], strides = [1, 1]} : vector<256x128xf32> to vector<16x128xf32>
    %26 = arith.maximumf %24, %25 : vector<16x128xf32>
    %c64 = arith.constant 64 : index
    %c0_11 = arith.constant 0 : index
    %27 = vector.load %arg6[%c64, %c0_11] : memref<128x128xf32, #tpu.memory_space<vmem>>, vector<16x128xf32>
    tpu.vector_store %arg6[%c64, %c0_11], %26 {strides = array<i32>} : memref<128x128xf32, #tpu.memory_space<vmem>>, vector<16x128xf32>,
    %28 = vector.extract_strided_slice %7 {offsets = [160, 0], sizes = [16, 128], strides = [1, 1]} : vector<256x128xf32> to vector<16x128xf32>
    %29 = vector.extract_strided_slice %7 {offsets = [176, 0], sizes = [16, 128], strides = [1, 1]} : vector<256x128xf32> to vector<16x128xf32>
    %30 = arith.maximumf %28, %29 : vector<16x128xf32>
    %c80 = arith.constant 80 : index
    %c0_12 = arith.constant 0 : index
    %31 = vector.load %arg6[%c80, %c0_12] : memref<128x128xf32, #tpu.memory_space<vmem>>, vector<16x128xf32>
    tpu.vector_store %arg6[%c80, %c0_12], %30 {strides = array<i32>} : memref<128x128xf32, #tpu.memory_space<vmem>>, vector<16x128xf32>,
    %32 = vector.extract_strided_slice %7 {offsets = [192, 0], sizes = [16, 128], strides = [1, 1]} : vector<256x128xf32> to vector<16x128xf32>
    %33 = vector.extract_strided_slice %7 {offsets = [208, 0], sizes = [16, 128], strides = [1, 1]} : vector<256x128xf32> to vector<16x128xf32>
    %34 = arith.maximumf %32, %33 : vector<16x128xf32>
    %c96 = arith.constant 96 : index
    %c0_13 = arith.constant 0 : index
    %35 = vector.load %arg6[%c96, %c0_13] : memref<128x128xf32, #tpu.memory_space<vmem>>, vector<16x128xf32>
    tpu.vector_store %arg6[%c96, %c0_13], %34 {strides = array<i32>} : memref<128x128xf32, #tpu.memory_space<vmem>>, vector<16x128xf32>,
    %36 = vector.extract_strided_slice %7 {offsets = [224, 0], sizes = [16, 128], strides = [1, 1]} : vector<256x128xf32> to vector<16x128xf32>
    %37 = vector.extract_strided_slice %7 {offsets = [240, 0], sizes = [16, 128], strides = [1, 1]} : vector<256x128xf32> to vector<16x128xf32>
    %38 = arith.maximumf %36, %37 : vector<16x128xf32>
    %c112 = arith.constant 112 : index
    %c0_14 = arith.constant 0 : index
    %39 = vector.load %arg6[%c112, %c0_14] : memref<128x128xf32, #tpu.memory_space<vmem>>, vector<16x128xf32>
    tpu.vector_store %arg6[%c112, %c0_14], %38 {strides = array<i32>} : memref<128x128xf32, #tpu.memory_space<vmem>>, vector<16x128xf32>,
    %c0_15 = arith.constant 0 : index
    %c0_16 = arith.constant 0 : index
    %40 = tpu.strided_load %arg6[%c0_15, %c0_16] {strides = array<i32: 2, 1>} : memref<128x128xf32, #tpu.memory_space<vmem>>, vector<64x128xf32>
    %c1 = arith.constant 1 : index
    %c0_17 = arith.constant 0 : index
    %41 = tpu.strided_load %arg6[%c1, %c0_17] {strides = array<i32: 2, 1>} : memref<128x128xf32, #tpu.memory_space<vmem>>, vector<64x128xf32>
    %42 = arith.maximumf %40, %41 : vector<64x128xf32>
    %43 = arith.truncf %42 : vector<64x128xf32> to vector<64x128xbf16>
    %c0_18 = arith.constant 0 : index
    %c0_19 = arith.constant 0 : index
    %44 = vector.load %arg5[%c0_18, %c0_19] : memref<64x128xbf16, #tpu.memory_space<vmem>>, vector<64x128xbf16>
    tpu.vector_store %arg5[%c0_18, %c0_19], %43 {strides = array<i32>} : memref<64x128xbf16, #tpu.memory_space<vmem>>, vector<64x128xbf16>,
    return
  }
  func.func @transform_0(%arg0: i32, %arg1: i32) -> (i32, i32) {
    %c0_i32 = arith.constant 0 : i32
    %c0_i32_0 = arith.constant 0 : i32
    return %arg0, %c0_i32 : i32, i32
  }
  func.func @transform_1(%arg0: i32, %arg1: i32) -> (i32, i32) {
    %c0_i32 = arith.constant 0 : i32
    %c0_i32_0 = arith.constant 0 : i32
    return %c0_i32, %arg1 : i32, i32
  }
  func.func @transform_2(%arg0: i32, %arg1: i32) -> (i32, i32) {
    %c0_i32 = arith.constant 0 : i32
    %c0_i32_0 = arith.constant 0 : i32
    return %c0_i32, %arg1 : i32, i32
  }
  func.func @transform_3(%arg0: i32, %arg1: i32) -> (i32, i32) {
    %c0_i32 = arith.constant 0 : i32
    return %arg0, %arg1 : i32, i32
  }
}

module attributes {stable_mosaic.version = 11 : i64} {
  func.func @_conv_relu_pool_kernel(%arg0: i32, %arg1: i32, %arg2: memref<64x896xbf16, #tpu.memory_space<vmem>>, %arg3: memref<896x128xbf16, #tpu.memory_space<vmem>>, %arg4: memref<1x128xf32, #tpu.memory_space<vmem>>, %arg5: memref<16x128xbf16, #tpu.memory_space<vmem>>, %arg6: memref<32x128xf32, #tpu.memory_space<vmem>>) attributes {dimension_semantics = [#tpu.dimension_semantics<parallel>, #tpu.dimension_semantics<parallel>], iteration_bounds = array<i64: 2, 1>, scalar_prefetch = 0 : i64, scratch_operands = 1 : i64, tpu.core_type = #tpu.core_type<tc>, window_params = [{transform_indices = @transform_0, window_bounds = array<i64: 64, 896>}, {transform_indices = @transform_1, window_bounds = array<i64: 896, 128>}, {transform_indices = @transform_2, window_bounds = array<i64: 1, 128>}, {transform_indices = @transform_3, window_bounds = array<i64: 16, 128>}]} {
    %c0 = arith.constant 0 : index
    %c0_0 = arith.constant 0 : index
    %0 = vector.load %arg2[%c0, %c0_0] : memref<64x896xbf16, #tpu.memory_space<vmem>>, vector<64x896xbf16>
    %c0_1 = arith.constant 0 : index
    %c0_2 = arith.constant 0 : index
    %1 = vector.load %arg3[%c0_1, %c0_2] : memref<896x128xbf16, #tpu.memory_space<vmem>>, vector<896x128xbf16>
    %cst = arith.constant dense<0.000000e+00> : vector<64x128xf32>
    %2 = tpu.matmul %0, %1, %cst {dimension_numbers = #tpu.dot_dimension_numbers<[1], [0], [0], [1], [0, 0, 1, 1], [], []>} : vector<64x896xbf16>, vector<896x128xbf16>, vector<64x128xf32> -> vector<64x128xf32>
    %c0_3 = arith.constant 0 : index
    %c0_4 = arith.constant 0 : index
    %3 = vector.load %arg4[%c0_3, %c0_4] : memref<1x128xf32, #tpu.memory_space<vmem>>, vector<1x128xf32>
    %4 = vector.broadcast %3 : vector<1x128xf32> to vector<64x128xf32>
    %5 = arith.addf %2, %4 : vector<64x128xf32>
    %cst_5 = arith.constant 0.000000e+00 : f32
    %6 = vector.broadcast %cst_5 : f32 to vector<64x128xf32>
    %7 = arith.maximumf %5, %6 : vector<64x128xf32>
    %8 = vector.extract_strided_slice %7 {offsets = [0, 0], sizes = [8, 128], strides = [1, 1]} : vector<64x128xf32> to vector<8x128xf32>
    %9 = vector.extract_strided_slice %7 {offsets = [8, 0], sizes = [8, 128], strides = [1, 1]} : vector<64x128xf32> to vector<8x128xf32>
    %10 = arith.maximumf %8, %9 : vector<8x128xf32>
    %c0_6 = arith.constant 0 : index
    %c0_7 = arith.constant 0 : index
    %11 = vector.load %arg6[%c0_6, %c0_7] : memref<32x128xf32, #tpu.memory_space<vmem>>, vector<8x128xf32>
    tpu.vector_store %arg6[%c0_6, %c0_7], %10 {strides = array<i32>} : memref<32x128xf32, #tpu.memory_space<vmem>>, vector<8x128xf32>,
    %12 = vector.extract_strided_slice %7 {offsets = [16, 0], sizes = [8, 128], strides = [1, 1]} : vector<64x128xf32> to vector<8x128xf32>
    %13 = vector.extract_strided_slice %7 {offsets = [24, 0], sizes = [8, 128], strides = [1, 1]} : vector<64x128xf32> to vector<8x128xf32>
    %14 = arith.maximumf %12, %13 : vector<8x128xf32>
    %c8 = arith.constant 8 : index
    %c0_8 = arith.constant 0 : index
    %15 = vector.load %arg6[%c8, %c0_8] : memref<32x128xf32, #tpu.memory_space<vmem>>, vector<8x128xf32>
    tpu.vector_store %arg6[%c8, %c0_8], %14 {strides = array<i32>} : memref<32x128xf32, #tpu.memory_space<vmem>>, vector<8x128xf32>,
    %16 = vector.extract_strided_slice %7 {offsets = [32, 0], sizes = [8, 128], strides = [1, 1]} : vector<64x128xf32> to vector<8x128xf32>
    %17 = vector.extract_strided_slice %7 {offsets = [40, 0], sizes = [8, 128], strides = [1, 1]} : vector<64x128xf32> to vector<8x128xf32>
    %18 = arith.maximumf %16, %17 : vector<8x128xf32>
    %c16 = arith.constant 16 : index
    %c0_9 = arith.constant 0 : index
    %19 = vector.load %arg6[%c16, %c0_9] : memref<32x128xf32, #tpu.memory_space<vmem>>, vector<8x128xf32>
    tpu.vector_store %arg6[%c16, %c0_9], %18 {strides = array<i32>} : memref<32x128xf32, #tpu.memory_space<vmem>>, vector<8x128xf32>,
    %20 = vector.extract_strided_slice %7 {offsets = [48, 0], sizes = [8, 128], strides = [1, 1]} : vector<64x128xf32> to vector<8x128xf32>
    %21 = vector.extract_strided_slice %7 {offsets = [56, 0], sizes = [8, 128], strides = [1, 1]} : vector<64x128xf32> to vector<8x128xf32>
    %22 = arith.maximumf %20, %21 : vector<8x128xf32>
    %c24 = arith.constant 24 : index
    %c0_10 = arith.constant 0 : index
    %23 = vector.load %arg6[%c24, %c0_10] : memref<32x128xf32, #tpu.memory_space<vmem>>, vector<8x128xf32>
    tpu.vector_store %arg6[%c24, %c0_10], %22 {strides = array<i32>} : memref<32x128xf32, #tpu.memory_space<vmem>>, vector<8x128xf32>,
    %c0_11 = arith.constant 0 : index
    %c0_12 = arith.constant 0 : index
    %24 = tpu.strided_load %arg6[%c0_11, %c0_12] {strides = array<i32: 2, 1>} : memref<32x128xf32, #tpu.memory_space<vmem>>, vector<16x128xf32>
    %c1 = arith.constant 1 : index
    %c0_13 = arith.constant 0 : index
    %25 = tpu.strided_load %arg6[%c1, %c0_13] {strides = array<i32: 2, 1>} : memref<32x128xf32, #tpu.memory_space<vmem>>, vector<16x128xf32>
    %26 = arith.maximumf %24, %25 : vector<16x128xf32>
    %27 = arith.truncf %26 : vector<16x128xf32> to vector<16x128xbf16>
    %c0_14 = arith.constant 0 : index
    %c0_15 = arith.constant 0 : index
    %28 = vector.load %arg5[%c0_14, %c0_15] : memref<16x128xbf16, #tpu.memory_space<vmem>>, vector<16x128xbf16>
    tpu.vector_store %arg5[%c0_14, %c0_15], %27 {strides = array<i32>} : memref<16x128xbf16, #tpu.memory_space<vmem>>, vector<16x128xbf16>,
    return
  }
  func.func @transform_0(%arg0: i32, %arg1: i32) -> (i32, i32) {
    %c0_i32 = arith.constant 0 : i32
    %c0_i32_0 = arith.constant 0 : i32
    return %arg0, %c0_i32 : i32, i32
  }
  func.func @transform_1(%arg0: i32, %arg1: i32) -> (i32, i32) {
    %c0_i32 = arith.constant 0 : i32
    %c0_i32_0 = arith.constant 0 : i32
    return %c0_i32, %arg1 : i32, i32
  }
  func.func @transform_2(%arg0: i32, %arg1: i32) -> (i32, i32) {
    %c0_i32 = arith.constant 0 : i32
    %c0_i32_0 = arith.constant 0 : i32
    return %c0_i32, %arg1 : i32, i32
  }
  func.func @transform_3(%arg0: i32, %arg1: i32) -> (i32, i32) {
    %c0_i32 = arith.constant 0 : i32
    return %arg0, %arg1 : i32, i32
  }
}

module attributes {stable_mosaic.version = 11 : i64} {
  func.func @_conv_relu_pool_kernel(%arg0: i32, %arg1: i32, %arg2: memref<32x1664xbf16, #tpu.memory_space<vmem>>, %arg3: memref<1664x128xbf16, #tpu.memory_space<vmem>>, %arg4: memref<1x128xf32, #tpu.memory_space<vmem>>, %arg5: memref<8x128xbf16, #tpu.memory_space<vmem>>, %arg6: memref<16x128xf32, #tpu.memory_space<vmem>>) attributes {dimension_semantics = [#tpu.dimension_semantics<parallel>, #tpu.dimension_semantics<parallel>], iteration_bounds = array<i64: 1, 1>, scalar_prefetch = 0 : i64, scratch_operands = 1 : i64, tpu.core_type = #tpu.core_type<tc>, window_params = [{transform_indices = @transform_0, window_bounds = array<i64: 32, 1664>}, {transform_indices = @transform_1, window_bounds = array<i64: 1664, 128>}, {transform_indices = @transform_2, window_bounds = array<i64: 1, 128>}, {transform_indices = @transform_3, window_bounds = array<i64: 8, 128>}]} {
    %c0 = arith.constant 0 : index
    %c0_0 = arith.constant 0 : index
    %0 = vector.load %arg2[%c0, %c0_0] : memref<32x1664xbf16, #tpu.memory_space<vmem>>, vector<32x1664xbf16>
    %c0_1 = arith.constant 0 : index
    %c0_2 = arith.constant 0 : index
    %1 = vector.load %arg3[%c0_1, %c0_2] : memref<1664x128xbf16, #tpu.memory_space<vmem>>, vector<1664x128xbf16>
    %cst = arith.constant dense<0.000000e+00> : vector<32x128xf32>
    %2 = tpu.matmul %0, %1, %cst {dimension_numbers = #tpu.dot_dimension_numbers<[1], [0], [0], [1], [0, 0, 1, 1], [], []>} : vector<32x1664xbf16>, vector<1664x128xbf16>, vector<32x128xf32> -> vector<32x128xf32>
    %c0_3 = arith.constant 0 : index
    %c0_4 = arith.constant 0 : index
    %3 = vector.load %arg4[%c0_3, %c0_4] : memref<1x128xf32, #tpu.memory_space<vmem>>, vector<1x128xf32>
    %4 = vector.broadcast %3 : vector<1x128xf32> to vector<32x128xf32>
    %5 = arith.addf %2, %4 : vector<32x128xf32>
    %cst_5 = arith.constant 0.000000e+00 : f32
    %6 = vector.broadcast %cst_5 : f32 to vector<32x128xf32>
    %7 = arith.maximumf %5, %6 : vector<32x128xf32>
    %8 = vector.extract_strided_slice %7 {offsets = [0, 0], sizes = [4, 128], strides = [1, 1]} : vector<32x128xf32> to vector<4x128xf32>
    %9 = vector.extract_strided_slice %7 {offsets = [4, 0], sizes = [4, 128], strides = [1, 1]} : vector<32x128xf32> to vector<4x128xf32>
    %10 = arith.maximumf %8, %9 : vector<4x128xf32>
    %c0_6 = arith.constant 0 : index
    %c0_7 = arith.constant 0 : index
    %11 = vector.load %arg6[%c0_6, %c0_7] : memref<16x128xf32, #tpu.memory_space<vmem>>, vector<4x128xf32>
    tpu.vector_store %arg6[%c0_6, %c0_7], %10 {strides = array<i32>} : memref<16x128xf32, #tpu.memory_space<vmem>>, vector<4x128xf32>,
    %12 = vector.extract_strided_slice %7 {offsets = [8, 0], sizes = [4, 128], strides = [1, 1]} : vector<32x128xf32> to vector<4x128xf32>
    %13 = vector.extract_strided_slice %7 {offsets = [12, 0], sizes = [4, 128], strides = [1, 1]} : vector<32x128xf32> to vector<4x128xf32>
    %14 = arith.maximumf %12, %13 : vector<4x128xf32>
    %c4 = arith.constant 4 : index
    %c0_8 = arith.constant 0 : index
    %15 = vector.load %arg6[%c4, %c0_8] : memref<16x128xf32, #tpu.memory_space<vmem>>, vector<4x128xf32>
    tpu.vector_store %arg6[%c4, %c0_8], %14 {strides = array<i32>} : memref<16x128xf32, #tpu.memory_space<vmem>>, vector<4x128xf32>,
    %16 = vector.extract_strided_slice %7 {offsets = [16, 0], sizes = [4, 128], strides = [1, 1]} : vector<32x128xf32> to vector<4x128xf32>
    %17 = vector.extract_strided_slice %7 {offsets = [20, 0], sizes = [4, 128], strides = [1, 1]} : vector<32x128xf32> to vector<4x128xf32>
    %18 = arith.maximumf %16, %17 : vector<4x128xf32>
    %c8 = arith.constant 8 : index
    %c0_9 = arith.constant 0 : index
    %19 = vector.load %arg6[%c8, %c0_9] : memref<16x128xf32, #tpu.memory_space<vmem>>, vector<4x128xf32>
    tpu.vector_store %arg6[%c8, %c0_9], %18 {strides = array<i32>} : memref<16x128xf32, #tpu.memory_space<vmem>>, vector<4x128xf32>,
    %20 = vector.extract_strided_slice %7 {offsets = [24, 0], sizes = [4, 128], strides = [1, 1]} : vector<32x128xf32> to vector<4x128xf32>
    %21 = vector.extract_strided_slice %7 {offsets = [28, 0], sizes = [4, 128], strides = [1, 1]} : vector<32x128xf32> to vector<4x128xf32>
    %22 = arith.maximumf %20, %21 : vector<4x128xf32>
    %c12 = arith.constant 12 : index
    %c0_10 = arith.constant 0 : index
    %23 = vector.load %arg6[%c12, %c0_10] : memref<16x128xf32, #tpu.memory_space<vmem>>, vector<4x128xf32>
    tpu.vector_store %arg6[%c12, %c0_10], %22 {strides = array<i32>} : memref<16x128xf32, #tpu.memory_space<vmem>>, vector<4x128xf32>,
    %c0_11 = arith.constant 0 : index
    %c0_12 = arith.constant 0 : index
    %24 = tpu.strided_load %arg6[%c0_11, %c0_12] {strides = array<i32: 2, 1>} : memref<16x128xf32, #tpu.memory_space<vmem>>, vector<8x128xf32>
    %c1 = arith.constant 1 : index
    %c0_13 = arith.constant 0 : index
    %25 = tpu.strided_load %arg6[%c1, %c0_13] {strides = array<i32: 2, 1>} : memref<16x128xf32, #tpu.memory_space<vmem>>, vector<8x128xf32>
    %26 = arith.maximumf %24, %25 : vector<8x128xf32>
    %27 = arith.truncf %26 : vector<8x128xf32> to vector<8x128xbf16>
    %c0_14 = arith.constant 0 : index
    %c0_15 = arith.constant 0 : index
    %28 = vector.load %arg5[%c0_14, %c0_15] : memref<8x128xbf16, #tpu.memory_space<vmem>>, vector<8x128xbf16>
    tpu.vector_store %arg5[%c0_14, %c0_15], %27 {strides = array<i32>} : memref<8x128xbf16, #tpu.memory_space<vmem>>, vector<8x128xbf16>,
    return
  }
  func.func @transform_0(%arg0: i32, %arg1: i32) -> (i32, i32) {
    %c0_i32 = arith.constant 0 : i32
    %c0_i32_0 = arith.constant 0 : i32
    return %arg0, %c0_i32 : i32, i32
  }
  func.func @transform_1(%arg0: i32, %arg1: i32) -> (i32, i32) {
    %c0_i32 = arith.constant 0 : i32
    %c0_i32_0 = arith.constant 0 : i32
    return %c0_i32, %arg1 : i32, i32
  }
  func.func @transform_2(%arg0: i32, %arg1: i32) -> (i32, i32) {
    %c0_i32 = arith.constant 0 : i32
    %c0_i32_0 = arith.constant 0 : i32
    return %c0_i32, %arg1 : i32, i32
  }
  func.func @transform_3(%arg0: i32, %arg1: i32) -> (i32, i32) {
    %c0_i32 = arith.constant 0 : i32
    return %arg0, %arg1 : i32, i32
  }
}

module attributes {stable_mosaic.version = 11 : i64} {
  func.func @_fc_chain_kernel(%arg0: i32, %arg1: memref<8x512xbf16, #tpu.memory_space<vmem>>, %arg2: memref<512x1024xbf16, #tpu.memory_space<vmem>>, %arg3: memref<1x1024xf32, #tpu.memory_space<vmem>>, %arg4: memref<1024x512xbf16, #tpu.memory_space<vmem>>, %arg5: memref<1x512xf32, #tpu.memory_space<vmem>>, %arg6: memref<512x128xbf16, #tpu.memory_space<vmem>>, %arg7: memref<1x128xf32, #tpu.memory_space<vmem>>, %arg8: memref<8x128xf32, #tpu.memory_space<vmem>>) attributes {dimension_semantics = [#tpu.dimension_semantics<parallel>], iteration_bounds = array<i64: 1>, scalar_prefetch = 0 : i64, scratch_operands = 0 : i64, tpu.core_type = #tpu.core_type<tc>, window_params = [{transform_indices = @transform_0, window_bounds = array<i64: 8, 512>}, {pipeline_mode = #tpu.pipeline_mode<synchronous>, transform_indices = @transform_1, window_bounds = array<i64: 512, 1024>}, {pipeline_mode = #tpu.pipeline_mode<synchronous>, transform_indices = @transform_2, window_bounds = array<i64: 1, 1024>}, {pipeline_mode = #tpu.pipeline_mode<synchronous>, transform_indices = @transform_3, window_bounds = array<i64: 1024, 512>}, {pipeline_mode = #tpu.pipeline_mode<synchronous>, transform_indices = @transform_4, window_bounds = array<i64: 1, 512>}, {pipeline_mode = #tpu.pipeline_mode<synchronous>, transform_indices = @transform_5, window_bounds = array<i64: 512, 128>}, {pipeline_mode = #tpu.pipeline_mode<synchronous>, transform_indices = @transform_6, window_bounds = array<i64: 1, 128>}, {transform_indices = @transform_7, window_bounds = array<i64: 8, 128>}]} {
    %c0 = arith.constant 0 : index
    %c0_0 = arith.constant 0 : index
    %0 = vector.load %arg1[%c0, %c0_0] : memref<8x512xbf16, #tpu.memory_space<vmem>>, vector<8x512xbf16>
    %c0_1 = arith.constant 0 : index
    %c0_2 = arith.constant 0 : index
    %1 = vector.load %arg2[%c0_1, %c0_2] : memref<512x1024xbf16, #tpu.memory_space<vmem>>, vector<512x1024xbf16>
    %cst = arith.constant dense<0.000000e+00> : vector<8x1024xf32>
    %2 = tpu.matmul %0, %1, %cst {dimension_numbers = #tpu.dot_dimension_numbers<[1], [0], [0], [1], [0, 0, 1, 1], [], []>} : vector<8x512xbf16>, vector<512x1024xbf16>, vector<8x1024xf32> -> vector<8x1024xf32>
    %c0_3 = arith.constant 0 : index
    %c0_4 = arith.constant 0 : index
    %3 = vector.load %arg3[%c0_3, %c0_4] : memref<1x1024xf32, #tpu.memory_space<vmem>>, vector<1x1024xf32>
    %4 = vector.broadcast %3 : vector<1x1024xf32> to vector<8x1024xf32>
    %5 = arith.addf %2, %4 : vector<8x1024xf32>
    %cst_5 = arith.constant 0.000000e+00 : f32
    %6 = vector.broadcast %cst_5 : f32 to vector<8x1024xf32>
    %7 = arith.maximumf %5, %6 : vector<8x1024xf32>
    %8 = arith.truncf %7 : vector<8x1024xf32> to vector<8x1024xbf16>
    %c0_6 = arith.constant 0 : index
    %c0_7 = arith.constant 0 : index
    %9 = vector.load %arg4[%c0_6, %c0_7] : memref<1024x512xbf16, #tpu.memory_space<vmem>>, vector<1024x512xbf16>
    %cst_8 = arith.constant dense<0.000000e+00> : vector<8x512xf32>
    %10 = tpu.matmul %8, %9, %cst_8 {dimension_numbers = #tpu.dot_dimension_numbers<[1], [0], [0], [1], [0, 0, 1, 1], [], []>} : vector<8x1024xbf16>, vector<1024x512xbf16>, vector<8x512xf32> -> vector<8x512xf32>
    %c0_9 = arith.constant 0 : index
    %c0_10 = arith.constant 0 : index
    %11 = vector.load %arg5[%c0_9, %c0_10] : memref<1x512xf32, #tpu.memory_space<vmem>>, vector<1x512xf32>
    %12 = vector.broadcast %11 : vector<1x512xf32> to vector<8x512xf32>
    %13 = arith.addf %10, %12 : vector<8x512xf32>
    %cst_11 = arith.constant 0.000000e+00 : f32
    %14 = vector.broadcast %cst_11 : f32 to vector<8x512xf32>
    %15 = arith.maximumf %13, %14 : vector<8x512xf32>
    %16 = arith.truncf %15 : vector<8x512xf32> to vector<8x512xbf16>
    %c0_12 = arith.constant 0 : index
    %c0_13 = arith.constant 0 : index
    %17 = vector.load %arg6[%c0_12, %c0_13] : memref<512x128xbf16, #tpu.memory_space<vmem>>, vector<512x128xbf16>
    %cst_14 = arith.constant dense<0.000000e+00> : vector<8x128xf32>
    %18 = tpu.matmul %16, %17, %cst_14 {dimension_numbers = #tpu.dot_dimension_numbers<[1], [0], [0], [1], [0, 0, 1, 1], [], []>} : vector<8x512xbf16>, vector<512x128xbf16>, vector<8x128xf32> -> vector<8x128xf32>
    %c0_15 = arith.constant 0 : index
    %c0_16 = arith.constant 0 : index
    %19 = vector.load %arg7[%c0_15, %c0_16] : memref<1x128xf32, #tpu.memory_space<vmem>>, vector<1x128xf32>
    %20 = vector.broadcast %19 : vector<1x128xf32> to vector<8x128xf32>
    %21 = arith.addf %18, %20 : vector<8x128xf32>
    %c0_17 = arith.constant 0 : index
    %c0_18 = arith.constant 0 : index
    %22 = vector.load %arg8[%c0_17, %c0_18] : memref<8x128xf32, #tpu.memory_space<vmem>>, vector<8x128xf32>
    tpu.vector_store %arg8[%c0_17, %c0_18], %21 {strides = array<i32>} : memref<8x128xf32, #tpu.memory_space<vmem>>, vector<8x128xf32>,
    return
  }
  func.func @transform_0(%arg0: i32) -> (i32, i32) {
    %c0_i32 = arith.constant 0 : i32
    %c0_i32_0 = arith.constant 0 : i32
    return %arg0, %c0_i32 : i32, i32
  }
  func.func @transform_1(%arg0: i32) -> (i32, i32) {
    %c0_i32 = arith.constant 0 : i32
    %c0_i32_0 = arith.constant 0 : i32
    %c0_i32_1 = arith.constant 0 : i32
    return %c0_i32, %c0_i32_0 : i32, i32
  }
  func.func @transform_2(%arg0: i32) -> (i32, i32) {
    %c0_i32 = arith.constant 0 : i32
    %c0_i32_0 = arith.constant 0 : i32
    %c0_i32_1 = arith.constant 0 : i32
    return %c0_i32, %c0_i32_0 : i32, i32
  }
  func.func @transform_3(%arg0: i32) -> (i32, i32) {
    %c0_i32 = arith.constant 0 : i32
    %c0_i32_0 = arith.constant 0 : i32
    %c0_i32_1 = arith.constant 0 : i32
    return %c0_i32, %c0_i32_0 : i32, i32
  }
  func.func @transform_4(%arg0: i32) -> (i32, i32) {
    %c0_i32 = arith.constant 0 : i32
    %c0_i32_0 = arith.constant 0 : i32
    %c0_i32_1 = arith.constant 0 : i32
    return %c0_i32, %c0_i32_0 : i32, i32
  }
  func.func @transform_5(%arg0: i32) -> (i32, i32) {
    %c0_i32 = arith.constant 0 : i32
    %c0_i32_0 = arith.constant 0 : i32
    %c0_i32_1 = arith.constant 0 : i32
    return %c0_i32, %c0_i32_0 : i32, i32
  }
  func.func @transform_6(%arg0: i32) -> (i32, i32) {
    %c0_i32 = arith.constant 0 : i32
    %c0_i32_0 = arith.constant 0 : i32
    %c0_i32_1 = arith.constant 0 : i32
    return %c0_i32, %c0_i32_0 : i32, i32
  }
  func.func @transform_7(%arg0: i32) -> (i32, i32) {
    %c0_i32 = arith.constant 0 : i32
    %c0_i32_0 = arith.constant 0 : i32
    return %arg0, %c0_i32 : i32, i32
  }
}

</mosaic_0001>

<bundles_post_ra>
// kernel: convnet_forward.4
= control target key start
LH: loop header
LB: loop body
LE: loop exit
PB: predicated region body
PF: predicated region fallthrough
CT: control target
= control target key end

     0   :  { %s1088_s12 = smov 0   ;;  %s1090_s13 = smov 0   ;;  %s1219_s0 = inlined_call_operand.vmem [shape: bf16[512,128], index: 0, kind: input, shape index: {}]   ;;  %s1220_s1 = inlined_call_operand.vmem [shape: bf16[128,128], index: 1, kind: input, shape index: {}]   ;;  %s1221_s2 = inlined_call_operand.vmem [shape: f32[1,128], index: 2, kind: input, shape index: {}]   ;;  %s1222_s3 = inlined_call_operand.vmem [shape: bf16[128,128], index: 3, kind: output, shape index: {}]  }
   0x1   :  { %s1092_s14 = smov 0  }
   0x2 LB: > { %s25_s15 = sadd.s32 1, %s1062_s13  ;;  %p837_p0 = scmp.ge.s32.totalorder %s1066_s14, 1  ;;  %s1066_s14 = sphi %s1092_s14, %s13_s14   ;;  %s1062_s13 = sphi %s1090_s13, %s1225_s13   ;;  %s1058_s12 = sphi %s1088_s12, %s1224_s12  }
   0x3   : > { %p27_p1 = scmp.ge.s32.totalorder %s25_s15, 2  ;;  %p169_p2 = scmp.lt.s32.totalorder %s1066_s14, 3 }
   0x5   : > { %s1227_s15 = smov (%p27_p1, %s25_s15), 0  ;;  %p170_p3 = pnand %p837_p0, %p169_p2 }
   0x6   : > { %v1020_v0 = vld [vmem:[%s1220_s1] sm:$0xff] (!%p170_p3)   ;;  %s838_s18 = sshll.u32 (!%p170_p3), %s1058_s12, 5  ;;  %v1021_v1 = vld [vmem:[%s1220_s1 + $0x8] sm:$0xff] (!%p170_p3)   ;;  %v1022_v2 = vld [vmem:[%s1220_s1 + $0x10] sm:$0xff] (!%p170_p3)   ;;  %s840_s16 = sshll.u32 (!%p170_p3), %s1058_s12, 3 }
   0x7   : > { %173 = sbr.rel (%p170_p3) target bundleno = 299 (0x12b), region = 32  ;;  %p204_p4 = scmp.lt.s32.totalorder (!%p170_p3), %s838_s18, 63  ;;  %932 = vmatprep.subr.bf16.mxu0 (!%p170_p3), %v1020_v0  ;;  %980 = vmatprep.subr.bf16.mxu1 (!%p170_p3), %v1020_v0  ;;  %v1023_v3 = vld [vmem:[%s1220_s1 + $0x18] sm:$0xff] (!%p170_p3)   ;;  %v1024_v6 = vld [vmem:[%s1220_s1 + $0x20] sm:$0xff] (!%p170_p3)   ;;  %v1025_v7 = vld [vmem:[%s1220_s1 + $0x28] sm:$0xff] (!%p170_p3)  }
   0x8   : > { %933 = vmatpush3.bf16.msra.mxu0 (!%p170_p3), %v1020_v0  ;;  %988 = vmatpush3.bf16.msra.mxu1 (!%p170_p3), %v1020_v0  ;;  %v1026_v8 = vld [vmem:[%s1220_s1 + $0x30] sm:$0xff] (!%p170_p3)   ;;  %v1027_v9 = vld [vmem:[%s1220_s1 + $0x38] sm:$0xff] (!%p170_p3)   ;;  %v1157_v24 = vld [vmem:[%s1221_s2] ss:$0 sm:$0xff] (!%p170_p3)  ;;  %p1176_p5 = scmp.lt.s32.totalorder (!%p170_p3), %s840_s16, 15 }
   0x9   : > { %934 = vmatprep.subr.bf16.mxu0 (!%p170_p3), %v1021_v1  ;;  %981 = vmatprep.subr.bf16.mxu1 (!%p170_p3), %v1021_v1 }
   0xc   : > { %935 = vmatpush3.bf16.msra.mxu0 (!%p170_p3), %v1021_v1  ;;  %989 = vmatpush3.bf16.msra.mxu1 (!%p170_p3), %v1021_v1 }
   0xd   : > { %936 = vmatprep.subr.bf16.mxu0 (!%p170_p3), %v1022_v2  ;;  %982 = vmatprep.subr.bf16.mxu1 (!%p170_p3), %v1022_v2 }
   0xe   : > { %s1229_s18 = smov (!%p204_p4, %s838_s18), 63  ;;  %s1231_s16 = smov (!%p1176_p5, %s840_s16), 15 }
   0xf   : > { %s839_s23 = sshll.u32 %s1229_s18, 2  ;;  %s841_s12 = sshll.u32 %s1231_s16, 2 }
  0x10   : > { %s1121_s26 = scalar_lea.vmem %s1219_s0, %s839_s23  ;;  %937 = vmatpush3.bf16.msra.mxu0 %v1022_v2  ;;  %990 = vmatpush3.bf16.msra.mxu1 %v1022_v2  ;;  %s1198_s20 = scalar_lea.vmem %s1222_s3, %s841_s12 }
  0x11   : > { %v1028_v4 = vld [vmem:[%s1121_s26] sm:$0xff]   ;;  %938 = vmatprep.subr.bf16.mxu0 %v1023_v3  ;;  %983 = vmatprep.subr.bf16.mxu1 %v1023_v3  ;;  %v1030_v10 = vld [vmem:[%s1121_s26 + $0x8] sm:$0xff]   ;;  %v1032_v12 = vld [vmem:[%s1121_s26 + $0x10] sm:$0xff]  }
  0x12   : > { %v1029_v5 = vld [vmem:[%s1121_s26 + $0x40] sm:$0xff]   ;;  %948 = vmatprep.mubr.bf16.mxu0 %v1028_v4  ;;  %v1031_v11 = vld [vmem:[%s1121_s26 + $0x48] sm:$0xff]   ;;  %v1033_v13 = vld [vmem:[%s1121_s26 + $0x50] sm:$0xff]  }
  0x13   : > { %964 = vmatprep.mubr.bf16.mxu1 %v1029_v5  ;;  %v1034_v14 = vld [vmem:[%s1121_s26 + $0x18] sm:$0xff]   ;;  %v1036_v16 = vld [vmem:[%s1121_s26 + $0x20] sm:$0xff]   ;;  %v1038_v18 = vld [vmem:[%s1121_s26 + $0x28] sm:$0xff]  }
  0x14   : > { %939 = vmatpush3.bf16.msra.mxu0 %v1023_v3  ;;  %991 = vmatpush3.bf16.msra.mxu1 %v1023_v3  ;;  %v1035_v15 = vld [vmem:[%s1121_s26 + $0x58] sm:$0xff]   ;;  %v1037_v17 = vld [vmem:[%s1121_s26 + $0x60] sm:$0xff]   ;;  %v1039_v19 = vld [vmem:[%s1121_s26 + $0x68] sm:$0xff]  }
  0x15   : > { %940 = vmatprep.subr.bf16.mxu0 %v1024_v6  ;;  %984 = vmatprep.subr.bf16.mxu1 %v1024_v6  ;;  %v1040_v20 = vld [vmem:[%s1121_s26 + $0x30] sm:$0xff]   ;;  %v1042_v22 = vld [vmem:[%s1121_s26 + $0x38] sm:$0xff]  }
  0x16   : > { %v1041_v21 = vld [vmem:[%s1121_s26 + $0x70] sm:$0xff]   ;;  %v1043_v23 = vld [vmem:[%s1121_s26 + $0x78] sm:$0xff]  }
  0x18   : > { %941 = vmatpush3.bf16.msra.mxu0 %v1024_v6  ;;  %992 = vmatpush3.bf16.msra.mxu1 %v1024_v6 }
  0x19   : > { %942 = vmatprep.subr.bf16.mxu0 %v1025_v7  ;;  %985 = vmatprep.subr.bf16.mxu1 %v1025_v7 }
  0x1c   : > { %943 = vmatpush3.bf16.msra.mxu0 %v1025_v7  ;;  %993 = vmatpush3.bf16.msra.mxu1 %v1025_v7 }
  0x1d   : > { %944 = vmatprep.subr.bf16.mxu0 %v1026_v8  ;;  %986 = vmatprep.subr.bf16.mxu1 %v1026_v8 }
  0x20   : > { %945 = vmatpush3.bf16.msra.mxu0 %v1026_v8  ;;  %994 = vmatpush3.bf16.msra.mxu1 %v1026_v8 }
  0x21   : > { %946 = vmatprep.subr.bf16.mxu0 %v1027_v9  ;;  %987 = vmatprep.subr.bf16.mxu1 %v1027_v9 }
  0x24   : > { %947 = vmatpush3.bf16.msra.mxu0 %v1027_v9  ;;  %995 = vmatpush3.bf16.msra.mxu1 %v1027_v9 }
  0x27   : > { %949 = vmatmul.mubr.bf16.vlgmr.msra.gmra.mrb[0].mxu0 %v1030_v10  ;;  %965 = vmatmul.mubr.bf16.vlgmr.msra.gmra.mrb[0].mxu1 %v1031_v11 }
  0x28   : > { %952 = vmatprep.mubr.bf16.mxu0 %v1032_v12  ;;  %968 = vmatprep.mubr.bf16.mxu1 %v1033_v13 }
  0x2f   : > { %953 = vmatmul.mubr.bf16.gmra.mrb[4].mxu0 %v1034_v14  ;;  %969 = vmatmul.mubr.bf16.gmra.mrb[4].mxu1 %v1035_v15 }
  0x30   : > { %956 = vmatprep.mubr.bf16.mxu0 %v1036_v16  ;;  %972 = vmatprep.mubr.bf16.mxu1 %v1037_v17 }
  0x37   : > { %957 = vmatmul.mubr.bf16.gmra.mrb[8].mxu0 %v1038_v18  ;;  %973 = vmatmul.mubr.bf16.gmra.mrb[8].mxu1 %v1039_v19 }
  0x38   : > { %960 = vmatprep.mubr.bf16.mxu0 %v1040_v20  ;;  %976 = vmatprep.mubr.bf16.mxu1 %v1041_v21 }
  0x3f   : > { %961 = vmatmul.mubr.bf16.gmra.mrb[12].mxu0 %v1042_v22  ;;  %977 = vmatmul.mubr.bf16.gmra.mrb[12].mxu1 %v1043_v23 }
  0xfa   : > { %v950_v25 = vpop.f32.mrb[0].mxu0  ;;  %v966_v26 = vpop.f32.mrb[0].mxu1 }
  0xfb   : > { %v468_v27 = vadd.f32 %v950_v25, %v1157_v24  ;;  %v532_v28 = vadd.f32 %v966_v26, %v1157_v24  ;;  %v459_v29 = vpop.f32.mrb[1].mxu0  ;;  %v523_v30 = vpop.f32.mrb[1].mxu1 }
  0xfc   : > { %v460_v31 = vadd.f32 %v1157_v24, %v459_v29  ;;  %v524_v32 = vadd.f32 %v1157_v24, %v523_v30  ;;  %v951_v33 = vpop.f32.mrb[2].mxu0  ;;  %v967_v34 = vpop.f32.mrb[2].mxu1 }
  0xfd   : > { %v588_v35 = vmax.f32 %v468_v27, 0.0  ;;  %v604_v36 = vmax.f32 %v532_v28, 0.0  ;;  %v471_v37 = vadd.f32 %v951_v33, %v1157_v24  ;;  %v535_v38 = vadd.f32 %v967_v34, %v1157_v24  ;;  %v462_v39 = vpop.f32.mrb[3].mxu0  ;;  %v526_v40 = vpop.f32.mrb[3].mxu1 }
  0xfe   : > { %v586_v41 = vmax.f32 %v460_v31, 0.0  ;;  %v602_v42 = vmax.f32 %v524_v32, 0.0  ;;  %v463_v43 = vadd.f32 %v1157_v24, %v462_v39  ;;  %v527_v44 = vadd.f32 %v1157_v24, %v526_v40 }
  0xff   : > { %v589_v45 = vmax.f32 %v471_v37, 0.0  ;;  %v605_v46 = vmax.f32 %v535_v38, 0.0 }
 0x100   : > { %v618_v47 = vmax.f32 %v586_v41, %v588_v35  ;;  %v634_v48 = vmax.f32 %v602_v42, %v604_v36  ;;  %v587_v49 = vmax.f32 %v463_v43, 0.0  ;;  %v603_v50 = vmax.f32 %v527_v44, 0.0 }
 0x102   : > { %620 = vst [vmem:[#allocation2] sm:$0xff] %v618_v47  ;;  %636 = vst [vmem:[#allocation2 + $0x40] sm:$0xff] %v634_v48  ;;  %v619_v51 = vmax.f32 %v587_v49, %v589_v45  ;;  %v635_v52 = vmax.f32 %v603_v50, %v605_v46  ;;  %v954_v53 = vpop.f32.mrb[4].mxu0  ;;  %v970_v54 = vpop.f32.mrb[4].mxu1 }
 0x103   : > { %v484_v55 = vadd.f32 %v954_v53, %v1157_v24  ;;  %v548_v56 = vadd.f32 %v970_v54, %v1157_v24  ;;  %v475_v57 = vpop.f32.mrb[5].mxu0  ;;  %v539_v58 = vpop.f32.mrb[5].mxu1 }
 0x104   : > { %621 = vst [vmem:[#allocation2 + $0x8] sm:$0xff] %v619_v51  ;;  %637 = vst [vmem:[#allocation2 + $0x48] sm:$0xff] %v635_v52  ;;  %v476_v59 = vadd.f32 %v1157_v24, %v475_v57  ;;  %v540_v60 = vadd.f32 %v1157_v24, %v539_v58  ;;  %v955_v61 = vpop.f32.mrb[6].mxu0  ;;  %v971_v62 = vpop.f32.mrb[6].mxu1 }
 0x105   : > { %v592_v63 = vmax.f32 %v484_v55, 0.0  ;;  %v608_v0 = vmax.f32 %v548_v56, 0.0  ;;  %v487_v1 = vadd.f32 %v955_v61, %v1157_v24  ;;  %v551_v2 = vadd.f32 %v971_v62, %v1157_v24  ;;  %v478_v3 = vpop.f32.mrb[7].mxu0  ;;  %v542_v4 = vpop.f32.mrb[7].mxu1 }
 0x106   : > { %v590_v5 = vmax.f32 %v476_v59, 0.0  ;;  %v606_v6 = vmax.f32 %v540_v60, 0.0  ;;  %v479_v7 = vadd.f32 %v1157_v24, %v478_v3  ;;  %v543_v8 = vadd.f32 %v1157_v24, %v542_v4 }
 0x107   : > { %v593_v9 = vmax.f32 %v487_v1, 0.0  ;;  %v609_v10 = vmax.f32 %v551_v2, 0.0 }
 0x108   : > { %v622_v11 = vmax.f32 %v590_v5, %v592_v63  ;;  %v638_v12 = vmax.f32 %v606_v6, %v608_v0  ;;  %v591_v13 = vmax.f32 %v479_v7, 0.0  ;;  %v607_v14 = vmax.f32 %v543_v8, 0.0 }
 0x10a   : > { %624 = vst [vmem:[#allocation2 + $0x10] sm:$0xff] %v622_v11  ;;  %640 = vst [vmem:[#allocation2 + $0x50] sm:$0xff] %v638_v12  ;;  %v623_v15 = vmax.f32 %v591_v13, %v593_v9  ;;  %v639_v16 = vmax.f32 %v607_v14, %v609_v10  ;;  %v958_v17 = vpop.f32.mrb[8].mxu0  ;;  %v974_v18 = vpop.f32.mrb[8].mxu1 }
 0x10b   : > { %v500_v19 = vadd.f32 %v958_v17, %v1157_v24  ;;  %v564_v20 = vadd.f32 %v974_v18, %v1157_v24  ;;  %v491_v21 = vpop.f32.mrb[9].mxu0  ;;  %v555_v22 = vpop.f32.mrb[9].mxu1  ;;  %v650_v34 = vld [vmem:[#allocation2] ss:$2 sm:$0xff]  ;;  %v666_v38 = vld [vmem:[#allocation2 + $0x1] ss:$2 sm:$0xff] }
 0x10c   : > { %625 = vst [vmem:[#allocation2 + $0x18] sm:$0xff] %v623_v15  ;;  %641 = vst [vmem:[#allocation2 + $0x58] sm:$0xff] %v639_v16  ;;  %v492_v25 = vadd.f32 %v1157_v24, %v491_v21  ;;  %v959_v26 = vpop.f32.mrb[10].mxu0  ;;  %v975_v27 = vpop.f32.mrb[10].mxu1  ;;  %v556_v29 = vadd.f32 %v1157_v24, %v555_v22  ;;  %v658_v42 = vld [vmem:[#allocation2 + $0x40] ss:$2 sm:$0xff]  ;;  %v681_v57 = vmax.f32 %v650_v34, %v666_v38 }
 0x10d   : > { %v596_v23 = vmax.f32 %v500_v19, 0.0  ;;  %v612_v28 = vmax.f32 %v564_v20, 0.0  ;;  %v503_v30 = vadd.f32 %v959_v26, %v1157_v24  ;;  %v567_v31 = vadd.f32 %v975_v27, %v1157_v24  ;;  %v494_v32 = vpop.f32.mrb[11].mxu0  ;;  %v558_v33 = vpop.f32.mrb[11].mxu1  ;;  %v674_v43 = vld [vmem:[#allocation2 + $0x41] ss:$2 sm:$0xff] }
 0x10e   : > { %v594_v35 = vmax.f32 %v492_v25, 0.0  ;;  %v495_v36 = vadd.f32 %v1157_v24, %v494_v32  ;;  %v559_v37 = vadd.f32 %v1157_v24, %v558_v33  ;;  %v610_v39 = vmax.f32 %v556_v29, 0.0 }
 0x10f   : > { %v597_v40 = vmax.f32 %v503_v30, 0.0  ;;  %v613_v41 = vmax.f32 %v567_v31, 0.0  ;;  %v685_v58 = vmax.f32 %v658_v42, %v674_v43 }
 0x110   : > { %v626_v44 = vmax.f32 %v594_v35, %v596_v23  ;;  %v595_v45 = vmax.f32 %v495_v36, 0.0  ;;  %v611_v46 = vmax.f32 %v559_v37, 0.0  ;;  %v642_v47 = vmax.f32 %v610_v39, %v612_v28 }
 0x112   : > { %v962_v48 = vpop.f32.mrb[12].mxu0  ;;  %v978_v49 = vpop.f32.mrb[12].mxu1  ;;  %628 = vst [vmem:[#allocation2 + $0x20] sm:$0xff] %v626_v44  ;;  %v627_v53 = vmax.f32 %v595_v45, %v597_v40  ;;  %v643_v54 = vmax.f32 %v611_v46, %v613_v41  ;;  %644 = vst [vmem:[#allocation2 + $0x60] sm:$0xff] %v642_v47 }
 0x113   : > { %v652_v50 = vld [vmem:[#allocation2 + $0x10] ss:$2 sm:$0xff]  ;;  %v668_v51 = vld [vmem:[#allocation2 + $0x11] ss:$2 sm:$0xff]  ;;  %v516_v55 = vadd.f32 %v962_v48, %v1157_v24  ;;  %v580_v56 = vadd.f32 %v978_v49, %v1157_v24  ;;  %v507_v61 = vpop.f32.mrb[13].mxu0  ;;  %v571_v62 = vpop.f32.mrb[13].mxu1 }
 0x114   : > { %v660_v52 = vld [vmem:[#allocation2 + $0x50] ss:$2 sm:$0xff]  ;;  %v682_v59 = vmax.f32 %v652_v50, %v668_v51  ;;  %v676_v60 = vld [vmem:[#allocation2 + $0x51] ss:$2 sm:$0xff]  ;;  %629 = vst [vmem:[#allocation2 + $0x28] sm:$0xff] %v627_v53  ;;  %645 = vst [vmem:[#allocation2 + $0x68] sm:$0xff] %v643_v54  ;;  %v508_v2 = vadd.f32 %v1157_v24, %v507_v61  ;;  %v572_v6 = vadd.f32 %v1157_v24, %v571_v62 }
 0x115   : > { %v686_v63 = vmax.f32 %v660_v52, %v676_v60  ;;  %v600_v0 = vmax.f32 %v516_v55, 0.0  ;;  %v616_v1 = vmax.f32 %v580_v56, 0.0  ;;  %v963_v3 = vpop.f32.mrb[14].mxu0  ;;  %v979_v4 = vpop.f32.mrb[14].mxu1 }
 0x116   : > { %v888_v5 = vpack.c.bf16 %v682_v59, %v681_v57  ;;  %v519_v7 = vadd.f32 %v963_v3, %v1157_v24  ;;  %v583_v8 = vadd.f32 %v979_v4, %v1157_v24  ;;  %v510_v9 = vpop.f32.mrb[15].mxu0  ;;  %v574_v10 = vpop.f32.mrb[15].mxu1  ;;  %v598_v12 = vmax.f32 %v508_v2, 0.0 }
 0x117   : > { %v898_v11 = vpack.c.bf16 %v686_v63, %v685_v58  ;;  %v511_v13 = vadd.f32 %v1157_v24, %v510_v9  ;;  %v575_v14 = vadd.f32 %v1157_v24, %v574_v10  ;;  %v614_v15 = vmax.f32 %v572_v6, 0.0 }
 0x118   : > { %889 = vst [vmem:[%s1198_s20] sm:$0xff] %v888_v5   ;;  %v601_v16 = vmax.f32 %v519_v7, 0.0  ;;  %v617_v17 = vmax.f32 %v583_v8, 0.0  ;;  %v630_v18 = vmax.f32 %v598_v12, %v600_v0 }
 0x119   : > { %906 = vst [vmem:[%s1198_s20 + $0x10] sm:$0xff] %v898_v11   ;;  %v599_v19 = vmax.f32 %v511_v13, 0.0  ;;  %v615_v20 = vmax.f32 %v575_v14, 0.0  ;;  %v646_v21 = vmax.f32 %v614_v15, %v616_v1 }
 0x11a   : > { %632 = vst [vmem:[#allocation2 + $0x30] sm:$0xff] %v630_v18 }
 0x11b   : > { %v631_v22 = vmax.f32 %v599_v19, %v601_v16  ;;  %v647_v23 = vmax.f32 %v615_v20, %v617_v17  ;;  %648 = vst [vmem:[#allocation2 + $0x70] sm:$0xff] %v646_v21  ;;  %v654_v25 = vld [vmem:[#allocation2 + $0x20] ss:$2 sm:$0xff]  ;;  %v670_v26 = vld [vmem:[#allocation2 + $0x21] ss:$2 sm:$0xff] }
 0x11c   : > { %v662_v24 = vld [vmem:[#allocation2 + $0x60] ss:$2 sm:$0xff]  ;;  %v678_v27 = vld [vmem:[#allocation2 + $0x61] ss:$2 sm:$0xff]  ;;  %v683_v31 = vmax.f32 %v654_v25, %v670_v26 }
 0x11d   : > { %633 = vst [vmem:[#allocation2 + $0x38] sm:$0xff] %v631_v22  ;;  %649 = vst [vmem:[#allocation2 + $0x78] sm:$0xff] %v647_v23  ;;  %v687_v34 = vmax.f32 %v662_v24, %v678_v27 }
 0x124   : > { %v656_v28 = vld [vmem:[#allocation2 + $0x30] ss:$2 sm:$0xff]  ;;  %v672_v29 = vld [vmem:[#allocation2 + $0x31] ss:$2 sm:$0xff] }
 0x125   : > { %v664_v30 = vld [vmem:[#allocation2 + $0x70] ss:$2 sm:$0xff]  ;;  %v684_v32 = vmax.f32 %v656_v28, %v672_v29  ;;  %v680_v33 = vld [vmem:[#allocation2 + $0x71] ss:$2 sm:$0xff] }
 0x126   : > { %v688_v35 = vmax.f32 %v664_v30, %v680_v33 }
 0x127   : > { %v893_v36 = vpack.c.bf16 %v684_v32, %v683_v31 }
 0x128   : > { %v903_v37 = vpack.c.bf16 %v688_v35, %v687_v34 }
 0x129   : > { %905 = vst [vmem:[%s1198_s20 + $0x8] sm:$0xff] %v893_v36  }
 0x12a   : > { %907 = vst [vmem:[%s1198_s20 + $0x18] sm:$0xff] %v903_v37  }
 0x12b PF: > { %s13_s14 = sadd.s32 1, %s1066_s14   ;;  %s1224_s12 = smov %s1062_s13 }
 0x12c   : > { %p10_p6 = scmp.ge.s32.totalorder %s13_s14, 4   ;;  %s1225_s13 = smov %s1227_s15 }
 0x12e   :  { %12 = sbr.rel (!%p10_p6) target bundleno = 2 (0x2), region = 83 }

// kernel: convnet_forward.5
= control target key start
LH: loop header
LB: loop body
LE: loop exit
PB: predicated region body
PF: predicated region fallthrough
CT: control target
= control target key end

     0   :  { %s1685_s12 = smov 0   ;;  %s1687_s13 = smov 0   ;;  %s1923_s0 = inlined_call_operand.vmem [shape: bf16[128,896], index: 0, kind: input, shape index: {}]   ;;  %s1924_s1 = inlined_call_operand.vmem [shape: bf16[896,128], index: 1, kind: input, shape index: {}]   ;;  %s1925_s2 = inlined_call_operand.vmem [shape: f32[1,128], index: 2, kind: input, shape index: {}]   ;;  %s1926_s3 = inlined_call_operand.vmem [shape: bf16[32,128], index: 3, kind: output, shape index: {}]  }
   0x1   :  { %s1689_s14 = smov 0  }
   0x2 LB: > { %s25_s15 = sadd.s32 1, %s1659_s13  ;;  %p1263_p0 = scmp.ge.s32.totalorder %s1663_s14, 1  ;;  %s1663_s14 = sphi %s1689_s14, %s13_s14   ;;  %s1659_s13 = sphi %s1687_s13, %s1928_s13   ;;  %s1655_s12 = sphi %s1685_s12, %s1927_s12  }
   0x3   : > { %p27_p1 = scmp.ge.s32.totalorder %s25_s15, 2  ;;  %p170_p2 = scmp.lt.s32.totalorder %s1663_s14, 3 }
   0x5   : > { %s1930_s15 = smov (%p27_p1, %s25_s15), 0  ;;  %p171_p3 = pnand %p1263_p0, %p170_p2 }
   0x6   : > { %v1545_v0 = vld [vmem:[%s1924_s1 + $0x40] sm:$0xff] (!%p171_p3)   ;;  %v1549_v4 = vld [vmem:[%s1924_s1 + $0x48] sm:$0xff] (!%p171_p3)   ;;  %v1553_v8 = vld [vmem:[%s1924_s1 + $0x50] sm:$0xff] (!%p171_p3)   ;;  %s1264_s21 = sshll.u32 (!%p171_p3), %s1655_s12, 3 }
   0x7   : > { %174 = sbr.rel (%p171_p3) target bundleno = 333 (0x14d), region = 32  ;;  %v1546_v1 = vld [vmem:[%s1924_s1] sm:$0xff] (!%p171_p3)   ;;  %1364 = vmatprep.subr.bf16.mxu0 (!%p171_p3), %v1545_v0  ;;  %v1550_v5 = vld [vmem:[%s1924_s1 + $0x8] sm:$0xff] (!%p171_p3)   ;;  %v1554_v9 = vld [vmem:[%s1924_s1 + $0x10] sm:$0xff] (!%p171_p3)   ;;  %p206_p4 = scmp.lt.s32.totalorder (!%p171_p3), %s1264_s21, 15 }
   0x8   : > { %v1547_v2 = vld [vmem:[%s1924_s1 + $0xc0] sm:$0xff] (!%p171_p3)   ;;  %1365 = vmatpush3.bf16.msra.mxu0 (!%p171_p3), %v1546_v1  ;;  %v1551_v6 = vld [vmem:[%s1924_s1 + $0xc8] sm:$0xff] (!%p171_p3)   ;;  %v1555_v10 = vld [vmem:[%s1924_s1 + $0xd0] sm:$0xff] (!%p171_p3)  }
   0x9   : > { %v1548_v3 = vld [vmem:[%s1924_s1 + $0x80] sm:$0xff] (!%p171_p3)   ;;  %1404 = vmatprep.subr.bf16.mxu1 (!%p171_p3), %v1547_v2  ;;  %1366 = vmatprep.subr.bf16.mxu0 (!%p171_p3), %v1549_v4  ;;  %v1552_v7 = vld [vmem:[%s1924_s1 + $0x88] sm:$0xff] (!%p171_p3)   ;;  %v1556_v11 = vld [vmem:[%s1924_s1 + $0x90] sm:$0xff] (!%p171_p3)  }
   0xa   : > { %1405 = vmatpush3.bf16.msra.mxu1 (!%p171_p3), %v1548_v3  ;;  %v1557_v12 = vld [vmem:[%s1924_s1 + $0x58] sm:$0xff] (!%p171_p3)   ;;  %v1561_v16 = vld [vmem:[%s1924_s1 + $0x60] sm:$0xff] (!%p171_p3)   ;;  %v1565_v20 = vld [vmem:[%s1924_s1 + $0x68] sm:$0xff] (!%p171_p3)  }
   0xb   : > { %1406 = vmatprep.subr.bf16.mxu1 (!%p171_p3), %v1551_v6  ;;  %v1558_v13 = vld [vmem:[%s1924_s1 + $0x18] sm:$0xff] (!%p171_p3)   ;;  %v1562_v17 = vld [vmem:[%s1924_s1 + $0x20] sm:$0xff] (!%p171_p3)   ;;  %v1566_v21 = vld [vmem:[%s1924_s1 + $0x28] sm:$0xff] (!%p171_p3)  }
   0xc   : > { %1367 = vmatpush3.bf16.msra.mxu0 (!%p171_p3), %v1550_v5  ;;  %v1559_v14 = vld [vmem:[%s1924_s1 + $0xd8] sm:$0xff] (!%p171_p3)   ;;  %v1563_v18 = vld [vmem:[%s1924_s1 + $0xe0] sm:$0xff] (!%p171_p3)   ;;  %v1567_v22 = vld [vmem:[%s1924_s1 + $0xe8] sm:$0xff] (!%p171_p3)  }
   0xd   : > { %1368 = vmatprep.subr.bf16.mxu0 (!%p171_p3), %v1553_v8  ;;  %v1560_v15 = vld [vmem:[%s1924_s1 + $0x98] sm:$0xff] (!%p171_p3)   ;;  %v1564_v19 = vld [vmem:[%s1924_s1 + $0xa0] sm:$0xff] (!%p171_p3)   ;;  %v1568_v23 = vld [vmem:[%s1924_s1 + $0xa8] sm:$0xff] (!%p171_p3)  }
   0xe   : > { %1407 = vmatpush3.bf16.msra.mxu1 %v1552_v7  ;;  %s1932_s21 = smov (!%p206_p4, %s1264_s21), 15  ;;  %v1569_v24 = vld [vmem:[%s1924_s1 + $0x70] sm:$0xff]   ;;  %v1573_v28 = vld [vmem:[%s1924_s1 + $0x78] sm:$0xff]   ;;  %v1580_v34 = vld [vmem:[%s1924_s1 + $0x140] sm:$0xff]  }
   0xf   : > { %1408 = vmatprep.subr.bf16.mxu1 %v1555_v10  ;;  %s1520_s22 = smul.u32 28, %s1932_s21  ;;  %v1570_v25 = vld [vmem:[%s1924_s1 + $0x30] sm:$0xff]   ;;  %v1574_v29 = vld [vmem:[%s1924_s1 + $0x38] sm:$0xff]   ;;  %v1584_v37 = vld [vmem:[%s1924_s1 + $0x100] sm:$0xff]  }
  0x10   : > { %1369 = vmatpush3.bf16.msra.mxu0 %v1554_v9  ;;  %v1571_v26 = vld [vmem:[%s1924_s1 + $0xf0] sm:$0xff]   ;;  %v1575_v30 = vld [vmem:[%s1924_s1 + $0xf8] sm:$0xff]   ;;  %v1585_v38 = vld [vmem:[%s1924_s1 + $0x148] sm:$0xff]  }
  0x11   : > { %1370 = vmatprep.subr.bf16.mxu0 %v1557_v12  ;;  %v1572_v27 = vld [vmem:[%s1924_s1 + $0xb0] sm:$0xff]   ;;  %s1796_s5 = scalar_lea.vmem %s1923_s0, %s1520_s22  ;;  %v1579_v33 = vld [vmem:[%s1924_s1 + $0xb8] sm:$0xff]   ;;  %v1586_v39 = vld [vmem:[%s1924_s1 + $0x180] sm:$0xff]  }
  0x12   : > { %1409 = vmatpush3.bf16.msra.mxu1 %v1556_v11  ;;  %v1576_v31 = vld [vmem:[%s1796_s5] ss:$28 sps:$4 sm:$0xff]   ;;  %v1581_v35 = vld [vmem:[%s1796_s5 + $0x8] ss:$28 sps:$4 sm:$0xff]   ;;  %v1590_v42 = vld [vmem:[%s1796_s5 + $0x38] ss:$28 sps:$4 sm:$0xff]  }
  0x13   : > { %1410 = vmatprep.subr.bf16.mxu1 %v1559_v14  ;;  %v1578_v32 = vld [vmem:[%s1796_s5 + $0x4] ss:$28 sps:$4 sm:$0xff]   ;;  %v1583_v36 = vld [vmem:[%s1796_s5 + $0xc] ss:$28 sps:$4 sm:$0xff]   ;;  %v1588_v41 = vld [vmem:[%s1796_s5 + $0x3c] ss:$28 sps:$4 sm:$0xff]  }
  0x14   : > { %1371 = vmatpush3.bf16.msra.mxu0 %v1558_v13  ;;  %892 = vmatprep.mubr.bf16.mxu0 %v1578_v32  ;;  %v1587_v40 = vld [vmem:[%s1924_s1 + $0x108] sm:$0xff]   ;;  %v1591_v43 = vld [vmem:[%s1924_s1 + $0x150] sm:$0xff]   ;;  %v1593_v45 = vld [vmem:[%s1796_s5 + $0x44] ss:$28 sps:$4 sm:$0xff]  }
  0x15   : > { %1372 = vmatprep.subr.bf16.mxu0 %v1561_v16  ;;  %957 = vmatprep.mubr.bf16.mxu1 %v1583_v36  ;;  %v1592_v44 = vld [vmem:[%s1924_s1 + $0x188] sm:$0xff]   ;;  %v1595_v46 = vld [vmem:[%s1924_s1 + $0x110] sm:$0xff]   ;;  %v1596_v47 = vld [vmem:[%s1796_s5 + $0x40] ss:$28 sps:$4 sm:$0xff]  }
  0x16   : > { %1411 = vmatpush3.bf16.msra.mxu1 %v1560_v15  ;;  %v1597_v48 = vld [vmem:[%s1924_s1 + $0x158] sm:$0xff]   ;;  %v1598_v49 = vld [vmem:[%s1924_s1 + $0x190] sm:$0xff]   ;;  %v1603_v53 = vld [vmem:[%s1924_s1 + $0x160] sm:$0xff]  }
  0x17   : > { %1412 = vmatprep.subr.bf16.mxu1 %v1563_v18  ;;  %v1599_v50 = vld [vmem:[%s1924_s1 + $0x118] sm:$0xff]   ;;  %v1600_v51 = vld [vmem:[%s1796_s5 + $0x74] ss:$28 sps:$4 sm:$0xff]   ;;  %v1607_v56 = vld [vmem:[%s1924_s1 + $0x120] sm:$0xff]  }
  0x18   : > { %1373 = vmatpush3.bf16.msra.mxu0 %v1562_v17  ;;  %v1602_v52 = vld [vmem:[%s1796_s5 + $0x70] ss:$28 sps:$4 sm:$0xff]   ;;  %v1604_v54 = vld [vmem:[%s1924_s1 + $0x198] sm:$0xff]   ;;  %v1610_v59 = vld [vmem:[%s1924_s1 + $0x1a0] sm:$0xff]  }
  0x19   : > { %1374 = vmatprep.subr.bf16.mxu0 %v1565_v20  ;;  %v1605_v55 = vld [vmem:[%s1796_s5 + $0x7c] ss:$28 sps:$4 sm:$0xff]   ;;  %v1609_v58 = vld [vmem:[%s1924_s1 + $0x168] sm:$0xff]   ;;  %v1615_v63 = vld [vmem:[%s1924_s1 + $0x170] sm:$0xff]  }
  0x1a   : > { %1413 = vmatpush3.bf16.msra.mxu1 %v1564_v19  ;;  %v1608_v57 = vld [vmem:[%s1796_s5 + $0x78] ss:$28 sps:$4 sm:$0xff]   ;;  %v1611_v60 = vld [vmem:[%s1924_s1 + $0x128] sm:$0xff]   ;;  %v1633_v15 = vld [vmem:[%s1796_s5 + $0x84] ss:$28 sps:$4 sm:$0xff]  }
  0x1b   : > { %1414 = vmatprep.subr.bf16.mxu1 %v1567_v22  ;;  %v1612_v61 = vld [vmem:[%s1796_s5 + $0xac] ss:$28 sps:$4 sm:$0xff]   ;;  %v1617_v1 = vld [vmem:[%s1796_s5 + $0xb4] ss:$28 sps:$4 sm:$0xff]   ;;  %v1621_v4 = vld [vmem:[%s1924_s1 + $0x178] sm:$0xff]  }
  0x1c   : > { %1375 = vmatpush3.bf16.msra.mxu0 %v1566_v21  ;;  %v1614_v62 = vld [vmem:[%s1796_s5 + $0xa8] ss:$28 sps:$4 sm:$0xff]   ;;  %v1619_v2 = vld [vmem:[%s1924_s1 + $0x130] sm:$0xff]   ;;  %v1623_v6 = vld [vmem:[%s1924_s1 + $0x138] sm:$0xff]  }
  0x1d   : > { %1376 = vmatprep.subr.bf16.mxu0 %v1569_v24  ;;  %v1616_v0 = vld [vmem:[%s1924_s1 + $0x1a8] sm:$0xff]   ;;  %v1622_v5 = vld [vmem:[%s1924_s1 + $0x1b0] sm:$0xff]   ;;  %v1627_v9 = vld [vmem:[%s1924_s1 + $0x1b8] sm:$0xff]  }
  0x1e   : > { %1415 = vmatpush3.bf16.msra.mxu1 %v1568_v23  ;;  %v1620_v3 = vld [vmem:[%s1796_s5 + $0xb0] ss:$28 sps:$4 sm:$0xff]   ;;  %v1628_v10 = vld [vmem:[%s1796_s5 + $0x18] ss:$28 sps:$4 sm:$0xff]   ;;  %v1636_v13 = vld [vmem:[%s1796_s5 + $0x88] ss:$28 sps:$4 sm:$0xff]  }
  0x1f   : > { %1416 = vmatprep.subr.bf16.mxu1 %v1571_v26  ;;  %v1624_v7 = vld [vmem:[%s1796_s5 + $0x10] ss:$28 sps:$4 sm:$0xff]   ;;  %v1632_v14 = vld [vmem:[%s1796_s5 + $0x48] ss:$28 sps:$4 sm:$0xff]   ;;  %v1637_v16 = vld [vmem:[%s1796_s5 + $0xc0] ss:$28 sps:$4 sm:$0xff]  }
  0x20   : > { %1377 = vmatpush3.bf16.msra.mxu0 %v1570_v25  ;;  %v1626_v8 = vld [vmem:[%s1796_s5 + $0x14] ss:$28 sps:$4 sm:$0xff]   ;;  %v1630_v12 = vld [vmem:[%s1796_s5 + $0x4c] ss:$28 sps:$4 sm:$0xff]   ;;  %v1635_v17 = vld [vmem:[%s1796_s5 + $0x80] ss:$28 sps:$4 sm:$0xff]  }
  0x21   : > { %1378 = vmatprep.subr.bf16.mxu0 %v1573_v28  ;;  %v1629_v11 = vld [vmem:[%s1796_s5 + $0x50] ss:$28 sps:$4 sm:$0xff]   ;;  %v1638_v18 = vld [vmem:[%s1796_s5 + $0xbc] ss:$28 sps:$4 sm:$0xff]   ;;  %v1268_v21 = vld [vmem:[%s1925_s2] ss:$0 sm:$0xff] }
  0x22   : > { %1417 = vmatpush3.bf16.msra.mxu1 %v1572_v27  ;;  %v1640_v19 = vld [vmem:[%s1796_s5 + $0xb8] ss:$28 sps:$4 sm:$0xff]   ;;  %s1266_s5 = sshll.u32 %s1655_s12, 1 }
  0x23   : > { %1418 = vmatprep.subr.bf16.mxu1 %v1575_v30  ;;  %p220_p5 = scmp.lt.s32.totalorder %s1266_s5, 3 }
  0x24   : > { %1379 = vmatpush3.bf16.msra.mxu0 %v1574_v29 }
  0x25   : > { %1444 = vmatprep.subr.bf16.mxu0 %v1580_v34  ;;  %s1934_s5 = smov (!%p220_p5, %s1266_s5), 3 }
  0x26   : > { %1419 = vmatpush3.bf16.msra.mxu1 %v1579_v33  ;;  %s1267_s23 = sshll.u32 %s1934_s5, 2 }
  0x27   : > { %893 = vmatmul.mubr.bf16.vlgmr.msra.gmra.mrb[0].mxu0 %v1576_v31  ;;  %1496 = vmatprep.subr.bf16.mxu1 %v1586_v39  ;;  %s226_s26 = scalar_lea.vmem %s1926_s3, %s1267_s23 }
  0x28   : > { %1445 = vmatpush3.bf16.msra.mxu0 %v1584_v37  ;;  %900 = vmatprep.mubr.bf16.mxu0 %v1588_v41 }
  0x29   : > { %958 = vmatmul.mubr.bf16.vlgmr.msra.gmra.mrb[0].mxu1 %v1581_v35  ;;  %1446 = vmatprep.subr.bf16.mxu0 %v1585_v38 }
  0x2a   : > { %1497 = vmatpush3.bf16.msra.mxu1 %v1586_v39  ;;  %965 = vmatprep.mubr.bf16.mxu1 %v1593_v45 }
  0x2b   : > { %1498 = vmatprep.subr.bf16.mxu1 %v1592_v44 }
  0x2c   : > { %1447 = vmatpush3.bf16.msra.mxu0 %v1587_v40 }
  0x2d   : > { %1448 = vmatprep.subr.bf16.mxu0 %v1591_v43 }
  0x2e   : > { %1499 = vmatpush3.bf16.msra.mxu1 %v1592_v44 }
  0x2f   : > { %901 = vmatmul.mubr.bf16.gmra.mrb[4].mxu0 %v1590_v42  ;;  %1500 = vmatprep.subr.bf16.mxu1 %v1598_v49 }
  0x30   : > { %1449 = vmatpush3.bf16.msra.mxu0 %v1595_v46  ;;  %908 = vmatprep.mubr.bf16.mxu0 %v1600_v51 }
  0x31   : > { %966 = vmatmul.mubr.bf16.gmra.mrb[4].mxu1 %v1596_v47  ;;  %1450 = vmatprep.subr.bf16.mxu0 %v1597_v48 }
  0x32   : > { %1501 = vmatpush3.bf16.msra.mxu1 %v1598_v49  ;;  %973 = vmatprep.mubr.bf16.mxu1 %v1605_v55 }
  0x33   : > { %1502 = vmatprep.subr.bf16.mxu1 %v1604_v54 }
  0x34   : > { %1451 = vmatpush3.bf16.msra.mxu0 %v1599_v50 }
  0x35   : > { %1452 = vmatprep.subr.bf16.mxu0 %v1603_v53 }
  0x36   : > { %1503 = vmatpush3.bf16.msra.mxu1 %v1604_v54 }
  0x37   : > { %909 = vmatmul.mubr.bf16.gmra.mrb[8].mxu0 %v1602_v52  ;;  %1504 = vmatprep.subr.bf16.mxu1 %v1610_v59 }
  0x38   : > { %1453 = vmatpush3.bf16.msra.mxu0 %v1607_v56  ;;  %916 = vmatprep.mubr.bf16.mxu0 %v1612_v61 }
  0x39   : > { %974 = vmatmul.mubr.bf16.gmra.mrb[8].mxu1 %v1608_v57  ;;  %1454 = vmatprep.subr.bf16.mxu0 %v1609_v58 }
  0x3a   : > { %1505 = vmatpush3.bf16.msra.mxu1 %v1610_v59  ;;  %981 = vmatprep.mubr.bf16.mxu1 %v1617_v1 }
  0x3b   : > { %1506 = vmatprep.subr.bf16.mxu1 %v1616_v0 }
  0x3c   : > { %1455 = vmatpush3.bf16.msra.mxu0 %v1611_v60 }
  0x3d   : > { %1456 = vmatprep.subr.bf16.mxu0 %v1615_v63 }
  0x3e   : > { %1507 = vmatpush3.bf16.msra.mxu1 %v1616_v0 }
  0x3f   : > { %917 = vmatmul.mubr.bf16.gmra.mrb[12].mxu0 %v1614_v62  ;;  %1508 = vmatprep.subr.bf16.mxu1 %v1622_v5 }
  0x40   : > { %1457 = vmatpush3.bf16.msra.mxu0 %v1619_v2  ;;  %1022 = vmatprep.mubr.bf16.mxu0 %v1626_v8 }
  0x41   : > { %982 = vmatmul.mubr.bf16.gmra.mrb[12].mxu1 %v1620_v3  ;;  %1458 = vmatprep.subr.bf16.mxu0 %v1621_v4 }
  0x42   : > { %1509 = vmatpush3.bf16.msra.mxu1 %v1622_v5  ;;  %1512 = vmatprep.mubr.bf16.mxu1 %v1628_v10 }
  0x43   : > { %1510 = vmatprep.subr.bf16.mxu1 %v1627_v9 }
  0x44   : > { %1459 = vmatpush3.bf16.msra.mxu0 %v1623_v6 }
  0x46   : > { %1511 = vmatpush3.bf16.msra.mxu1 %v1627_v9 }
  0x47   : > { %1023 = vmatmul.mubr.bf16.vlgmr.msra.gmra.mrb[16].mxu0 %v1624_v7 }
  0x48   : > { %1030 = vmatprep.mubr.bf16.mxu0 %v1630_v12 }
  0x49   : > { %1513 = vmatmul.mubr.bf16.vlgmr.msra.gmra.mrb[16].mxu1 %v1629_v11 }
  0x4a   : > { %1516 = vmatprep.mubr.bf16.mxu1 %v1636_v13 }
  0x4f   : > { %1031 = vmatmul.mubr.bf16.gmra.mrb[20].mxu0 %v1632_v14 }
  0x50   : > { %1038 = vmatprep.mubr.bf16.mxu0 %v1633_v15 }
  0x51   : > { %1517 = vmatmul.mubr.bf16.gmra.mrb[20].mxu1 %v1637_v16 }
  0x57   : > { %1039 = vmatmul.mubr.bf16.gmra.mrb[24].mxu0 %v1635_v17 }
  0x58   : > { %1046 = vmatprep.mubr.bf16.mxu0 %v1638_v18 }
  0x5f   : > { %1047 = vmatmul.mubr.bf16.gmra.mrb[28].mxu0 %v1640_v19 }
  0xfa   : > { %v1380_v20 = vpop.f32.mrb[0].mxu0 }
  0xfb   : > { %v1381_v22 = vpop.f32.mrb[1].mxu0 }
  0xfc   : > { %v1382_v23 = vadd.f32 %v1381_v22, %v1380_v20  ;;  %v1383_v24 = vpop.f32.mrb[2].mxu0  ;;  %v1420_v25 = vpop.f32.mrb[0].mxu1 }
  0xfd   : > { %v1384_v26 = vpop.f32.mrb[3].mxu0  ;;  %v1421_v29 = vpop.f32.mrb[1].mxu1 }
  0xfe   : > { %v895_v27 = vadd.f32 %v1382_v23, %v1268_v21  ;;  %v1385_v28 = vadd.f32 %v1384_v26, %v1383_v24  ;;  %v1422_v30 = vadd.f32 %v1421_v29, %v1420_v25  ;;  %v1423_v31 = vpop.f32.mrb[2].mxu1 }
  0xff   : > { %v1424_v33 = vpop.f32.mrb[3].mxu1 }
 0x100   : > { %v898_v32 = vadd.f32 %v1385_v28, %v1268_v21  ;;  %v960_v34 = vadd.f32 %v1422_v30, %v895_v27  ;;  %v1425_v35 = vadd.f32 %v1424_v33, %v1423_v31 }
 0x102   : > { %v1386_v36 = vpop.f32.mrb[4].mxu0  ;;  %v963_v37 = vadd.f32 %v1425_v35, %v898_v32 }
 0x103   : > { %v1387_v38 = vpop.f32.mrb[5].mxu0 }
 0x104   : > { %v1388_v39 = vadd.f32 %v1387_v38, %v1386_v36  ;;  %v1389_v40 = vpop.f32.mrb[6].mxu0  ;;  %v1426_v43 = vpop.f32.mrb[4].mxu1 }
 0x105   : > { %v1390_v41 = vpop.f32.mrb[7].mxu0  ;;  %v1427_v45 = vpop.f32.mrb[5].mxu1 }
 0x106   : > { %v903_v42 = vadd.f32 %v1388_v39, %v1268_v21  ;;  %v1391_v44 = vadd.f32 %v1390_v41, %v1389_v40  ;;  %v1428_v47 = vadd.f32 %v1427_v45, %v1426_v43  ;;  %v1429_v48 = vpop.f32.mrb[6].mxu1 }
 0x107   : > { %v1430_v49 = vpop.f32.mrb[7].mxu1 }
 0x108   : > { %v906_v46 = vadd.f32 %v1391_v44, %v1268_v21  ;;  %v968_v50 = vadd.f32 %v1428_v47, %v903_v42  ;;  %v1431_v51 = vadd.f32 %v1430_v49, %v1429_v48 }
 0x10a   : > { %v1392_v52 = vpop.f32.mrb[8].mxu0  ;;  %v971_v53 = vadd.f32 %v1431_v51, %v906_v46 }
 0x10b   : > { %v1393_v54 = vpop.f32.mrb[9].mxu0 }
 0x10c   : > { %v1394_v55 = vadd.f32 %v1393_v54, %v1392_v52  ;;  %v1395_v56 = vpop.f32.mrb[10].mxu0  ;;  %v1432_v57 = vpop.f32.mrb[8].mxu1 }
 0x10d   : > { %v1396_v58 = vpop.f32.mrb[11].mxu0  ;;  %v1433_v61 = vpop.f32.mrb[9].mxu1 }
 0x10e   : > { %v911_v59 = vadd.f32 %v1394_v55, %v1268_v21  ;;  %v1397_v60 = vadd.f32 %v1396_v58, %v1395_v56  ;;  %v1434_v62 = vadd.f32 %v1433_v61, %v1432_v57  ;;  %v1435_v63 = vpop.f32.mrb[10].mxu1 }
 0x10f   : > { %v1436_v1 = vpop.f32.mrb[11].mxu1 }
 0x110   : > { %v914_v0 = vadd.f32 %v1397_v60, %v1268_v21  ;;  %v976_v2 = vadd.f32 %v1434_v62, %v911_v59  ;;  %v1437_v3 = vadd.f32 %v1436_v1, %v1435_v63 }
 0x112   : > { %v1398_v4 = vpop.f32.mrb[12].mxu0  ;;  %v979_v5 = vadd.f32 %v1437_v3, %v914_v0 }
 0x113   : > { %v1399_v6 = vpop.f32.mrb[13].mxu0 }
 0x114   : > { %v1400_v7 = vadd.f32 %v1399_v6, %v1398_v4  ;;  %v1401_v8 = vpop.f32.mrb[14].mxu0  ;;  %v1438_v11 = vpop.f32.mrb[12].mxu1 }
 0x115   : > { %v1402_v9 = vpop.f32.mrb[15].mxu0  ;;  %v1439_v13 = vpop.f32.mrb[13].mxu1 }
 0x116   : > { %v919_v10 = vadd.f32 %v1400_v7, %v1268_v21  ;;  %v1403_v12 = vadd.f32 %v1402_v9, %v1401_v8  ;;  %v1440_v15 = vadd.f32 %v1439_v13, %v1438_v11  ;;  %v1441_v16 = vpop.f32.mrb[14].mxu1 }
 0x117   : > { %v1442_v17 = vpop.f32.mrb[15].mxu1 }
 0x118   : > { %v922_v14 = vadd.f32 %v1403_v12, %v1268_v21  ;;  %v984_v18 = vadd.f32 %v1440_v15, %v919_v10  ;;  %v1443_v19 = vadd.f32 %v1442_v17, %v1441_v16 }
 0x11a   : > { %v987_v20 = vadd.f32 %v1443_v19, %v922_v14  ;;  %v1460_v22 = vpop.f32.mrb[16].mxu0 }
 0x11b   : > { %v1461_v23 = vpop.f32.mrb[17].mxu0 }
 0x11c   : > { %v1462_v24 = vadd.f32 %v1461_v23, %v1460_v22  ;;  %v1463_v25 = vpop.f32.mrb[18].mxu0  ;;  %v1514_v27 = vpop.f32.mrb[16].mxu1 }
 0x11d   : > { %v1464_v26 = vpop.f32.mrb[19].mxu0  ;;  %v1089_v30 = vpop.f32.mrb[17].mxu1 }
 0x11e   : > { %v1465_v28 = vadd.f32 %v1464_v26, %v1463_v25  ;;  %v1025_v29 = vadd.f32 %v1462_v24, %v960_v34  ;;  %v1515_v31 = vpop.f32.mrb[18].mxu1 }
 0x11f   : > { %v1092_v35 = vpop.f32.mrb[19].mxu1 }
 0x120   : > { %v1090_v32 = vadd.f32 %v1089_v30, %v1025_v29  ;;  %v1028_v33 = vadd.f32 %v1465_v28, %v963_v37 }
 0x122   : > { %v1093_v21 = vadd.f32 %v1092_v35, %v1028_v33  ;;  %v1466_v36 = vpop.f32.mrb[20].mxu0  ;;  %v1120_v39 = vmax.f32 %v1090_v32, 0.0 }
 0x123   : > { %v1467_v38 = vpop.f32.mrb[21].mxu0 }
 0x124   : > { %v1121_v40 = vmax.f32 %v1093_v21, 0.0  ;;  %v1468_v41 = vadd.f32 %v1467_v38, %v1466_v36  ;;  %v1469_v42 = vpop.f32.mrb[22].mxu0  ;;  %v1518_v44 = vpop.f32.mrb[20].mxu1 }
 0x125   : > { %v1470_v43 = vpop.f32.mrb[23].mxu0  ;;  %v1105_v48 = vpop.f32.mrb[21].mxu1 }
 0x126   : > { %v1128_v45 = vmax.f32 %v1120_v39, %v1121_v40  ;;  %v1033_v46 = vadd.f32 %v1468_v41, %v968_v50  ;;  %v1471_v47 = vadd.f32 %v1470_v43, %v1469_v42  ;;  %v1519_v49 = vpop.f32.mrb[22].mxu1 }
 0x127   : > { %v1108_v52 = vpop.f32.mrb[23].mxu1 }
 0x128   : > { %1129 = vst [vmem:[#allocation2] sm:$0xff] %v1128_v45  ;;  %v1098_v34 = vadd.f32 %v1514_v27, %v1033_v46  ;;  %v1036_v51 = vadd.f32 %v1471_v47, %v971_v53 }
 0x12a   : > { %v1101_v37 = vadd.f32 %v1515_v31, %v1036_v51  ;;  %v1472_v54 = vpop.f32.mrb[24].mxu0  ;;  %v1122_v56 = vmax.f32 %v1098_v34, 0.0 }
 0x12b   : > { %v1473_v55 = vpop.f32.mrb[25].mxu0 }
 0x12c   : > { %v1123_v57 = vmax.f32 %v1101_v37, 0.0  ;;  %v1474_v58 = vadd.f32 %v1473_v55, %v1472_v54  ;;  %v1475_v59 = vpop.f32.mrb[26].mxu0 }
 0x12d   : > { %v1476_v60 = vpop.f32.mrb[27].mxu0 }
 0x12e   : > { %v1130_v61 = vmax.f32 %v1122_v56, %v1123_v57  ;;  %v1477_v62 = vadd.f32 %v1476_v60, %v1475_v59  ;;  %v1041_v63 = vadd.f32 %v1474_v58, %v976_v2 }
 0x130   : > { %1131 = vst [vmem:[#allocation2 + $0x8] sm:$0xff] %v1130_v61  ;;  %v1106_v50 = vadd.f32 %v1105_v48, %v1041_v63  ;;  %v1044_v0 = vadd.f32 %v1477_v62, %v979_v5 }
 0x132   : > { %v1109_v1 = vadd.f32 %v1108_v52, %v1044_v0  ;;  %v1478_v3 = vpop.f32.mrb[28].mxu0  ;;  %v1124_v53 = vmax.f32 %v1106_v50, 0.0 }
 0x133   : > { %v1479_v4 = vpop.f32.mrb[29].mxu0 }
 0x134   : > { %v1125_v6 = vmax.f32 %v1109_v1, 0.0  ;;  %v1480_v7 = vadd.f32 %v1479_v4, %v1478_v3  ;;  %v1481_v8 = vpop.f32.mrb[30].mxu0 }
 0x135   : > { %v1482_v9 = vpop.f32.mrb[31].mxu0 }
 0x136   : > { %v1132_v10 = vmax.f32 %v1124_v53, %v1125_v6  ;;  %v1049_v11 = vadd.f32 %v1480_v7, %v984_v18  ;;  %v1483_v12 = vadd.f32 %v1482_v9, %v1481_v8 }
 0x137   : > { %v1136_v17 = vld [vmem:[#allocation2] ss:$2 sm:$0xff]  ;;  %v1140_v19 = vld [vmem:[#allocation2 + $0x1] ss:$2 sm:$0xff] }
 0x138   : > { %1133 = vst [vmem:[#allocation2 + $0x10] sm:$0xff] %v1132_v10  ;;  %v1114_v13 = vadd.f32 %v1518_v44, %v1049_v11  ;;  %v1052_v14 = vadd.f32 %v1483_v12, %v987_v20  ;;  %v1143_v24 = vmax.f32 %v1136_v17, %v1140_v19 }
 0x13a   : > { %v1117_v15 = vadd.f32 %v1519_v49, %v1052_v14  ;;  %v1126_v2 = vmax.f32 %v1114_v13, 0.0 }
 0x13c   : > { %v1127_v16 = vmax.f32 %v1117_v15, 0.0 }
 0x13e   : > { %v1134_v5 = vmax.f32 %v1126_v2, %v1127_v16 }
 0x140   : > { %1135 = vst [vmem:[#allocation2 + $0x18] sm:$0xff] %v1134_v5 }
 0x147   : > { %v1138_v22 = vld [vmem:[#allocation2 + $0x10] ss:$2 sm:$0xff]  ;;  %v1142_v23 = vld [vmem:[#allocation2 + $0x11] ss:$2 sm:$0xff] }
 0x148   : > { %v1144_v25 = vmax.f32 %v1138_v22, %v1142_v23 }
 0x14a   : > { %v1362_v18 = vpack.c.bf16 %v1144_v25, %v1143_v24 }
 0x14c   : > { %1363 = vst [vmem:[%s226_s26] sm:$0xff] %v1362_v18  }
 0x14d PF: > { %s13_s14 = sadd.s32 1, %s1663_s14   ;;  %s1927_s12 = smov %s1659_s13 }
 0x14e   : > { %p10_p6 = scmp.ge.s32.totalorder %s13_s14, 4   ;;  %s1928_s13 = smov %s1930_s15 }
 0x150   :  { %12 = sbr.rel (!%p10_p6) target bundleno = 2 (0x2), region = 71 }

// kernel: convnet_forward.6
= control target key start
LH: loop header
LB: loop body
LE: loop exit
PB: predicated region body
PF: predicated region fallthrough
CT: control target
= control target key end

     0   :  { %s2278_s1 = inlined_call_operand.vmem [shape: bf16[1664,128], index: 1, kind: input, shape index: {}]   ;;  %s2279_s0 = inlined_call_operand.vmem [shape: bf16[32,1664], index: 0, kind: input, shape index: {}]   ;;  %s2280_s2 = inlined_call_operand.vmem [shape: f32[1,128], index: 2, kind: input, shape index: {}]   ;;  %s2281_s3 = inlined_call_operand.vmem [shape: bf16[8,128], index: 3, kind: output, shape index: {}]  }
   0x1   :  { %v1720_v0 = vld [vmem:[%s2278_s1 + $0x40] sm:$0xff]   ;;  %v1724_v4 = vld [vmem:[%s2278_s1 + $0x48] sm:$0xff]   ;;  %v1728_v8 = vld [vmem:[%s2278_s1 + $0x50] sm:$0xff]  }
   0x2   :  { %v1721_v1 = vld [vmem:[%s2278_s1] sm:$0xff]   ;;  %1522 = vmatprep.subr.bf16.mxu0 %v1720_v0  ;;  %v1725_v5 = vld [vmem:[%s2278_s1 + $0x8] sm:$0xff]   ;;  %v1729_v9 = vld [vmem:[%s2278_s1 + $0x10] sm:$0xff]  }
   0x3   :  { %v1722_v2 = vld [vmem:[%s2278_s1 + $0xc0] sm:$0xff]   ;;  %1523 = vmatpush3.bf16.msra.mxu0 %v1721_v1  ;;  %v1726_v6 = vld [vmem:[%s2278_s1 + $0xc8] sm:$0xff]   ;;  %v1730_v10 = vld [vmem:[%s2278_s1 + $0xd0] sm:$0xff]  }
   0x4   :  { %v1723_v3 = vld [vmem:[%s2278_s1 + $0x80] sm:$0xff]   ;;  %1550 = vmatprep.subr.bf16.mxu1 %v1722_v2  ;;  %1524 = vmatprep.subr.bf16.mxu0 %v1724_v4  ;;  %v1727_v7 = vld [vmem:[%s2278_s1 + $0x88] sm:$0xff]   ;;  %v1731_v11 = vld [vmem:[%s2278_s1 + $0x90] sm:$0xff]  }
   0x5   :  { %1551 = vmatpush3.bf16.msra.mxu1 %v1723_v3  ;;  %v1732_v12 = vld [vmem:[%s2278_s1 + $0x58] sm:$0xff]   ;;  %v1736_v16 = vld [vmem:[%s2278_s1 + $0x60] sm:$0xff]   ;;  %v1740_v20 = vld [vmem:[%s2278_s1 + $0x68] sm:$0xff]  }
   0x6   :  { %1552 = vmatprep.subr.bf16.mxu1 %v1726_v6  ;;  %v1733_v13 = vld [vmem:[%s2278_s1 + $0x18] sm:$0xff]   ;;  %v1737_v17 = vld [vmem:[%s2278_s1 + $0x20] sm:$0xff]   ;;  %v1741_v21 = vld [vmem:[%s2278_s1 + $0x28] sm:$0xff]  }
   0x7   :  { %1525 = vmatpush3.bf16.msra.mxu0 %v1725_v5  ;;  %v1734_v14 = vld [vmem:[%s2278_s1 + $0xd8] sm:$0xff]   ;;  %v1738_v18 = vld [vmem:[%s2278_s1 + $0xe0] sm:$0xff]   ;;  %v1742_v22 = vld [vmem:[%s2278_s1 + $0xe8] sm:$0xff]  }
   0x8   :  { %1526 = vmatprep.subr.bf16.mxu0 %v1728_v8  ;;  %v1735_v15 = vld [vmem:[%s2278_s1 + $0x98] sm:$0xff]   ;;  %v1739_v19 = vld [vmem:[%s2278_s1 + $0xa0] sm:$0xff]   ;;  %v1743_v23 = vld [vmem:[%s2278_s1 + $0xa8] sm:$0xff]  }
   0x9   :  { %1553 = vmatpush3.bf16.msra.mxu1 %v1727_v7  ;;  %v1744_v24 = vld [vmem:[%s2278_s1 + $0x70] sm:$0xff]   ;;  %v1748_v28 = vld [vmem:[%s2278_s1 + $0x78] sm:$0xff]   ;;  %v1755_v34 = vld [vmem:[%s2278_s1 + $0x140] sm:$0xff]  }
   0xa   :  { %1554 = vmatprep.subr.bf16.mxu1 %v1730_v10  ;;  %v1745_v25 = vld [vmem:[%s2278_s1 + $0x30] sm:$0xff]   ;;  %v1749_v29 = vld [vmem:[%s2278_s1 + $0x38] sm:$0xff]   ;;  %v1758_v36 = vld [vmem:[%s2279_s0 + $0xc] ss:$52 sps:$4 sm:$0xff]  }
   0xb   :  { %1527 = vmatpush3.bf16.msra.mxu0 %v1729_v9  ;;  %v1746_v26 = vld [vmem:[%s2278_s1 + $0xf0] sm:$0xff]   ;;  %v1750_v30 = vld [vmem:[%s2278_s1 + $0xf8] sm:$0xff]   ;;  %v1759_v37 = vld [vmem:[%s2278_s1 + $0x100] sm:$0xff]   ;;  %1095 = vmatprep.mubr.bf16.mxu1 %v1758_v36 }
   0xc   :  { %1528 = vmatprep.subr.bf16.mxu0 %v1732_v12  ;;  %v1747_v27 = vld [vmem:[%s2278_s1 + $0xb0] sm:$0xff]   ;;  %v1753_v32 = vld [vmem:[%s2279_s0 + $0x4] ss:$52 sps:$4 sm:$0xff]   ;;  %v1756_v35 = vld [vmem:[%s2279_s0 + $0x8] ss:$52 sps:$4 sm:$0xff]  }
   0xd   :  { %1555 = vmatpush3.bf16.msra.mxu1 %v1731_v11  ;;  %v1751_v31 = vld [vmem:[%s2279_s0] ss:$52 sps:$4 sm:$0xff]   ;;  %v1754_v33 = vld [vmem:[%s2278_s1 + $0xb8] sm:$0xff]   ;;  %1046 = vmatprep.mubr.bf16.mxu0 %v1753_v32  ;;  %v1762_v40 = vld [vmem:[%s2278_s1 + $0x148] sm:$0xff]  }
   0xe   :  { %1556 = vmatprep.subr.bf16.mxu1 %v1734_v14  ;;  %v1760_v38 = vld [vmem:[%s2278_s1 + $0x1c0] sm:$0xff]   ;;  %v1763_v41 = vld [vmem:[%s2278_s1 + $0x108] sm:$0xff]   ;;  %v1766_v44 = vld [vmem:[%s2278_s1 + $0x150] sm:$0xff]  }
   0xf   :  { %1529 = vmatpush3.bf16.msra.mxu0 %v1733_v13  ;;  %v1761_v39 = vld [vmem:[%s2278_s1 + $0x180] sm:$0xff]   ;;  %v1764_v42 = vld [vmem:[%s2278_s1 + $0x1c8] sm:$0xff]   ;;  %v1767_v45 = vld [vmem:[%s2278_s1 + $0x110] sm:$0xff]  }
  0x10   :  { %1530 = vmatprep.subr.bf16.mxu0 %v1736_v16  ;;  %v1765_v43 = vld [vmem:[%s2278_s1 + $0x188] sm:$0xff]   ;;  %v1768_v46 = vld [vmem:[%s2278_s1 + $0x1d0] sm:$0xff]   ;;  %v1770_v48 = vld [vmem:[%s2278_s1 + $0x158] sm:$0xff]  }
  0x11   :  { %1557 = vmatpush3.bf16.msra.mxu1 %v1735_v15  ;;  %v1769_v47 = vld [vmem:[%s2278_s1 + $0x190] sm:$0xff]   ;;  %v1771_v49 = vld [vmem:[%s2278_s1 + $0x118] sm:$0xff]   ;;  %v1774_v52 = vld [vmem:[%s2278_s1 + $0x160] sm:$0xff]  }
  0x12   :  { %1558 = vmatprep.subr.bf16.mxu1 %v1738_v18  ;;  %v1772_v50 = vld [vmem:[%s2278_s1 + $0x1d8] sm:$0xff]   ;;  %v1775_v53 = vld [vmem:[%s2278_s1 + $0x120] sm:$0xff]   ;;  %v1778_v56 = vld [vmem:[%s2278_s1 + $0x168] sm:$0xff]  }
  0x13   :  { %1531 = vmatpush3.bf16.msra.mxu0 %v1737_v17  ;;  %v1773_v51 = vld [vmem:[%s2278_s1 + $0x198] sm:$0xff]   ;;  %v1776_v54 = vld [vmem:[%s2278_s1 + $0x1e0] sm:$0xff]   ;;  %v1781_v58 = vld [vmem:[%s2278_s1 + $0x128] sm:$0xff]  }
  0x14   :  { %1532 = vmatprep.subr.bf16.mxu0 %v1740_v20  ;;  %v1777_v55 = vld [vmem:[%s2278_s1 + $0x1a0] sm:$0xff]   ;;  %v1782_v59 = vld [vmem:[%s2279_s0 + $0x68] ss:$52 sps:$4 sm:$0xff]   ;;  %v1788_v0 = vld [vmem:[%s2278_s1 + $0x170] sm:$0xff]  }
  0x15   :  { %1559 = vmatpush3.bf16.msra.mxu1 %v1739_v19  ;;  %v1779_v57 = vld [vmem:[%s2279_s0 + $0x6c] ss:$52 sps:$4 sm:$0xff]   ;;  %v1784_v61 = vld [vmem:[%s2279_s0 + $0x74] ss:$52 sps:$4 sm:$0xff]   ;;  %v1787_v63 = vld [vmem:[%s2279_s0 + $0x70] ss:$52 sps:$4 sm:$0xff]  }
  0x16   :  { %1560 = vmatprep.subr.bf16.mxu1 %v1742_v22  ;;  %v1783_v60 = vld [vmem:[%s2278_s1 + $0x1e8] sm:$0xff]   ;;  %v1789_v1 = vld [vmem:[%s2278_s1 + $0x130] sm:$0xff]   ;;  %v1792_v4 = vld [vmem:[%s2278_s1 + $0x178] sm:$0xff]  }
  0x17   :  { %1533 = vmatpush3.bf16.msra.mxu0 %v1741_v21  ;;  %v1786_v62 = vld [vmem:[%s2278_s1 + $0x1a8] sm:$0xff]   ;;  %v1790_v2 = vld [vmem:[%s2278_s1 + $0x1f0] sm:$0xff]   ;;  %v1793_v5 = vld [vmem:[%s2278_s1 + $0x138] sm:$0xff]  }
  0x18   :  { %1534 = vmatprep.subr.bf16.mxu0 %v1744_v24  ;;  %v1791_v3 = vld [vmem:[%s2278_s1 + $0x1b0] sm:$0xff]   ;;  %v1794_v6 = vld [vmem:[%s2278_s1 + $0x1f8] sm:$0xff]   ;;  %v1799_v10 = vld [vmem:[%s2278_s1 + $0x240] sm:$0xff]  }
  0x19   :  { %1561 = vmatpush3.bf16.msra.mxu1 %v1743_v23  ;;  %v1795_v7 = vld [vmem:[%s2279_s0 + $0x10] ss:$52 sps:$4 sm:$0xff]   ;;  %v1797_v8 = vld [vmem:[%s2279_s0 + $0x14] ss:$52 sps:$4 sm:$0xff]   ;;  %v1798_v9 = vld [vmem:[%s2278_s1 + $0x1b8] sm:$0xff]  }
  0x1a   :  { %1562 = vmatprep.subr.bf16.mxu1 %v1746_v26  ;;  %v1800_v11 = vld [vmem:[%s2279_s0 + $0x18] ss:$52 sps:$4 sm:$0xff]   ;;  %v1802_v12 = vld [vmem:[%s2279_s0 + $0x1c] ss:$52 sps:$4 sm:$0xff]   ;;  %v1803_v13 = vld [vmem:[%s2278_s1 + $0x200] sm:$0xff]  }
  0x1b   :  { %1535 = vmatpush3.bf16.msra.mxu0 %v1745_v25  ;;  %v1804_v14 = vld [vmem:[%s2278_s1 + $0x2c0] sm:$0xff]   ;;  %v1806_v16 = vld [vmem:[%s2278_s1 + $0x248] sm:$0xff]   ;;  %v1809_v19 = vld [vmem:[%s2279_s0 + $0x7c] ss:$52 sps:$4 sm:$0xff]  }
  0x1c   :  { %1536 = vmatprep.subr.bf16.mxu0 %v1748_v28  ;;  %v1805_v15 = vld [vmem:[%s2278_s1 + $0x280] sm:$0xff]   ;;  %v1807_v17 = vld [vmem:[%s2278_s1 + $0x208] sm:$0xff]   ;;  %v1813_v22 = vld [vmem:[%s2278_s1 + $0x250] sm:$0xff]  }
  0x1d   :  { %1563 = vmatpush3.bf16.msra.mxu1 %v1747_v27  ;;  %v1808_v18 = vld [vmem:[%s2278_s1 + $0x2c8] sm:$0xff]   ;;  %v1814_v23 = vld [vmem:[%s2279_s0 + $0x84] ss:$52 sps:$4 sm:$0xff]   ;;  %v1816_v24 = vld [vmem:[%s2278_s1 + $0x210] sm:$0xff]  }
  0x1e   :  { %1564 = vmatprep.subr.bf16.mxu1 %v1750_v30  ;;  %v1811_v20 = vld [vmem:[%s2278_s1 + $0x288] sm:$0xff]   ;;  %v1817_v25 = vld [vmem:[%s2279_s0 + $0x80] ss:$52 sps:$4 sm:$0xff]   ;;  %v1820_v28 = vld [vmem:[%s2278_s1 + $0x258] sm:$0xff]  }
  0x1f   :  { %1537 = vmatpush3.bf16.msra.mxu0 %v1749_v29  ;;  %v1812_v21 = vld [vmem:[%s2279_s0 + $0x78] ss:$52 sps:$4 sm:$0xff]   ;;  %v1818_v26 = vld [vmem:[%s2278_s1 + $0x2d0] sm:$0xff]   ;;  %v1824_v32 = vld [vmem:[%s2278_s1 + $0x260] sm:$0xff]  }
  0x20   :  { %1578 = vmatprep.subr.bf16.mxu0 %v1755_v34  ;;  %v1819_v27 = vld [vmem:[%s2278_s1 + $0x290] sm:$0xff]   ;;  %v1821_v29 = vld [vmem:[%s2278_s1 + $0x218] sm:$0xff]   ;;  %v1826_v34 = vld [vmem:[%s2278_s1 + $0x2e0] sm:$0xff]  }
  0x21   :  { %1565 = vmatpush3.bf16.msra.mxu1 %v1754_v33  ;;  %v1822_v30 = vld [vmem:[%s2278_s1 + $0x2d8] sm:$0xff]   ;;  %v1825_v33 = vld [vmem:[%s2278_s1 + $0x220] sm:$0xff]   ;;  %v1828_v36 = vld [vmem:[%s2278_s1 + $0x268] sm:$0xff]  }
  0x22   :  { %1047 = vmatmul.mubr.bf16.vlgmr.msra.gmra.mrb[0].mxu0 %v1751_v31  ;;  %1606 = vmatprep.subr.bf16.mxu1 %v1760_v38  ;;  %v1823_v31 = vld [vmem:[%s2278_s1 + $0x298] sm:$0xff]   ;;  %v1830_v38 = vld [vmem:[%s2278_s1 + $0x2e8] sm:$0xff]  }
  0x23   :  { %1579 = vmatpush3.bf16.msra.mxu0 %v1759_v37  ;;  %1054 = vmatprep.mubr.bf16.mxu0 %v1779_v57  ;;  %v1829_v37 = vld [vmem:[%s2278_s1 + $0x228] sm:$0xff]  }
  0x24   :  { %1096 = vmatmul.mubr.bf16.vlgmr.msra.gmra.mrb[0].mxu1 %v1756_v35  ;;  %1580 = vmatprep.subr.bf16.mxu0 %v1762_v40  ;;  %v1827_v35 = vld [vmem:[%s2278_s1 + $0x2a0] sm:$0xff]   ;;  %v1832_v40 = vld [vmem:[%s2278_s1 + $0x270] sm:$0xff]  }
  0x25   :  { %1607 = vmatpush3.bf16.msra.mxu1 %v1761_v39  ;;  %1103 = vmatprep.mubr.bf16.mxu1 %v1784_v61  ;;  %v1831_v39 = vld [vmem:[%s2278_s1 + $0x2a8] sm:$0xff]   ;;  %v1860_v61 = vld [vmem:[%s2279_s0 + $0x30] ss:$52 sps:$4 sm:$0xff]  }
  0x26   :  { %1608 = vmatprep.subr.bf16.mxu1 %v1764_v42  ;;  %v1834_v42 = vld [vmem:[%s2278_s1 + $0x2f0] sm:$0xff]  }
  0x27   :  { %1581 = vmatpush3.bf16.msra.mxu0 %v1763_v41  ;;  %v1833_v41 = vld [vmem:[%s2278_s1 + $0x230] sm:$0xff]  }
  0x28   :  { %1582 = vmatprep.subr.bf16.mxu0 %v1766_v44  ;;  %v1836_v44 = vld [vmem:[%s2278_s1 + $0x278] sm:$0xff]   ;;  %v1852_v57 = vld [vmem:[%s2279_s0 + $0x94] ss:$52 sps:$4 sm:$0xff]  }
  0x29   :  { %1609 = vmatpush3.bf16.msra.mxu1 %v1765_v43  ;;  %v1835_v43 = vld [vmem:[%s2278_s1 + $0x2b0] sm:$0xff]  }
  0x2a   :  { %1610 = vmatprep.subr.bf16.mxu1 %v1768_v46  ;;  %1055 = vmatmul.mubr.bf16.gmra.mrb[4].mxu0 %v1782_v59  ;;  %v1838_v46 = vld [vmem:[%s2278_s1 + $0x2f8] sm:$0xff]   ;;  %v1854_v59 = vld [vmem:[%s2279_s0 + $0x90] ss:$52 sps:$4 sm:$0xff]  }
  0x2b   :  { %1583 = vmatpush3.bf16.msra.mxu0 %v1767_v45  ;;  %1144 = vmatprep.mubr.bf16.mxu0 %v1797_v8  ;;  %v1837_v45 = vld [vmem:[%s2278_s1 + $0x238] sm:$0xff]  }
  0x2c   :  { %1584 = vmatprep.subr.bf16.mxu0 %v1770_v48  ;;  %1104 = vmatmul.mubr.bf16.gmra.mrb[4].mxu1 %v1787_v63  ;;  %v1841_v48 = vld [vmem:[%s2279_s0 + $0x24] ss:$52 sps:$4 sm:$0xff]   ;;  %v1858_v63 = vld [vmem:[%s2278_s1 + $0x330] sm:$0xff]  }
  0x2d   :  { %1611 = vmatpush3.bf16.msra.mxu1 %v1769_v47  ;;  %1193 = vmatprep.mubr.bf16.mxu1 %v1802_v12  ;;  %v1839_v47 = vld [vmem:[%s2279_s0 + $0x20] ss:$52 sps:$4 sm:$0xff]  }
  0x2e   :  { %1612 = vmatprep.subr.bf16.mxu1 %v1772_v50  ;;  %v1843_v50 = vld [vmem:[%s2278_s1 + $0x300] sm:$0xff]  }
  0x2f   :  { %1585 = vmatpush3.bf16.msra.mxu0 %v1771_v49  ;;  %v1842_v49 = vld [vmem:[%s2278_s1 + $0x2b8] sm:$0xff]  }
  0x30   :  { %1586 = vmatprep.subr.bf16.mxu0 %v1774_v52  ;;  %v1846_v52 = vld [vmem:[%s2279_s0 + $0x2c] ss:$52 sps:$4 sm:$0xff]  }
  0x31   :  { %1613 = vmatpush3.bf16.msra.mxu1 %v1773_v51  ;;  %v1844_v51 = vld [vmem:[%s2279_s0 + $0x28] ss:$52 sps:$4 sm:$0xff]  }
  0x32   :  { %1614 = vmatprep.subr.bf16.mxu1 %v1776_v54  ;;  %v1848_v54 = vld [vmem:[%s2279_s0 + $0x8c] ss:$52 sps:$4 sm:$0xff]  }
  0x33   :  { %1587 = vmatpush3.bf16.msra.mxu0 %v1775_v53  ;;  %v1847_v53 = vld [vmem:[%s2278_s1 + $0x308] sm:$0xff]  }
  0x34   :  { %1588 = vmatprep.subr.bf16.mxu0 %v1778_v56  ;;  %v1851_v56 = vld [vmem:[%s2278_s1 + $0x310] sm:$0xff]  }
  0x35   :  { %1615 = vmatpush3.bf16.msra.mxu1 %v1777_v55  ;;  %v1850_v55 = vld [vmem:[%s2279_s0 + $0x88] ss:$52 sps:$4 sm:$0xff]  }
  0x36   :  { %1616 = vmatprep.subr.bf16.mxu1 %v1783_v60  ;;  %v1856_v60 = vld [vmem:[%s2278_s1 + $0x320] sm:$0xff]  }
  0x37   :  { %1589 = vmatpush3.bf16.msra.mxu0 %v1781_v58  ;;  %v1855_v58 = vld [vmem:[%s2278_s1 + $0x318] sm:$0xff]  }
  0x38   :  { %1590 = vmatprep.subr.bf16.mxu0 %v1788_v0  ;;  %v1859_v0 = vld [vmem:[%s2278_s1 + $0x338] sm:$0xff]  }
  0x39   :  { %1617 = vmatpush3.bf16.msra.mxu1 %v1786_v62  ;;  %v1857_v62 = vld [vmem:[%s2278_s1 + $0x328] sm:$0xff]  }
  0x3a   :  { %1618 = vmatprep.subr.bf16.mxu1 %v1790_v2 }
  0x3b   :  { %1591 = vmatpush3.bf16.msra.mxu0 %v1789_v1  ;;  %v1861_v1 = vld [vmem:[%s2279_s0 + $0x98] ss:$52 sps:$4 sm:$0xff]  }
  0x3c   :  { %1592 = vmatprep.subr.bf16.mxu0 %v1792_v4 }
  0x3d   :  { %1619 = vmatpush3.bf16.msra.mxu1 %v1791_v3  ;;  %v1391_v3 = vld [vmem:[%s2280_s2] ss:$0 sm:$0xff] }
  0x3e   :  { %1620 = vmatprep.subr.bf16.mxu1 %v1794_v6 }
  0x3f   :  { %1593 = vmatpush3.bf16.msra.mxu0 %v1793_v5 }
  0x40   :  { %1634 = vmatprep.subr.bf16.mxu0 %v1799_v10 }
  0x41   :  { %1621 = vmatpush3.bf16.msra.mxu1 %v1798_v9 }
  0x42   :  { %1145 = vmatmul.mubr.bf16.vlgmr.msra.gmra.mrb[8].mxu0 %v1795_v7  ;;  %1662 = vmatprep.subr.bf16.mxu1 %v1804_v14 }
  0x43   :  { %1635 = vmatpush3.bf16.msra.mxu0 %v1803_v13  ;;  %1152 = vmatprep.mubr.bf16.mxu0 %v1809_v19 }
  0x44   :  { %1194 = vmatmul.mubr.bf16.vlgmr.msra.gmra.mrb[8].mxu1 %v1800_v11  ;;  %1636 = vmatprep.subr.bf16.mxu0 %v1806_v16 }
  0x45   :  { %1663 = vmatpush3.bf16.msra.mxu1 %v1805_v15  ;;  %1201 = vmatprep.mubr.bf16.mxu1 %v1814_v23 }
  0x46   :  { %1664 = vmatprep.subr.bf16.mxu1 %v1808_v18 }
  0x47   :  { %1637 = vmatpush3.bf16.msra.mxu0 %v1807_v17 }
  0x48   :  { %1638 = vmatprep.subr.bf16.mxu0 %v1813_v22 }
  0x49   :  { %1665 = vmatpush3.bf16.msra.mxu1 %v1811_v20 }
  0x4a   :  { %1153 = vmatmul.mubr.bf16.gmra.mrb[12].mxu0 %v1812_v21  ;;  %1666 = vmatprep.subr.bf16.mxu1 %v1818_v26 }
  0x4b   :  { %1639 = vmatpush3.bf16.msra.mxu0 %v1816_v24  ;;  %1242 = vmatprep.mubr.bf16.mxu0 %v1841_v48 }
  0x4c   :  { %1202 = vmatmul.mubr.bf16.gmra.mrb[12].mxu1 %v1817_v25  ;;  %1640 = vmatprep.subr.bf16.mxu0 %v1820_v28 }
  0x4d   :  { %1667 = vmatpush3.bf16.msra.mxu1 %v1819_v27  ;;  %1291 = vmatprep.mubr.bf16.mxu1 %v1846_v52 }
  0x4e   :  { %1668 = vmatprep.subr.bf16.mxu1 %v1822_v30 }
  0x4f   :  { %1641 = vmatpush3.bf16.msra.mxu0 %v1821_v29 }
  0x50   :  { %1642 = vmatprep.subr.bf16.mxu0 %v1824_v32 }
  0x51   :  { %1669 = vmatpush3.bf16.msra.mxu1 %v1823_v31 }
  0x52   :  { %1670 = vmatprep.subr.bf16.mxu1 %v1826_v34 }
  0x53   :  { %1643 = vmatpush3.bf16.msra.mxu0 %v1825_v33 }
  0x54   :  { %1644 = vmatprep.subr.bf16.mxu0 %v1828_v36 }
  0x55   :  { %1671 = vmatpush3.bf16.msra.mxu1 %v1827_v35 }
  0x56   :  { %1672 = vmatprep.subr.bf16.mxu1 %v1830_v38 }
  0x57   :  { %1645 = vmatpush3.bf16.msra.mxu0 %v1829_v37 }
  0x58   :  { %1646 = vmatprep.subr.bf16.mxu0 %v1832_v40 }
  0x59   :  { %1673 = vmatpush3.bf16.msra.mxu1 %v1831_v39 }
  0x5a   :  { %1674 = vmatprep.subr.bf16.mxu1 %v1834_v42 }
  0x5b   :  { %1647 = vmatpush3.bf16.msra.mxu0 %v1833_v41 }
  0x5c   :  { %1648 = vmatprep.subr.bf16.mxu0 %v1836_v44 }
  0x5d   :  { %1675 = vmatpush3.bf16.msra.mxu1 %v1835_v43 }
  0x5e   :  { %1676 = vmatprep.subr.bf16.mxu1 %v1838_v46 }
  0x5f   :  { %1649 = vmatpush3.bf16.msra.mxu0 %v1837_v45 }
  0x60   :  { %1700 = vmatprep.subr.bf16.mxu0 %v1843_v50 }
  0x61   :  { %1677 = vmatpush3.bf16.msra.mxu1 %v1842_v49 }
  0x62   :  { %1243 = vmatmul.mubr.bf16.vlgmr.msra.gmra.mrb[16].mxu0 %v1839_v47 }
  0x63   :  { %1701 = vmatpush3.bf16.msra.mxu0 %v1843_v50  ;;  %1250 = vmatprep.mubr.bf16.mxu0 %v1848_v54 }
  0x64   :  { %1292 = vmatmul.mubr.bf16.vlgmr.msra.gmra.mrb[16].mxu1 %v1844_v51  ;;  %1702 = vmatprep.subr.bf16.mxu0 %v1847_v53 }
  0x65   :  { %1299 = vmatprep.mubr.bf16.mxu1 %v1852_v57 }
  0x67   :  { %1703 = vmatpush3.bf16.msra.mxu0 %v1847_v53 }
  0x68   :  { %1704 = vmatprep.subr.bf16.mxu0 %v1851_v56 }
  0x6a   :  { %1251 = vmatmul.mubr.bf16.gmra.mrb[20].mxu0 %v1850_v55 }
  0x6b   :  { %1705 = vmatpush3.bf16.msra.mxu0 %v1851_v56  ;;  %1716 = vmatprep.mubr.bf16.mxu0 %v1860_v61 }
  0x6c   :  { %1706 = vmatprep.subr.bf16.mxu0 %v1855_v58  ;;  %1300 = vmatmul.mubr.bf16.gmra.mrb[20].mxu1 %v1854_v59 }
  0x6f   :  { %1707 = vmatpush3.bf16.msra.mxu0 %v1855_v58 }
  0x70   :  { %1708 = vmatprep.subr.bf16.mxu0 %v1856_v60 }
  0x73   :  { %1709 = vmatpush3.bf16.msra.mxu0 %v1856_v60 }
  0x74   :  { %1710 = vmatprep.subr.bf16.mxu0 %v1857_v62 }
  0x77   :  { %1711 = vmatpush3.bf16.msra.mxu0 %v1857_v62 }
  0x78   :  { %1712 = vmatprep.subr.bf16.mxu0 %v1858_v63 }
  0x7b   :  { %1713 = vmatpush3.bf16.msra.mxu0 %v1858_v63 }
  0x7c   :  { %1714 = vmatprep.subr.bf16.mxu0 %v1859_v0 }
  0x7f   :  { %1715 = vmatpush3.bf16.msra.mxu0 %v1859_v0 }
  0x82   :  { %1717 = vmatmul.mubr.bf16.vlgmr.msra.gmra.mrb[24].mxu0 %v1861_v1 }
  0xf5   :  { %v1538_v2 = vpop.f32.mrb[0].mxu0 }
  0xf6   :  { %v1539_v4 = vpop.f32.mrb[1].mxu0 }
  0xf7   :  { %v1540_v5 = vadd.f32 %v1539_v4, %v1538_v2  ;;  %v1541_v6 = vpop.f32.mrb[2].mxu0  ;;  %v1566_v7 = vpop.f32.mrb[0].mxu1 }
  0xf8   :  { %v1542_v8 = vpop.f32.mrb[3].mxu0  ;;  %v1567_v11 = vpop.f32.mrb[1].mxu1 }
  0xf9   :  { %v1049_v9 = vadd.f32 %v1540_v5, %v1391_v3  ;;  %v1543_v10 = vadd.f32 %v1542_v8, %v1541_v6  ;;  %v1568_v12 = vadd.f32 %v1567_v11, %v1566_v7  ;;  %v1569_v13 = vpop.f32.mrb[2].mxu1 }
  0xfa   :  { %v1570_v15 = vpop.f32.mrb[3].mxu1 }
  0xfb   :  { %v1052_v14 = vadd.f32 %v1543_v10, %v1391_v3  ;;  %v1098_v16 = vadd.f32 %v1568_v12, %v1049_v9  ;;  %v1571_v17 = vadd.f32 %v1570_v15, %v1569_v13 }
  0xfd   :  { %v1101_v18 = vadd.f32 %v1571_v17, %v1052_v14  ;;  %v1544_v19 = vpop.f32.mrb[4].mxu0 }
  0xfe   :  { %v1545_v20 = vpop.f32.mrb[5].mxu0 }
  0xff   :  { %v1546_v21 = vadd.f32 %v1545_v20, %v1544_v19  ;;  %v1547_v22 = vpop.f32.mrb[6].mxu0  ;;  %v1572_v23 = vpop.f32.mrb[4].mxu1 }
 0x100   :  { %v1548_v24 = vpop.f32.mrb[7].mxu0  ;;  %v1573_v27 = vpop.f32.mrb[5].mxu1 }
 0x101   :  { %v1057_v25 = vadd.f32 %v1546_v21, %v1391_v3  ;;  %v1549_v26 = vadd.f32 %v1548_v24, %v1547_v22  ;;  %v1574_v28 = vadd.f32 %v1573_v27, %v1572_v23  ;;  %v1575_v29 = vpop.f32.mrb[6].mxu1 }
 0x102   :  { %v1576_v31 = vpop.f32.mrb[7].mxu1 }
 0x103   :  { %v1060_v30 = vadd.f32 %v1549_v26, %v1391_v3  ;;  %v1106_v32 = vadd.f32 %v1574_v28, %v1057_v25  ;;  %v1577_v33 = vadd.f32 %v1576_v31, %v1575_v29 }
 0x105   :  { %v1109_v34 = vadd.f32 %v1577_v33, %v1060_v30 }
 0x115   :  { %v1594_v35 = vpop.f32.mrb[8].mxu0 }
 0x116   :  { %v1595_v36 = vpop.f32.mrb[9].mxu0 }
 0x117   :  { %v1596_v37 = vadd.f32 %v1595_v36, %v1594_v35  ;;  %v1597_v38 = vpop.f32.mrb[10].mxu0  ;;  %v1622_v39 = vpop.f32.mrb[8].mxu1 }
 0x118   :  { %v1598_v40 = vpop.f32.mrb[11].mxu0  ;;  %v1623_v43 = vpop.f32.mrb[9].mxu1 }
 0x119   :  { %v1147_v41 = vadd.f32 %v1596_v37, %v1098_v16  ;;  %v1599_v42 = vadd.f32 %v1598_v40, %v1597_v38  ;;  %v1624_v44 = vadd.f32 %v1623_v43, %v1622_v39  ;;  %v1625_v45 = vpop.f32.mrb[10].mxu1 }
 0x11a   :  { %v1626_v47 = vpop.f32.mrb[11].mxu1 }
 0x11b   :  { %v1150_v46 = vadd.f32 %v1599_v42, %v1101_v18  ;;  %v1196_v48 = vadd.f32 %v1624_v44, %v1147_v41  ;;  %v1627_v49 = vadd.f32 %v1626_v47, %v1625_v45 }
 0x11d   :  { %v1199_v50 = vadd.f32 %v1627_v49, %v1150_v46  ;;  %v1600_v51 = vpop.f32.mrb[12].mxu0 }
 0x11e   :  { %v1601_v52 = vpop.f32.mrb[13].mxu0 }
 0x11f   :  { %v1602_v53 = vadd.f32 %v1601_v52, %v1600_v51  ;;  %v1603_v54 = vpop.f32.mrb[14].mxu0  ;;  %v1628_v55 = vpop.f32.mrb[12].mxu1 }
 0x120   :  { %v1604_v56 = vpop.f32.mrb[15].mxu0  ;;  %v1629_v59 = vpop.f32.mrb[13].mxu1 }
 0x121   :  { %v1155_v57 = vadd.f32 %v1602_v53, %v1106_v32  ;;  %v1605_v58 = vadd.f32 %v1604_v56, %v1603_v54  ;;  %v1630_v60 = vadd.f32 %v1629_v59, %v1628_v55  ;;  %v1631_v61 = vpop.f32.mrb[14].mxu1 }
 0x122   :  { %v1632_v63 = vpop.f32.mrb[15].mxu1 }
 0x123   :  { %v1158_v62 = vadd.f32 %v1605_v58, %v1109_v34  ;;  %v1204_v0 = vadd.f32 %v1630_v60, %v1155_v57  ;;  %v1633_v1 = vadd.f32 %v1632_v63, %v1631_v61 }
 0x125   :  { %v1207_v2 = vadd.f32 %v1633_v1, %v1158_v62 }
 0x135   :  { %v1650_v3 = vpop.f32.mrb[16].mxu0 }
 0x136   :  { %v1651_v4 = vpop.f32.mrb[17].mxu0 }
 0x137   :  { %v1652_v5 = vadd.f32 %v1651_v4, %v1650_v3  ;;  %v1653_v6 = vpop.f32.mrb[18].mxu0  ;;  %v1678_v9 = vpop.f32.mrb[16].mxu1 }
 0x138   :  { %v1654_v7 = vpop.f32.mrb[19].mxu0  ;;  %v1679_v11 = vpop.f32.mrb[17].mxu1 }
 0x139   :  { %v1245_v8 = vadd.f32 %v1652_v5, %v1196_v48  ;;  %v1655_v10 = vadd.f32 %v1654_v7, %v1653_v6  ;;  %v1680_v13 = vadd.f32 %v1679_v11, %v1678_v9  ;;  %v1681_v14 = vpop.f32.mrb[18].mxu1 }
 0x13a   :  { %v1682_v15 = vpop.f32.mrb[19].mxu1 }
 0x13b   :  { %v1248_v12 = vadd.f32 %v1655_v10, %v1199_v50  ;;  %v1683_v16 = vadd.f32 %v1682_v15, %v1681_v14  ;;  %v1294_v18 = vadd.f32 %v1680_v13, %v1245_v8 }
 0x13d   :  { %v1656_v17 = vpop.f32.mrb[20].mxu0  ;;  %v1297_v22 = vadd.f32 %v1683_v16, %v1248_v12 }
 0x13e   :  { %v1657_v19 = vpop.f32.mrb[21].mxu0 }
 0x13f   :  { %v1658_v20 = vadd.f32 %v1657_v19, %v1656_v17  ;;  %v1659_v21 = vpop.f32.mrb[22].mxu0  ;;  %v1684_v25 = vpop.f32.mrb[20].mxu1 }
 0x140   :  { %v1660_v23 = vpop.f32.mrb[23].mxu0  ;;  %v1685_v27 = vpop.f32.mrb[21].mxu1 }
 0x141   :  { %v1253_v24 = vadd.f32 %v1658_v20, %v1204_v0  ;;  %v1661_v26 = vadd.f32 %v1660_v23, %v1659_v21  ;;  %v1686_v29 = vadd.f32 %v1685_v27, %v1684_v25  ;;  %v1687_v30 = vpop.f32.mrb[22].mxu1 }
 0x142   :  { %v1688_v31 = vpop.f32.mrb[23].mxu1 }
 0x143   :  { %v1256_v28 = vadd.f32 %v1661_v26, %v1207_v2  ;;  %v1689_v32 = vadd.f32 %v1688_v31, %v1687_v30  ;;  %v1302_v33 = vadd.f32 %v1686_v29, %v1253_v24 }
 0x145   :  { %v1305_v34 = vadd.f32 %v1689_v32, %v1256_v28 }
 0x155   :  { %v1718_v35 = vpop.f32.mrb[24].mxu0 }
 0x156   :  { %v1351_v36 = vadd.f32 %v1718_v35, %v1302_v33  ;;  %v1342_v37 = vpop.f32.mrb[25].mxu0 }
 0x157   :  { %v1343_v38 = vadd.f32 %v1342_v37, %v1294_v18  ;;  %v1719_v39 = vpop.f32.mrb[26].mxu0 }
 0x158   :  { %v1359_v40 = vmax.f32 %v1351_v36, 0.0  ;;  %v1354_v41 = vadd.f32 %v1719_v39, %v1305_v34  ;;  %v1345_v42 = vpop.f32.mrb[27].mxu0 }
 0x159   :  { %v1357_v43 = vmax.f32 %v1343_v38, 0.0  ;;  %v1346_v44 = vadd.f32 %v1345_v42, %v1297_v22 }
 0x15a   :  { %v1372_v45 = vrot.slane %v1359_v40, 4  ;;  %v1360_v46 = vmax.f32 %v1354_v41, 0.0 }
 0x15b   :  { %v1362_v47 = vrot.slane %v1357_v43, 4  ;;  %v1358_v48 = vmax.f32 %v1346_v44, 0.0 }
 0x15c   :  { %v1374_v49 = vmax.f32 %v1359_v40, %v1372_v45  ;;  %v1377_v50 = vrot.slane %v1360_v46, 4 }
 0x15d   :  { %v1364_v51 = vmax.f32 %v1357_v43, %v1362_v47  ;;  %v1367_v52 = vrot.slane %v1358_v48, 4 }
 0x15e   :  { %1375 = vst [vmem:[#allocation2 + $0x8] sm:$0xf] %v1374_v49  ;;  %v1379_v53 = vmax.f32 %v1360_v46, %v1377_v50 }
 0x15f   :  { %1365 = vst [vmem:[#allocation2] sm:$0xf] %v1364_v51  ;;  %v1369_v54 = vmax.f32 %v1358_v48, %v1367_v52 }
 0x160   :  { %1380 = vst [vmem:[#allocation2 + $0xc] sm:$0xf] %v1379_v53 }
 0x161   :  { %1370 = vst [vmem:[#allocation2 + $0x4] sm:$0xf] %v1369_v54 }
 0x168   :  { %v1381_v55 = vld [vmem:[#allocation2] ss:$2 sm:$0xff]  ;;  %v1383_v56 = vld [vmem:[#allocation2 + $0x1] ss:$2 sm:$0xff] }
 0x169   :  { %v1384_v57 = vmax.f32 %v1381_v55, %v1383_v56 }
 0x16b   :  { %v1385_v58 = vpack.c.bf16 %v1384_v57, %v1384_v57 }
 0x16d   :  { %1386 = vst [vmem:[%s2281_s3] sm:$0xf] %v1385_v58 }

// kernel: convnet_forward.7
= control target key start
LH: loop header
LB: loop body
LE: loop exit
PB: predicated region body
PF: predicated region fallthrough
CT: control target
= control target key end

     0   :  { %s7040_s1 = inlined_call_operand.vmem [shape: bf16[512,1024], index: 1, kind: input, shape index: {}]   ;;  %s7041_s0 = inlined_call_operand.vmem [shape: bf16[8,512], index: 0, kind: input, shape index: {}]   ;;  %s7042_s3 = inlined_call_operand.vmem [shape: bf16[1024,512], index: 3, kind: input, shape index: {}]   ;;  %s7043_s2 = inlined_call_operand.vmem [shape: f32[1,1024], index: 2, kind: input, shape index: {}]   ;;  %s7044_s5 = inlined_call_operand.vmem [shape: bf16[512,128], index: 5, kind: input, shape index: {}]   ;;  %s7045_s4 = inlined_call_operand.vmem [shape: f32[1,512], index: 4, kind: input, shape index: {}]   ;;  %s7046_s6 = inlined_call_operand.vmem [shape: f32[1,128], index: 6, kind: input, shape index: {}]   ;;  %s7047_s7 = inlined_call_operand.vmem [shape: f32[8,128], index: 7, kind: output, shape index: {}]  }
   0x1   :  { %v29_v0 = vld [vmem:[%s7040_s1] sm:$0xff]  ;;  %v30_v2 = vld [vmem:[%s7040_s1 + $0x8] sm:$0xff] }
   0x2   :  { %v33_v1 = vld [vmem:[%s7040_s1 + $0x20] sm:$0xff]  ;;  %v34_v4 = vld [vmem:[%s7040_s1 + $0x28] sm:$0xff] }
   0x3   :  { %v4212_v3 = vcombine.high %v29_v0, %v33_v1  ;;  %v4211_v5 = vcombine.low %v29_v0, %v33_v1  ;;  %v37_v6 = vld [vmem:[%s7040_s1 + $0x40] sm:$0xff]  ;;  %v4214_v8 = vcombine.high %v30_v2, %v34_v4  ;;  %v4213_v9 = vcombine.low %v30_v2, %v34_v4  ;;  %v38_v11 = vld [vmem:[%s7040_s1 + $0x48] sm:$0xff] }
   0x4   :  { %v41_v7 = vld [vmem:[%s7040_s1 + $0x60] sm:$0xff]  ;;  %v42_v12 = vld [vmem:[%s7040_s1 + $0x68] sm:$0xff] }
   0x5   :  { %v4220_v10 = vcombine.high %v37_v6, %v41_v7  ;;  %v45_v13 = vld [vmem:[%s7040_s1 + $0x80] sm:$0xff]  ;;  %1621 = vmatprep.subr.bf16.mxu0 %v4212_v3  ;;  %v4222_v14 = vcombine.high %v38_v11, %v42_v12  ;;  %v46_v16 = vld [vmem:[%s7040_s1 + $0x88] sm:$0xff]  ;;  %1703 = vmatprep.subr.bf16.mxu1 %v4214_v8  ;;  %v4219_v18 = vcombine.low %v37_v6, %v41_v7 }
   0x6   :  { %v49_v15 = vld [vmem:[%s7040_s1 + $0xa0] sm:$0xff]  ;;  %v50_v17 = vld [vmem:[%s7040_s1 + $0xa8] sm:$0xff]  ;;  %1622 = vmatpush1.bf16.msra.mxu0 %v4211_v5  ;;  %1704 = vmatpush1.bf16.msra.mxu1 %v4213_v9  ;;  %v4221_v19 = vcombine.low %v38_v11, %v42_v12 }
   0x7   :  { %1623 = vmatprep.subr.bf16.mxu0 %v4220_v10  ;;  %v4228_v20 = vcombine.high %v45_v13, %v49_v15  ;;  %1705 = vmatprep.subr.bf16.mxu1 %v4222_v14  ;;  %v4230_v21 = vcombine.high %v46_v16, %v50_v17  ;;  %v53_v22 = vld [vmem:[%s7040_s1 + $0xc0] sm:$0xff]  ;;  %v54_v24 = vld [vmem:[%s7040_s1 + $0xc8] sm:$0xff]  ;;  %v4227_v26 = vcombine.low %v45_v13, %v49_v15 }
   0x8   :  { %v57_v23 = vld [vmem:[%s7040_s1 + $0xe0] sm:$0xff]  ;;  %v58_v25 = vld [vmem:[%s7040_s1 + $0xe8] sm:$0xff]  ;;  %v4229_v27 = vcombine.low %v46_v16, %v50_v17 }
   0x9   :  { %v4236_v28 = vcombine.high %v53_v22, %v57_v23  ;;  %v4238_v29 = vcombine.high %v54_v24, %v58_v25  ;;  %v61_v30 = vld [vmem:[%s7040_s1 + $0x100] sm:$0xff]  ;;  %v62_v32 = vld [vmem:[%s7040_s1 + $0x108] sm:$0xff]  ;;  %v4235_v34 = vcombine.low %v53_v22, %v57_v23  ;;  %v4237_v35 = vcombine.low %v54_v24, %v58_v25 }
   0xa   :  { %1624 = vmatpush1.bf16.msra.mxu0 %v4219_v18  ;;  %1706 = vmatpush1.bf16.msra.mxu1 %v4221_v19  ;;  %v65_v31 = vld [vmem:[%s7040_s1 + $0x120] sm:$0xff]  ;;  %v66_v33 = vld [vmem:[%s7040_s1 + $0x128] sm:$0xff] }
   0xb   :  { %1625 = vmatprep.subr.bf16.mxu0 %v4228_v20  ;;  %1707 = vmatprep.subr.bf16.mxu1 %v4230_v21  ;;  %v4244_v36 = vcombine.high %v61_v30, %v65_v31  ;;  %v4246_v37 = vcombine.high %v62_v32, %v66_v33  ;;  %v69_v38 = vld [vmem:[%s7040_s1 + $0x140] sm:$0xff]  ;;  %v70_v40 = vld [vmem:[%s7040_s1 + $0x148] sm:$0xff]  ;;  %v4243_v42 = vcombine.low %v61_v30, %v65_v31 }
   0xc   :  { %v73_v39 = vld [vmem:[%s7040_s1 + $0x160] sm:$0xff]  ;;  %v74_v41 = vld [vmem:[%s7040_s1 + $0x168] sm:$0xff]  ;;  %v4245_v43 = vcombine.low %v62_v32, %v66_v33 }
   0xd   :  { %v4252_v44 = vcombine.high %v69_v38, %v73_v39  ;;  %v4254_v45 = vcombine.high %v70_v40, %v74_v41  ;;  %v77_v46 = vld [vmem:[%s7040_s1 + $0x180] sm:$0xff]  ;;  %v78_v48 = vld [vmem:[%s7040_s1 + $0x188] sm:$0xff]  ;;  %v4251_v50 = vcombine.low %v69_v38, %v73_v39  ;;  %v4253_v51 = vcombine.low %v70_v40, %v74_v41 }
   0xe   :  { %1626 = vmatpush1.bf16.msra.mxu0 %v4227_v26  ;;  %1708 = vmatpush1.bf16.msra.mxu1 %v4229_v27  ;;  %v81_v47 = vld [vmem:[%s7040_s1 + $0x1a0] sm:$0xff]  ;;  %v82_v49 = vld [vmem:[%s7040_s1 + $0x1a8] sm:$0xff] }
   0xf   :  { %1627 = vmatprep.subr.bf16.mxu0 %v4236_v28  ;;  %1709 = vmatprep.subr.bf16.mxu1 %v4238_v29  ;;  %v4260_v52 = vcombine.high %v77_v46, %v81_v47  ;;  %v5399_v53 = vld [vmem:[%s7041_s0] sm:$0xff]  ;;  %v4262_v54 = vcombine.high %v78_v48, %v82_v49  ;;  %v86_v58 = vld [vmem:[%s7040_s1 + $0x1c8] sm:$0xff]  ;;  %v4259_v60 = vcombine.low %v77_v46, %v81_v47 }
  0x10   :  { %v85_v55 = vld [vmem:[%s7040_s1 + $0x1c0] sm:$0xff]  ;;  %v5409_v57 = vcombine.high %v5399_v53, %v5399_v53  ;;  %v90_v59 = vld [vmem:[%s7040_s1 + $0x1e8] sm:$0xff]  ;;  %v4261_v61 = vcombine.low %v78_v48, %v82_v49 }
  0x11   :  { %v89_v56 = vld [vmem:[%s7040_s1 + $0x1e0] sm:$0xff]  ;;  %v4270_v63 = vcombine.high %v86_v58, %v90_v59  ;;  %v94_v2 = vld [vmem:[%s7040_s1 + $0x208] sm:$0xff]  ;;  %v4269_v5 = vcombine.low %v86_v58, %v90_v59 }
  0x12   :  { %1628 = vmatpush1.bf16.msra.mxu0 %v4235_v34  ;;  %1710 = vmatpush1.bf16.msra.mxu1 %v4237_v35  ;;  %v4268_v62 = vcombine.high %v85_v55, %v89_v56  ;;  %v93_v0 = vld [vmem:[%s7040_s1 + $0x200] sm:$0xff]  ;;  %v98_v3 = vld [vmem:[%s7040_s1 + $0x228] sm:$0xff]  ;;  %v4267_v4 = vcombine.low %v85_v55, %v89_v56 }
  0x13   :  { %1629 = vmatprep.subr.bf16.mxu0 %v4244_v36  ;;  %1711 = vmatprep.subr.bf16.mxu1 %v4246_v37  ;;  %v97_v1 = vld [vmem:[%s7040_s1 + $0x220] sm:$0xff]  ;;  %v4278_v7 = vcombine.high %v94_v2, %v98_v3  ;;  %v102_v10 = vld [vmem:[%s7040_s1 + $0x248] sm:$0xff]  ;;  %v4277_v13 = vcombine.low %v94_v2, %v98_v3 }
  0x14   :  { %1653 = vmatprep.mubr.bf16.mxu0 %v5409_v57  ;;  %1735 = vmatprep.mubr.bf16.mxu1 %v5409_v57  ;;  %v4276_v6 = vcombine.high %v93_v0, %v97_v1  ;;  %v101_v8 = vld [vmem:[%s7040_s1 + $0x240] sm:$0xff]  ;;  %v106_v11 = vld [vmem:[%s7040_s1 + $0x268] sm:$0xff]  ;;  %v4275_v12 = vcombine.low %v93_v0, %v97_v1 }
  0x15   :  { %v105_v9 = vld [vmem:[%s7040_s1 + $0x260] sm:$0xff]  ;;  %v4286_v15 = vcombine.high %v102_v10, %v106_v11  ;;  %v110_v18 = vld [vmem:[%s7040_s1 + $0x288] sm:$0xff]  ;;  %v4285_v21 = vcombine.low %v102_v10, %v106_v11 }
  0x16   :  { %1630 = vmatpush1.bf16.msra.mxu0 %v4243_v42  ;;  %1712 = vmatpush1.bf16.msra.mxu1 %v4245_v43  ;;  %v4284_v14 = vcombine.high %v101_v8, %v105_v9  ;;  %v109_v16 = vld [vmem:[%s7040_s1 + $0x280] sm:$0xff]  ;;  %v114_v19 = vld [vmem:[%s7040_s1 + $0x2a8] sm:$0xff]  ;;  %v4283_v20 = vcombine.low %v101_v8, %v105_v9 }
  0x17   :  { %1631 = vmatprep.subr.bf16.mxu0 %v4252_v44  ;;  %1713 = vmatprep.subr.bf16.mxu1 %v4254_v45  ;;  %v113_v17 = vld [vmem:[%s7040_s1 + $0x2a0] sm:$0xff]  ;;  %v4294_v23 = vcombine.high %v110_v18, %v114_v19  ;;  %v118_v26 = vld [vmem:[%s7040_s1 + $0x2c8] sm:$0xff]  ;;  %v4293_v29 = vcombine.low %v110_v18, %v114_v19 }
  0x18   :  { %v4292_v22 = vcombine.high %v109_v16, %v113_v17  ;;  %v117_v24 = vld [vmem:[%s7040_s1 + $0x2c0] sm:$0xff]  ;;  %v122_v27 = vld [vmem:[%s7040_s1 + $0x2e8] sm:$0xff]  ;;  %v4291_v28 = vcombine.low %v109_v16, %v113_v17 }
  0x19   :  { %v121_v25 = vld [vmem:[%s7040_s1 + $0x2e0] sm:$0xff]  ;;  %v4302_v31 = vcombine.high %v118_v26, %v122_v27  ;;  %v126_v34 = vld [vmem:[%s7040_s1 + $0x308] sm:$0xff]  ;;  %v4301_v37 = vcombine.low %v118_v26, %v122_v27 }
  0x1a   :  { %1632 = vmatpush1.bf16.msra.mxu0 %v4251_v50  ;;  %1714 = vmatpush1.bf16.msra.mxu1 %v4253_v51  ;;  %v4300_v30 = vcombine.high %v117_v24, %v121_v25  ;;  %v125_v32 = vld [vmem:[%s7040_s1 + $0x300] sm:$0xff]  ;;  %v130_v35 = vld [vmem:[%s7040_s1 + $0x328] sm:$0xff]  ;;  %v4299_v36 = vcombine.low %v117_v24, %v121_v25 }
  0x1b   :  { %1633 = vmatprep.subr.bf16.mxu0 %v4260_v52  ;;  %1715 = vmatprep.subr.bf16.mxu1 %v4262_v54  ;;  %v129_v33 = vld [vmem:[%s7040_s1 + $0x320] sm:$0xff]  ;;  %v4310_v39 = vcombine.high %v126_v34, %v130_v35  ;;  %v134_v42 = vld [vmem:[%s7040_s1 + $0x348] sm:$0xff]  ;;  %v4309_v45 = vcombine.low %v126_v34, %v130_v35 }
  0x1c   :  { %v4308_v38 = vcombine.high %v125_v32, %v129_v33  ;;  %v133_v40 = vld [vmem:[%s7040_s1 + $0x340] sm:$0xff]  ;;  %v138_v43 = vld [vmem:[%s7040_s1 + $0x368] sm:$0xff]  ;;  %v4307_v44 = vcombine.low %v125_v32, %v129_v33 }
  0x1d   :  { %v137_v41 = vld [vmem:[%s7040_s1 + $0x360] sm:$0xff]  ;;  %v4318_v47 = vcombine.high %v134_v42, %v138_v43  ;;  %v142_v50 = vld [vmem:[%s7040_s1 + $0x388] sm:$0xff]  ;;  %v4317_v54 = vcombine.low %v134_v42, %v138_v43 }
  0x1e   :  { %1634 = vmatpush1.bf16.msra.mxu0 %v4259_v60  ;;  %1716 = vmatpush1.bf16.msra.mxu1 %v4261_v61  ;;  %v4316_v46 = vcombine.high %v133_v40, %v137_v41  ;;  %v141_v48 = vld [vmem:[%s7040_s1 + $0x380] sm:$0xff]  ;;  %v146_v51 = vld [vmem:[%s7040_s1 + $0x3a8] sm:$0xff]  ;;  %v4315_v52 = vcombine.low %v133_v40, %v137_v41 }
  0x1f   :  { %1635 = vmatprep.subr.bf16.mxu0 %v4268_v62  ;;  %1717 = vmatprep.subr.bf16.mxu1 %v4270_v63  ;;  %v145_v49 = vld [vmem:[%s7040_s1 + $0x3a0] sm:$0xff]  ;;  %v4326_v56 = vcombine.high %v142_v50, %v146_v51  ;;  %v150_v60 = vld [vmem:[%s7040_s1 + $0x3c8] sm:$0xff]  ;;  %v4325_v63 = vcombine.low %v142_v50, %v146_v51 }
  0x20   :  { %v4324_v55 = vcombine.high %v141_v48, %v145_v49  ;;  %v149_v58 = vld [vmem:[%s7040_s1 + $0x3c0] sm:$0xff]  ;;  %v154_v61 = vld [vmem:[%s7040_s1 + $0x3e8] sm:$0xff]  ;;  %v4323_v62 = vcombine.low %v141_v48, %v145_v49 }
  0x21   :  { %v153_v59 = vld [vmem:[%s7040_s1 + $0x3e0] sm:$0xff]  ;;  %v4334_v1 = vcombine.high %v150_v60, %v154_v61 }
  0x22   :  { %1636 = vmatpush1.bf16.msra.mxu0 %v4267_v4  ;;  %1718 = vmatpush1.bf16.msra.mxu1 %v4269_v5  ;;  %v4332_v0 = vcombine.high %v149_v58, %v153_v59  ;;  %v157_v2 = vld [vmem:[%s7040_s1 + $0x400] sm:$0xff]  ;;  %v158_v4 = vld [vmem:[%s7040_s1 + $0x408] sm:$0xff] }
  0x23   :  { %1637 = vmatprep.subr.bf16.mxu0 %v4276_v6  ;;  %1719 = vmatprep.subr.bf16.mxu1 %v4278_v7  ;;  %v161_v3 = vld [vmem:[%s7040_s1 + $0x420] sm:$0xff]  ;;  %v162_v5 = vld [vmem:[%s7040_s1 + $0x428] sm:$0xff]  ;;  %v4331_v6 = vcombine.low %v149_v58, %v153_v59  ;;  %v4333_v7 = vcombine.low %v150_v60, %v154_v61 }
  0x24   :  { %v4340_v8 = vcombine.high %v157_v2, %v161_v3  ;;  %v4342_v9 = vcombine.high %v158_v4, %v162_v5  ;;  %v165_v10 = vld [vmem:[%s7040_s1 + $0x440] sm:$0xff]  ;;  %v4339_v16 = vcombine.low %v157_v2, %v161_v3  ;;  %v4341_v17 = vcombine.low %v158_v4, %v162_v5 }
  0x25   :  { %v169_v11 = vld [vmem:[%s7040_s1 + $0x460] sm:$0xff] }
  0x26   :  { %1638 = vmatpush1.bf16.msra.mxu0 %v4275_v12  ;;  %1720 = vmatpush1.bf16.msra.mxu1 %v4277_v13  ;;  %v5535_v12 = vcombine.low %v5399_v53, %v5399_v53  ;;  %v166_v13 = vld [vmem:[%s7040_s1 + $0x448] sm:$0xff]  ;;  %v4348_v53 = vcombine.high %v165_v10, %v169_v11  ;;  %v173_v19 = vld [vmem:[%s7040_s1 + $0x480] sm:$0xff]  ;;  %v4347_v24 = vcombine.low %v165_v10, %v169_v11 }
  0x27   :  { %1639 = vmatprep.subr.bf16.mxu0 %v4284_v14  ;;  %1721 = vmatprep.subr.bf16.mxu1 %v4286_v15  ;;  %v170_v14 = vld [vmem:[%s7040_s1 + $0x468] sm:$0xff] }
  0x28   :  { %v5546_v15 = vld [vmem:[%s7041_s0 + $0x8] sm:$0xff]  ;;  %v4350_v18 = vcombine.high %v166_v13, %v170_v14  ;;  %v4349_v25 = vcombine.low %v166_v13, %v170_v14 }
  0x2a   :  { %1640 = vmatpush1.bf16.msra.mxu0 %v4283_v20  ;;  %1722 = vmatpush1.bf16.msra.mxu1 %v4285_v21  ;;  %v177_v20 = vld [vmem:[%s7040_s1 + $0x4a0] sm:$0xff]  ;;  %v5556_v21 = vcombine.high %v5546_v15, %v5546_v15 }
  0x2b   :  { %1641 = vmatprep.subr.bf16.mxu0 %v4292_v22  ;;  %1723 = vmatprep.subr.bf16.mxu1 %v4294_v23  ;;  %v174_v22 = vld [vmem:[%s7040_s1 + $0x488] sm:$0xff]  ;;  %v4356_v26 = vcombine.high %v173_v19, %v177_v20  ;;  %v4355_v32 = vcombine.low %v173_v19, %v177_v20 }
  0x2c   :  { %v178_v23 = vld [vmem:[%s7040_s1 + $0x4a8] sm:$0xff] }
  0x2d   :  { %v4358_v27 = vcombine.high %v174_v22, %v178_v23  ;;  %v4357_v33 = vcombine.low %v174_v22, %v178_v23 }
  0x2e   :  { %1642 = vmatpush1.bf16.msra.mxu0 %v4291_v28  ;;  %1724 = vmatpush1.bf16.msra.mxu1 %v4293_v29  ;;  %v181_v28 = vld [vmem:[%s7040_s1 + $0x4c0] sm:$0xff] }
  0x2f   :  { %1643 = vmatprep.subr.bf16.mxu0 %v4300_v30  ;;  %1725 = vmatprep.subr.bf16.mxu1 %v4302_v31  ;;  %v185_v29 = vld [vmem:[%s7040_s1 + $0x4e0] sm:$0xff]  ;;  %v182_v30 = vld [vmem:[%s7040_s1 + $0x4c8] sm:$0xff] }
  0x30   :  { %v186_v31 = vld [vmem:[%s7040_s1 + $0x4e8] sm:$0xff]  ;;  %v4364_v34 = vcombine.high %v181_v28, %v185_v29  ;;  %v4363_v40 = vcombine.low %v181_v28, %v185_v29 }
  0x31   :  { %v4366_v35 = vcombine.high %v182_v30, %v186_v31  ;;  %v4365_v41 = vcombine.low %v182_v30, %v186_v31 }
  0x32   :  { %1644 = vmatpush1.bf16.msra.mxu0 %v4299_v36  ;;  %1726 = vmatpush1.bf16.msra.mxu1 %v4301_v37  ;;  %v189_v36 = vld [vmem:[%s7040_s1 + $0x500] sm:$0xff] }
  0x33   :  { %1645 = vmatprep.subr.bf16.mxu0 %v4308_v38  ;;  %1727 = vmatprep.subr.bf16.mxu1 %v4310_v39  ;;  %v193_v37 = vld [vmem:[%s7040_s1 + $0x520] sm:$0xff]  ;;  %v190_v38 = vld [vmem:[%s7040_s1 + $0x508] sm:$0xff] }
  0x34   :  { %v194_v39 = vld [vmem:[%s7040_s1 + $0x528] sm:$0xff]  ;;  %v4372_v42 = vcombine.high %v189_v36, %v193_v37  ;;  %v4371_v48 = vcombine.low %v189_v36, %v193_v37 }
  0x35   :  { %v4374_v43 = vcombine.high %v190_v38, %v194_v39  ;;  %v4373_v49 = vcombine.low %v190_v38, %v194_v39 }
  0x36   :  { %1646 = vmatpush1.bf16.msra.mxu0 %v4307_v44  ;;  %1728 = vmatpush1.bf16.msra.mxu1 %v4309_v45  ;;  %v197_v44 = vld [vmem:[%s7040_s1 + $0x540] sm:$0xff] }
  0x37   :  { %1647 = vmatprep.subr.bf16.mxu0 %v4316_v46  ;;  %1729 = vmatprep.subr.bf16.mxu1 %v4318_v47  ;;  %v201_v45 = vld [vmem:[%s7040_s1 + $0x560] sm:$0xff]  ;;  %v198_v46 = vld [vmem:[%s7040_s1 + $0x548] sm:$0xff] }
  0x38   :  { %v202_v47 = vld [vmem:[%s7040_s1 + $0x568] sm:$0xff]  ;;  %v4380_v50 = vcombine.high %v197_v44, %v201_v45  ;;  %v4379_v58 = vcombine.low %v197_v44, %v201_v45 }
  0x39   :  { %v4382_v51 = vcombine.high %v198_v46, %v202_v47  ;;  %v4381_v59 = vcombine.low %v198_v46, %v202_v47 }
  0x3a   :  { %1648 = vmatpush1.bf16.msra.mxu0 %v4315_v52  ;;  %1730 = vmatpush1.bf16.msra.mxu1 %v4317_v54  ;;  %v205_v52 = vld [vmem:[%s7040_s1 + $0x580] sm:$0xff] }
  0x3b   :  { %1649 = vmatprep.subr.bf16.mxu0 %v4324_v55  ;;  %1731 = vmatprep.subr.bf16.mxu1 %v4326_v56  ;;  %v209_v54 = vld [vmem:[%s7040_s1 + $0x5a0] sm:$0xff]  ;;  %v206_v55 = vld [vmem:[%s7040_s1 + $0x588] sm:$0xff] }
  0x3c   :  { %v210_v56 = vld [vmem:[%s7040_s1 + $0x5a8] sm:$0xff]  ;;  %v4388_v60 = vcombine.high %v205_v52, %v209_v54  ;;  %v4387_v2 = vcombine.low %v205_v52, %v209_v54 }
  0x3d   :  { %v4390_v61 = vcombine.high %v206_v55, %v210_v56  ;;  %v4389_v3 = vcombine.low %v206_v55, %v210_v56 }
  0x3e   :  { %1650 = vmatpush1.bf16.msra.mxu0 %v4323_v62  ;;  %1732 = vmatpush1.bf16.msra.mxu1 %v4325_v63  ;;  %v213_v62 = vld [vmem:[%s7040_s1 + $0x5c0] sm:$0xff] }
  0x3f   :  { %1651 = vmatprep.subr.bf16.mxu0 %v4332_v0  ;;  %1733 = vmatprep.subr.bf16.mxu1 %v4334_v1  ;;  %v217_v63 = vld [vmem:[%s7040_s1 + $0x5e0] sm:$0xff]  ;;  %v214_v0 = vld [vmem:[%s7040_s1 + $0x5c8] sm:$0xff] }
  0x40   :  { %v218_v1 = vld [vmem:[%s7040_s1 + $0x5e8] sm:$0xff]  ;;  %v4396_v4 = vcombine.high %v213_v62, %v217_v63  ;;  %v4395_v10 = vcombine.low %v213_v62, %v217_v63 }
  0x41   :  { %v4398_v5 = vcombine.high %v214_v0, %v218_v1  ;;  %v4397_v11 = vcombine.low %v214_v0, %v218_v1 }
  0x42   :  { %1652 = vmatpush1.bf16.msra.mxu0 %v4331_v6  ;;  %1734 = vmatpush1.bf16.msra.mxu1 %v4333_v7  ;;  %v221_v6 = vld [vmem:[%s7040_s1 + $0x600] sm:$0xff] }
  0x43   :  { %1662 = vmatprep.subr.bf16.mxu0 %v4340_v8  ;;  %1744 = vmatprep.subr.bf16.mxu1 %v4342_v9  ;;  %v225_v7 = vld [vmem:[%s7040_s1 + $0x620] sm:$0xff]  ;;  %v222_v8 = vld [vmem:[%s7040_s1 + $0x608] sm:$0xff] }
  0x44   :  { %v226_v9 = vld [vmem:[%s7040_s1 + $0x628] sm:$0xff]  ;;  %v4404_v13 = vcombine.high %v221_v6, %v225_v7  ;;  %v4403_v19 = vcombine.low %v221_v6, %v225_v7 }
  0x45   :  { %1654 = vmatmul.mubr.bf16.vlgmr.msra.gmra.mrb[0].mxu0 %v5535_v12  ;;  %1736 = vmatmul.mubr.bf16.vlgmr.msra.gmra.mrb[0].mxu1 %v5535_v12  ;;  %v4406_v14 = vcombine.high %v222_v8, %v226_v9  ;;  %v4405_v20 = vcombine.low %v222_v8, %v226_v9 }
  0x46   :  { %1663 = vmatpush1.bf16.msra.mxu0 %v4339_v16  ;;  %1745 = vmatpush1.bf16.msra.mxu1 %v4341_v17  ;;  %v229_v16 = vld [vmem:[%s7040_s1 + $0x640] sm:$0xff] }
  0x47   :  { %1664 = vmatprep.subr.bf16.mxu0 %v4348_v53  ;;  %1746 = vmatprep.subr.bf16.mxu1 %v4350_v18  ;;  %v233_v17 = vld [vmem:[%s7040_s1 + $0x660] sm:$0xff]  ;;  %v230_v53 = vld [vmem:[%s7040_s1 + $0x648] sm:$0xff] }
  0x48   :  { %1694 = vmatprep.mubr.bf16.mxu0 %v5556_v21  ;;  %1776 = vmatprep.mubr.bf16.mxu1 %v5556_v21  ;;  %v234_v18 = vld [vmem:[%s7040_s1 + $0x668] sm:$0xff]  ;;  %v4412_v22 = vcombine.high %v229_v16, %v233_v17  ;;  %v4411_v28 = vcombine.low %v229_v16, %v233_v17 }
  0x49   :  { %v4414_v23 = vcombine.high %v230_v53, %v234_v18  ;;  %v4413_v29 = vcombine.low %v230_v53, %v234_v18 }
  0x4a   :  { %1665 = vmatpush1.bf16.msra.mxu0 %v4347_v24  ;;  %1747 = vmatpush1.bf16.msra.mxu1 %v4349_v25  ;;  %v237_v24 = vld [vmem:[%s7040_s1 + $0x680] sm:$0xff] }
  0x4b   :  { %1666 = vmatprep.subr.bf16.mxu0 %v4356_v26  ;;  %1748 = vmatprep.subr.bf16.mxu1 %v4358_v27  ;;  %v241_v25 = vld [vmem:[%s7040_s1 + $0x6a0] sm:$0xff]  ;;  %v238_v26 = vld [vmem:[%s7040_s1 + $0x688] sm:$0xff] }
  0x4c   :  { %v242_v27 = vld [vmem:[%s7040_s1 + $0x6a8] sm:$0xff]  ;;  %v4420_v30 = vcombine.high %v237_v24, %v241_v25  ;;  %v4419_v36 = vcombine.low %v237_v24, %v241_v25  ;;  %v44_v24 = vld [vmem:[%s7040_s1 + $0x78] sm:$0xff] }
  0x4d   :  { %v4422_v31 = vcombine.high %v238_v26, %v242_v27  ;;  %v4421_v37 = vcombine.low %v238_v26, %v242_v27 }
  0x4e   :  { %1667 = vmatpush1.bf16.msra.mxu0 %v4355_v32  ;;  %1749 = vmatpush1.bf16.msra.mxu1 %v4357_v33  ;;  %v245_v32 = vld [vmem:[%s7040_s1 + $0x6c0] sm:$0xff] }
  0x4f   :  { %1668 = vmatprep.subr.bf16.mxu0 %v4364_v34  ;;  %1750 = vmatprep.subr.bf16.mxu1 %v4366_v35  ;;  %v249_v33 = vld [vmem:[%s7040_s1 + $0x6e0] sm:$0xff]  ;;  %v246_v34 = vld [vmem:[%s7040_s1 + $0x6c8] sm:$0xff] }
  0x50   :  { %v250_v35 = vld [vmem:[%s7040_s1 + $0x6e8] sm:$0xff]  ;;  %v4428_v38 = vcombine.high %v245_v32, %v249_v33  ;;  %v4427_v44 = vcombine.low %v245_v32, %v249_v33 }
  0x51   :  { %v4430_v39 = vcombine.high %v246_v34, %v250_v35  ;;  %v4429_v45 = vcombine.low %v246_v34, %v250_v35  ;;  %v55_v35 = vld [vmem:[%s7040_s1 + $0xd0] sm:$0xff] }
  0x52   :  { %1669 = vmatpush1.bf16.msra.mxu0 %v4363_v40  ;;  %1751 = vmatpush1.bf16.msra.mxu1 %v4365_v41  ;;  %v253_v40 = vld [vmem:[%s7040_s1 + $0x700] sm:$0xff] }
  0x53   :  { %1670 = vmatprep.subr.bf16.mxu0 %v4372_v42  ;;  %1752 = vmatprep.subr.bf16.mxu1 %v4374_v43  ;;  %v257_v41 = vld [vmem:[%s7040_s1 + $0x720] sm:$0xff]  ;;  %v254_v42 = vld [vmem:[%s7040_s1 + $0x708] sm:$0xff] }
  0x54   :  { %v258_v43 = vld [vmem:[%s7040_s1 + $0x728] sm:$0xff]  ;;  %v4436_v46 = vcombine.high %v253_v40, %v257_v41  ;;  %v4435_v52 = vcombine.low %v253_v40, %v257_v41 }
  0x55   :  { %v4438_v47 = vcombine.high %v254_v42, %v258_v43  ;;  %v4437_v54 = vcombine.low %v254_v42, %v258_v43  ;;  %v63_v43 = vld [vmem:[%s7040_s1 + $0x110] sm:$0xff] }
  0x56   :  { %1671 = vmatpush1.bf16.msra.mxu0 %v4371_v48  ;;  %1753 = vmatpush1.bf16.msra.mxu1 %v4373_v49  ;;  %v261_v48 = vld [vmem:[%s7040_s1 + $0x740] sm:$0xff] }
  0x57   :  { %1672 = vmatprep.subr.bf16.mxu0 %v4380_v50  ;;  %1754 = vmatprep.subr.bf16.mxu1 %v4382_v51  ;;  %v265_v49 = vld [vmem:[%s7040_s1 + $0x760] sm:$0xff]  ;;  %v262_v50 = vld [vmem:[%s7040_s1 + $0x748] sm:$0xff] }
  0x58   :  { %v266_v51 = vld [vmem:[%s7040_s1 + $0x768] sm:$0xff]  ;;  %v4444_v55 = vcombine.high %v261_v48, %v265_v49  ;;  %v4443_v62 = vcombine.low %v261_v48, %v265_v49 }
  0x59   :  { %v4446_v56 = vcombine.high %v262_v50, %v266_v51  ;;  %v4445_v63 = vcombine.low %v262_v50, %v266_v51  ;;  %v71_v50 = vld [vmem:[%s7040_s1 + $0x150] sm:$0xff] }
  0x5a   :  { %1673 = vmatpush1.bf16.msra.mxu0 %v4379_v58  ;;  %1755 = vmatpush1.bf16.msra.mxu1 %v4381_v59  ;;  %v269_v58 = vld [vmem:[%s7040_s1 + $0x780] sm:$0xff] }
  0x5b   :  { %1674 = vmatprep.subr.bf16.mxu0 %v4388_v60  ;;  %1756 = vmatprep.subr.bf16.mxu1 %v4390_v61  ;;  %v273_v59 = vld [vmem:[%s7040_s1 + $0x7a0] sm:$0xff]  ;;  %v270_v60 = vld [vmem:[%s7040_s1 + $0x788] sm:$0xff] }
  0x5c   :  { %v274_v61 = vld [vmem:[%s7040_s1 + $0x7a8] sm:$0xff]  ;;  %v4452_v0 = vcombine.high %v269_v58, %v273_v59  ;;  %v4451_v6 = vcombine.low %v269_v58, %v273_v59 }
  0x5d   :  { %v4454_v1 = vcombine.high %v270_v60, %v274_v61  ;;  %v4453_v7 = vcombine.low %v270_v60, %v274_v61  ;;  %v79_v60 = vld [vmem:[%s7040_s1 + $0x190] sm:$0xff] }
  0x5e   :  { %1675 = vmatpush1.bf16.msra.mxu0 %v4387_v2  ;;  %1757 = vmatpush1.bf16.msra.mxu1 %v4389_v3  ;;  %v277_v2 = vld [vmem:[%s7040_s1 + $0x7c0] sm:$0xff]  ;;  %v83_v61 = vld [vmem:[%s7040_s1 + $0x1b0] sm:$0xff] }
  0x5f   :  { %1676 = vmatprep.subr.bf16.mxu0 %v4396_v4  ;;  %1758 = vmatprep.subr.bf16.mxu1 %v4398_v5  ;;  %v281_v3 = vld [vmem:[%s7040_s1 + $0x7e0] sm:$0xff]  ;;  %v278_v4 = vld [vmem:[%s7040_s1 + $0x7c8] sm:$0xff] }
  0x60   :  { %v282_v5 = vld [vmem:[%s7040_s1 + $0x7e8] sm:$0xff]  ;;  %v4460_v8 = vcombine.high %v277_v2, %v281_v3  ;;  %v4459_v16 = vcombine.low %v277_v2, %v281_v3  ;;  %v4264_v3 = vcombine.high %v79_v60, %v83_v61 }
  0x61   :  { %v4462_v9 = vcombine.high %v278_v4, %v282_v5  ;;  %v4461_v17 = vcombine.low %v278_v4, %v282_v5  ;;  %v87_v4 = vld [vmem:[%s7040_s1 + $0x1d0] sm:$0xff] }
  0x62   :  { %1677 = vmatpush1.bf16.msra.mxu0 %v4395_v10  ;;  %1759 = vmatpush1.bf16.msra.mxu1 %v4397_v11  ;;  %v31_v10 = vld [vmem:[%s7040_s1 + $0x10] sm:$0xff] }
  0x63   :  { %1678 = vmatprep.subr.bf16.mxu0 %v4404_v13  ;;  %1760 = vmatprep.subr.bf16.mxu1 %v4406_v14  ;;  %v35_v11 = vld [vmem:[%s7040_s1 + $0x30] sm:$0xff]  ;;  %v32_v13 = vld [vmem:[%s7040_s1 + $0x18] sm:$0xff] }
  0x64   :  { %v36_v14 = vld [vmem:[%s7040_s1 + $0x38] sm:$0xff]  ;;  %v4216_v53 = vcombine.high %v31_v10, %v35_v11  ;;  %v4215_v25 = vcombine.low %v31_v10, %v35_v11  ;;  %v91_v5 = vld [vmem:[%s7040_s1 + $0x1f0] sm:$0xff] }
  0x65   :  { %v4218_v18 = vcombine.high %v32_v13, %v36_v14  ;;  %v4217_v26 = vcombine.low %v32_v13, %v36_v14  ;;  %v4272_v11 = vcombine.high %v87_v4, %v91_v5  ;;  %v95_v13 = vld [vmem:[%s7040_s1 + $0x210] sm:$0xff] }
  0x66   :  { %1679 = vmatpush1.bf16.msra.mxu0 %v4403_v19  ;;  %1761 = vmatpush1.bf16.msra.mxu1 %v4405_v20  ;;  %v39_v19 = vld [vmem:[%s7040_s1 + $0x50] sm:$0xff] }
  0x67   :  { %1680 = vmatprep.subr.bf16.mxu0 %v4412_v22  ;;  %1762 = vmatprep.subr.bf16.mxu1 %v4414_v23  ;;  %v43_v20 = vld [vmem:[%s7040_s1 + $0x70] sm:$0xff]  ;;  %v5744_v22 = vcombine.low %v5546_v15, %v5546_v15  ;;  %v40_v23 = vld [vmem:[%s7040_s1 + $0x58] sm:$0xff] }
  0x68   :  { %v4224_v27 = vcombine.high %v39_v19, %v43_v20  ;;  %v47_v15 = vld [vmem:[%s7040_s1 + $0x90] sm:$0xff]  ;;  %v4223_v32 = vcombine.low %v39_v19, %v43_v20  ;;  %v4225_v33 = vcombine.low %v40_v23, %v44_v24 }
  0x69   :  { %v99_v14 = vld [vmem:[%s7040_s1 + $0x230] sm:$0xff] }
  0x6a   :  { %1681 = vmatpush1.bf16.msra.mxu0 %v4411_v28  ;;  %1763 = vmatpush1.bf16.msra.mxu1 %v4413_v29  ;;  %v4226_v28 = vcombine.high %v40_v23, %v44_v24  ;;  %v51_v29 = vld [vmem:[%s7040_s1 + $0xb0] sm:$0xff]  ;;  %v4280_v20 = vcombine.high %v95_v13, %v99_v14 }
  0x6b   :  { %1682 = vmatprep.subr.bf16.mxu0 %v4420_v30  ;;  %1764 = vmatprep.subr.bf16.mxu1 %v4422_v31  ;;  %v48_v30 = vld [vmem:[%s7040_s1 + $0x98] sm:$0xff]  ;;  %v4232_v34 = vcombine.high %v47_v15, %v51_v29  ;;  %v4231_v40 = vcombine.low %v47_v15, %v51_v29  ;;  %v103_v23 = vld [vmem:[%s7040_s1 + $0x250] sm:$0xff] }
  0x6c   :  { %v52_v31 = vld [vmem:[%s7040_s1 + $0xb8] sm:$0xff]  ;;  %v107_v24 = vld [vmem:[%s7040_s1 + $0x270] sm:$0xff] }
  0x6d   :  { %v4233_v41 = vcombine.low %v48_v30, %v52_v31  ;;  %v4288_v29 = vcombine.high %v103_v23, %v107_v24 }
  0x6e   :  { %1683 = vmatpush1.bf16.msra.mxu0 %v4419_v36  ;;  %1765 = vmatpush1.bf16.msra.mxu1 %v4421_v37  ;;  %v4234_v36 = vcombine.high %v48_v30, %v52_v31  ;;  %v59_v37 = vld [vmem:[%s7040_s1 + $0xf0] sm:$0xff] }
  0x6f   :  { %1684 = vmatprep.subr.bf16.mxu0 %v4428_v38  ;;  %1766 = vmatprep.subr.bf16.mxu1 %v4430_v39  ;;  %v56_v38 = vld [vmem:[%s7040_s1 + $0xd8] sm:$0xff]  ;;  %v4240_v42 = vcombine.high %v55_v35, %v59_v37  ;;  %v111_v30 = vld [vmem:[%s7040_s1 + $0x290] sm:$0xff] }
  0x70   :  { %v60_v39 = vld [vmem:[%s7040_s1 + $0xf8] sm:$0xff]  ;;  %v115_v31 = vld [vmem:[%s7040_s1 + $0x2b0] sm:$0xff] }
  0x71   :  { %v4241_v48 = vcombine.low %v56_v38, %v60_v39 }
  0x72   :  { %1685 = vmatpush1.bf16.msra.mxu0 %v4427_v44  ;;  %1767 = vmatpush1.bf16.msra.mxu1 %v4429_v45  ;;  %v4242_v44 = vcombine.high %v56_v38, %v60_v39  ;;  %v67_v45 = vld [vmem:[%s7040_s1 + $0x130] sm:$0xff] }
  0x73   :  { %1686 = vmatprep.subr.bf16.mxu0 %v4436_v46  ;;  %1768 = vmatprep.subr.bf16.mxu1 %v4438_v47  ;;  %v68_v46 = vld [vmem:[%s7040_s1 + $0x138] sm:$0xff]  ;;  %v4239_v47 = vcombine.low %v55_v35, %v59_v37  ;;  %v4248_v49 = vcombine.high %v63_v43, %v67_v45  ;;  %v4287_v35 = vcombine.low %v103_v23, %v107_v24  ;;  %v119_v38 = vld [vmem:[%s7040_s1 + $0x2d0] sm:$0xff] }
  0x74   :  { %v4296_v37 = vcombine.high %v111_v30, %v115_v31  ;;  %v123_v39 = vld [vmem:[%s7040_s1 + $0x2f0] sm:$0xff] }
  0x75   :  { %v167_v24 = vld [vmem:[%s7040_s1 + $0x450] sm:$0xff] }
  0x76   :  { %1687 = vmatpush1.bf16.msra.mxu0 %v4435_v52  ;;  %1769 = vmatpush1.bf16.msra.mxu1 %v4437_v54  ;;  %v75_v52 = vld [vmem:[%s7040_s1 + $0x170] sm:$0xff]  ;;  %v72_v54 = vld [vmem:[%s7040_s1 + $0x158] sm:$0xff] }
  0x77   :  { %1688 = vmatprep.subr.bf16.mxu0 %v4444_v55  ;;  %1770 = vmatprep.subr.bf16.mxu1 %v4446_v56  ;;  %v76_v55 = vld [vmem:[%s7040_s1 + $0x178] sm:$0xff]  ;;  %v4247_v56 = vcombine.low %v63_v43, %v67_v45  ;;  %v4256_v59 = vcombine.high %v71_v50, %v75_v52  ;;  %v4295_v43 = vcombine.low %v111_v30, %v115_v31  ;;  %v175_v31 = vld [vmem:[%s7040_s1 + $0x490] sm:$0xff] }
  0x78   :  { %v4257_v2 = vcombine.low %v72_v54, %v76_v55  ;;  %v4304_v45 = vcombine.high %v119_v38, %v123_v39 }
  0x7a   :  { %1689 = vmatpush1.bf16.msra.mxu0 %v4443_v62  ;;  %1771 = vmatpush1.bf16.msra.mxu1 %v4445_v63  ;;  %v80_v62 = vld [vmem:[%s7040_s1 + $0x198] sm:$0xff]  ;;  %v4258_v63 = vcombine.high %v72_v54, %v76_v55  ;;  %v135_v54 = vld [vmem:[%s7040_s1 + $0x350] sm:$0xff] }
  0x7b   :  { %1690 = vmatprep.subr.bf16.mxu0 %v4452_v0  ;;  %1772 = vmatprep.subr.bf16.mxu1 %v4454_v1  ;;  %v84_v0 = vld [vmem:[%s7040_s1 + $0x1b8] sm:$0xff]  ;;  %v4255_v1 = vcombine.low %v71_v50, %v75_v52  ;;  %v4303_v50 = vcombine.low %v119_v38, %v123_v39  ;;  %v139_v55 = vld [vmem:[%s7040_s1 + $0x370] sm:$0xff] }
  0x7c   :  { %v4265_v10 = vcombine.low %v80_v62, %v84_v0  ;;  %v183_v39 = vld [vmem:[%s7040_s1 + $0x4d0] sm:$0xff] }
  0x7e   :  { %1691 = vmatpush1.bf16.msra.mxu0 %v4451_v6  ;;  %1773 = vmatpush1.bf16.msra.mxu1 %v4453_v7  ;;  %v88_v6 = vld [vmem:[%s7040_s1 + $0x1d8] sm:$0xff]  ;;  %v4266_v7 = vcombine.high %v80_v62, %v84_v0  ;;  %v4320_v62 = vcombine.high %v135_v54, %v139_v55  ;;  %v147_v0 = vld [vmem:[%s7040_s1 + $0x3b0] sm:$0xff] }
  0x7f   :  { %1692 = vmatprep.subr.bf16.mxu0 %v4460_v8  ;;  %1774 = vmatprep.subr.bf16.mxu1 %v4462_v9  ;;  %v92_v8 = vld [vmem:[%s7040_s1 + $0x1f8] sm:$0xff]  ;;  %v4263_v9 = vcombine.low %v79_v60, %v83_v61 }
  0x80   :  { %v4273_v19 = vcombine.low %v88_v6, %v92_v8 }
  0x82   :  { %1693 = vmatpush1.bf16.msra.mxu0 %v4459_v16  ;;  %1775 = vmatpush1.bf16.msra.mxu1 %v4461_v17  ;;  %v96_v16 = vld [vmem:[%s7040_s1 + $0x218] sm:$0xff]  ;;  %v4274_v17 = vcombine.high %v88_v6, %v92_v8  ;;  %v155_v8 = vld [vmem:[%s7040_s1 + $0x3f0] sm:$0xff] }
  0x83   :  { %1785 = vmatprep.subr.bf16.mxu0 %v4216_v53  ;;  %1867 = vmatprep.subr.bf16.mxu1 %v4218_v18  ;;  %v100_v53 = vld [vmem:[%s7040_s1 + $0x238] sm:$0xff]  ;;  %v4271_v18 = vcombine.low %v87_v4, %v91_v5  ;;  %v4319_v4 = vcombine.low %v135_v54, %v139_v55  ;;  %v203_v54 = vld [vmem:[%s7040_s1 + $0x570] sm:$0xff] }
  0x84   :  { %v4281_v15 = vcombine.low %v96_v16, %v100_v53 }
  0x85   :  { %1695 = vmatmul.mubr.bf16.vlgmr.msra.gmra.mrb[0].mxu0 %v5744_v22  ;;  %1777 = vmatmul.mubr.bf16.vlgmr.msra.gmra.mrb[0].mxu1 %v5744_v22 }
  0x86   :  { %1786 = vmatpush1.bf16.msra.mxu0 %v4215_v25  ;;  %1868 = vmatpush1.bf16.msra.mxu1 %v4217_v26  ;;  %v104_v25 = vld [vmem:[%s7040_s1 + $0x258] sm:$0xff]  ;;  %v4282_v26 = vcombine.high %v96_v16, %v100_v53  ;;  %v163_v16 = vld [vmem:[%s7040_s1 + $0x430] sm:$0xff] }
  0x87   :  { %1787 = vmatprep.subr.bf16.mxu0 %v4224_v27  ;;  %1869 = vmatprep.subr.bf16.mxu1 %v4226_v28  ;;  %v108_v27 = vld [vmem:[%s7040_s1 + $0x278] sm:$0xff]  ;;  %v4279_v28 = vcombine.low %v95_v13, %v99_v14  ;;  %v159_v14 = vld [vmem:[%s7040_s1 + $0x410] sm:$0xff] }
  0x88   :  { %1817 = vmatprep.mubr.bf16.mxu0 %v5409_v57  ;;  %1899 = vmatprep.mubr.bf16.mxu1 %v5409_v57  ;;  %v64_v57 = vld [vmem:[%s7040_s1 + $0x118] sm:$0xff]  ;;  %v4343_v30 = vcombine.low %v159_v14, %v163_v16 }
  0x89   :  { %v4250_v51 = vcombine.high %v64_v57, %v68_v46  ;;  %v4249_v58 = vcombine.low %v64_v57, %v68_v46  ;;  %v127_v57 = vld [vmem:[%s7040_s1 + $0x310] sm:$0xff] }
  0x8a   :  { %1788 = vmatpush1.bf16.msra.mxu0 %v4223_v32  ;;  %1870 = vmatpush1.bf16.msra.mxu1 %v4225_v33  ;;  %v112_v32 = vld [vmem:[%s7040_s1 + $0x298] sm:$0xff]  ;;  %v4290_v33 = vcombine.high %v104_v25, %v108_v27  ;;  %v131_v46 = vld [vmem:[%s7040_s1 + $0x330] sm:$0xff] }
  0x8b   :  { %1789 = vmatprep.subr.bf16.mxu0 %v4232_v34  ;;  %1871 = vmatprep.subr.bf16.mxu1 %v4234_v36  ;;  %v116_v34 = vld [vmem:[%s7040_s1 + $0x2b8] sm:$0xff]  ;;  %v4289_v36 = vcombine.low %v104_v25, %v108_v27  ;;  %v4312_v52 = vcombine.high %v127_v57, %v131_v46  ;;  %v4311_v60 = vcombine.low %v127_v57, %v131_v46  ;;  %v171_v25 = vld [vmem:[%s7040_s1 + $0x470] sm:$0xff] }
  0x8c   :  { %v4344_v27 = vcombine.high %v159_v14, %v163_v16  ;;  %v4351_v38 = vcombine.low %v167_v24, %v171_v25  ;;  %v191_v57 = vld [vmem:[%s7040_s1 + $0x510] sm:$0xff] }
  0x8d   :  { %v195_v46 = vld [vmem:[%s7040_s1 + $0x530] sm:$0xff] }
  0x8e   :  { %1790 = vmatpush1.bf16.msra.mxu0 %v4231_v40  ;;  %1872 = vmatpush1.bf16.msra.mxu1 %v4233_v41  ;;  %v120_v40 = vld [vmem:[%s7040_s1 + $0x2d8] sm:$0xff]  ;;  %v4298_v41 = vcombine.high %v112_v32, %v116_v34 }
  0x8f   :  { %1791 = vmatprep.subr.bf16.mxu0 %v4240_v42  ;;  %1873 = vmatprep.subr.bf16.mxu1 %v4242_v44  ;;  %v124_v42 = vld [vmem:[%s7040_s1 + $0x2f8] sm:$0xff]  ;;  %v4297_v44 = vcombine.low %v112_v32, %v116_v34  ;;  %v179_v32 = vld [vmem:[%s7040_s1 + $0x4b0] sm:$0xff]  ;;  %v4352_v34 = vcombine.high %v167_v24, %v171_v25 }
  0x92   :  { %1792 = vmatpush1.bf16.msra.mxu0 %v4239_v47  ;;  %1874 = vmatpush1.bf16.msra.mxu1 %v4241_v48  ;;  %v128_v47 = vld [vmem:[%s7040_s1 + $0x318] sm:$0xff]  ;;  %v4306_v48 = vcombine.high %v120_v40, %v124_v42 }
  0x93   :  { %1793 = vmatprep.subr.bf16.mxu0 %v4248_v49  ;;  %1875 = vmatprep.subr.bf16.mxu1 %v4250_v51  ;;  %v132_v49 = vld [vmem:[%s7040_s1 + $0x338] sm:$0xff]  ;;  %v4305_v51 = vcombine.low %v120_v40, %v124_v42  ;;  %v187_v40 = vld [vmem:[%s7040_s1 + $0x4f0] sm:$0xff]  ;;  %v4360_v42 = vcombine.high %v175_v31, %v179_v32 }
  0x94   :  { %v4313_v61 = vcombine.low %v128_v47, %v132_v49 }
  0x96   :  { %1794 = vmatpush1.bf16.msra.mxu0 %v4247_v56  ;;  %1876 = vmatpush1.bf16.msra.mxu1 %v4249_v58  ;;  %v136_v56 = vld [vmem:[%s7040_s1 + $0x358] sm:$0xff]  ;;  %v4314_v58 = vcombine.high %v128_v47, %v132_v49 }
  0x97   :  { %1795 = vmatprep.subr.bf16.mxu0 %v4256_v59  ;;  %1877 = vmatprep.subr.bf16.mxu1 %v4258_v63  ;;  %v140_v59 = vld [vmem:[%s7040_s1 + $0x378] sm:$0xff]  ;;  %v143_v63 = vld [vmem:[%s7040_s1 + $0x390] sm:$0xff] }
  0x98   :  { %v4321_v5 = vcombine.low %v136_v56, %v140_v59  ;;  %v4328_v6 = vcombine.high %v143_v63, %v147_v0  ;;  %v4327_v13 = vcombine.low %v143_v63, %v147_v0  ;;  %v192_v49 = vld [vmem:[%s7040_s1 + $0x518] sm:$0xff]  ;;  %v211_v63 = vld [vmem:[%s7040_s1 + $0x5b0] sm:$0xff] }
  0x9a   :  { %1796 = vmatpush1.bf16.msra.mxu0 %v4255_v1  ;;  %1878 = vmatpush1.bf16.msra.mxu1 %v4257_v2  ;;  %v144_v1 = vld [vmem:[%s7040_s1 + $0x398] sm:$0xff]  ;;  %v4322_v2 = vcombine.high %v136_v56, %v140_v59  ;;  %v4376_v56 = vcombine.high %v191_v57, %v195_v46 }
  0x9b   :  { %1797 = vmatprep.subr.bf16.mxu0 %v4264_v3  ;;  %1879 = vmatprep.subr.bf16.mxu1 %v4266_v7  ;;  %v148_v3 = vld [vmem:[%s7040_s1 + $0x3b8] sm:$0xff]  ;;  %v151_v7 = vld [vmem:[%s7040_s1 + $0x3d0] sm:$0xff] }
  0x9c   :  { %v4336_v53 = vcombine.high %v151_v7, %v155_v8  ;;  %v4335_v23 = vcombine.low %v151_v7, %v155_v8  ;;  %v204_v59 = vld [vmem:[%s7040_s1 + $0x578] sm:$0xff]  ;;  %v215_v8 = vld [vmem:[%s7040_s1 + $0x5d0] sm:$0xff] }
  0x9e   :  { %1798 = vmatpush1.bf16.msra.mxu0 %v4263_v9  ;;  %1880 = vmatpush1.bf16.msra.mxu1 %v4265_v10  ;;  %v152_v9 = vld [vmem:[%s7040_s1 + $0x3d8] sm:$0xff]  ;;  %v4330_v10 = vcombine.high %v144_v1, %v148_v3 }
  0x9f   :  { %1799 = vmatprep.subr.bf16.mxu0 %v4272_v11  ;;  %1881 = vmatprep.subr.bf16.mxu1 %v4274_v17  ;;  %v156_v11 = vld [vmem:[%s7040_s1 + $0x3f8] sm:$0xff]  ;;  %v4329_v17 = vcombine.low %v144_v1, %v148_v3 }
  0xa0   :  { %v212_v3 = vld [vmem:[%s7040_s1 + $0x5b8] sm:$0xff] }
  0xa2   :  { %1800 = vmatpush1.bf16.msra.mxu0 %v4271_v18  ;;  %1882 = vmatpush1.bf16.msra.mxu1 %v4273_v19  ;;  %v160_v18 = vld [vmem:[%s7040_s1 + $0x418] sm:$0xff]  ;;  %v4338_v19 = vcombine.high %v152_v9, %v156_v11 }
  0xa3   :  { %1801 = vmatprep.subr.bf16.mxu0 %v4280_v20  ;;  %1883 = vmatprep.subr.bf16.mxu1 %v4282_v26  ;;  %v164_v20 = vld [vmem:[%s7040_s1 + $0x438] sm:$0xff]  ;;  %v4337_v26 = vcombine.low %v152_v9, %v156_v11  ;;  %v219_v9 = vld [vmem:[%s7040_s1 + $0x5f0] sm:$0xff] }
  0xa4   :  { %v216_v11 = vld [vmem:[%s7040_s1 + $0x5d8] sm:$0xff]  ;;  %v4399_v24 = vcombine.low %v215_v8, %v219_v9 }
  0xa6   :  { %1802 = vmatpush1.bf16.msra.mxu0 %v4279_v28  ;;  %1884 = vmatpush1.bf16.msra.mxu1 %v4281_v15  ;;  %v168_v28 = vld [vmem:[%s7040_s1 + $0x458] sm:$0xff] }
  0xa7   :  { %1803 = vmatprep.subr.bf16.mxu0 %v4288_v29  ;;  %1885 = vmatprep.subr.bf16.mxu1 %v4290_v33  ;;  %v172_v15 = vld [vmem:[%s7040_s1 + $0x478] sm:$0xff]  ;;  %v4346_v29 = vcombine.high %v160_v18, %v164_v20  ;;  %v4345_v33 = vcombine.low %v160_v18, %v164_v20  ;;  %v227_v18 = vld [vmem:[%s7040_s1 + $0x630] sm:$0xff] }
  0xa8   :  { %v224_v20 = vld [vmem:[%s7040_s1 + $0x618] sm:$0xff] }
  0xaa   :  { %1804 = vmatpush1.bf16.msra.mxu0 %v4287_v35  ;;  %1886 = vmatpush1.bf16.msra.mxu1 %v4289_v36  ;;  %v176_v35 = vld [vmem:[%s7040_s1 + $0x498] sm:$0xff] }
  0xab   :  { %1805 = vmatprep.subr.bf16.mxu0 %v4296_v37  ;;  %1887 = vmatprep.subr.bf16.mxu1 %v4298_v41  ;;  %v180_v36 = vld [vmem:[%s7040_s1 + $0x4b8] sm:$0xff]  ;;  %v4354_v37 = vcombine.high %v168_v28, %v172_v15  ;;  %v4353_v41 = vcombine.low %v168_v28, %v172_v15  ;;  %v235_v28 = vld [vmem:[%s7040_s1 + $0x670] sm:$0xff] }
  0xac   :  { %v4361_v47 = vcombine.low %v176_v35, %v180_v36 }
  0xae   :  { %1806 = vmatpush1.bf16.msra.mxu0 %v4295_v43  ;;  %1888 = vmatpush1.bf16.msra.mxu1 %v4297_v44  ;;  %v184_v43 = vld [vmem:[%s7040_s1 + $0x4d8] sm:$0xff]  ;;  %v4362_v44 = vcombine.high %v176_v35, %v180_v36  ;;  %v243_v35 = vld [vmem:[%s7040_s1 + $0x6b0] sm:$0xff] }
  0xaf   :  { %1807 = vmatprep.subr.bf16.mxu0 %v4304_v45  ;;  %1889 = vmatprep.subr.bf16.mxu1 %v4306_v48  ;;  %v4359_v45 = vcombine.low %v175_v31, %v179_v32  ;;  %v4368_v48 = vcombine.high %v183_v39, %v187_v40  ;;  %v240_v36 = vld [vmem:[%s7040_s1 + $0x698] sm:$0xff] }
  0xb2   :  { %1808 = vmatpush1.bf16.msra.mxu0 %v4303_v50  ;;  %1890 = vmatpush1.bf16.msra.mxu1 %v4305_v51  ;;  %v4367_v51 = vcombine.low %v183_v39, %v187_v40  ;;  %v247_v40 = vld [vmem:[%s7040_s1 + $0x6d0] sm:$0xff] }
  0xb3   :  { %1809 = vmatprep.subr.bf16.mxu0 %v4312_v52  ;;  %1891 = vmatprep.subr.bf16.mxu1 %v4314_v58  ;;  %v199_v52 = vld [vmem:[%s7040_s1 + $0x550] sm:$0xff]  ;;  %v200_v58 = vld [vmem:[%s7040_s1 + $0x558] sm:$0xff] }
  0xb4   :  { %v4384_v1 = vcombine.high %v199_v52, %v203_v54 }
  0xb6   :  { %1810 = vmatpush1.bf16.msra.mxu0 %v4311_v60  ;;  %1892 = vmatpush1.bf16.msra.mxu1 %v4313_v61  ;;  %v4375_v61 = vcombine.low %v191_v57, %v195_v46  ;;  %v255_v46 = vld [vmem:[%s7040_s1 + $0x710] sm:$0xff] }
  0xb7   :  { %1811 = vmatprep.subr.bf16.mxu0 %v4320_v62  ;;  %1893 = vmatprep.subr.bf16.mxu1 %v4322_v2  ;;  %v207_v62 = vld [vmem:[%s7040_s1 + $0x590] sm:$0xff]  ;;  %v208_v2 = vld [vmem:[%s7040_s1 + $0x598] sm:$0xff] }
  0xb8   :  { %v4392_v7 = vcombine.high %v207_v62, %v211_v63  ;;  %v4391_v14 = vcombine.low %v207_v62, %v211_v63  ;;  %v4393_v16 = vcombine.low %v208_v2, %v212_v3  ;;  %v271_v63 = vld [vmem:[%s7040_s1 + $0x790] sm:$0xff] }
  0xba   :  { %1812 = vmatpush1.bf16.msra.mxu0 %v4319_v4  ;;  %1894 = vmatpush1.bf16.msra.mxu1 %v4321_v5  ;;  %v4386_v4 = vcombine.high %v200_v58, %v204_v59  ;;  %v4383_v5 = vcombine.low %v199_v52, %v203_v54  ;;  %v263_v54 = vld [vmem:[%s7040_s1 + $0x750] sm:$0xff] }
  0xbb   :  { %1813 = vmatprep.subr.bf16.mxu0 %v4328_v6  ;;  %1895 = vmatprep.subr.bf16.mxu1 %v4330_v10  ;;  %v4385_v6 = vcombine.low %v200_v58, %v204_v59  ;;  %v4394_v10 = vcombine.high %v208_v2, %v212_v3  ;;  %v264_v59 = vld [vmem:[%s7040_s1 + $0x758] sm:$0xff] }
  0xbc   :  { %v272_v3 = vld [vmem:[%s7040_s1 + $0x798] sm:$0xff] }
  0xbe   :  { %1814 = vmatpush1.bf16.msra.mxu0 %v4327_v13  ;;  %1896 = vmatpush1.bf16.msra.mxu1 %v4329_v17  ;;  %v220_v13 = vld [vmem:[%s7040_s1 + $0x5f8] sm:$0xff]  ;;  %v4400_v17 = vcombine.high %v215_v8, %v219_v9  ;;  %v283_v8 = vld [vmem:[%s7040_s1 + $0x7f0] sm:$0xff] }
  0xbf   :  { %1815 = vmatprep.subr.bf16.mxu0 %v4336_v53  ;;  %1897 = vmatprep.subr.bf16.mxu1 %v4338_v19  ;;  %v223_v53 = vld [vmem:[%s7040_s1 + $0x610] sm:$0xff]  ;;  %v4402_v19 = vcombine.high %v216_v11, %v220_v13  ;;  %v4401_v25 = vcombine.low %v216_v11, %v220_v13  ;;  %v280_v11 = vld [vmem:[%s7040_s1 + $0x7d8] sm:$0xff] }
  0xc0   :  { %v4407_v31 = vcombine.low %v223_v53, %v227_v18  ;;  %v284_v13 = vld [vmem:[%s7040_s1 + $0x7f8] sm:$0xff] }
  0xc2   :  { %1816 = vmatpush1.bf16.msra.mxu0 %v4335_v23  ;;  %1898 = vmatpush1.bf16.msra.mxu1 %v4337_v26  ;;  %v228_v23 = vld [vmem:[%s7040_s1 + $0x638] sm:$0xff]  ;;  %v4408_v26 = vcombine.high %v223_v53, %v227_v18  ;;  %v4466_v18 = vcombine.high %v280_v11, %v284_v13 }
  0xc3   :  { %1826 = vmatprep.subr.bf16.mxu0 %v4344_v27  ;;  %1908 = vmatprep.subr.bf16.mxu1 %v4346_v29  ;;  %v231_v27 = vld [vmem:[%s7040_s1 + $0x650] sm:$0xff]  ;;  %v4410_v15 = vcombine.high %v224_v20, %v228_v23  ;;  %v232_v29 = vld [vmem:[%s7040_s1 + $0x658] sm:$0xff]  ;;  %v4409_v32 = vcombine.low %v224_v20, %v228_v23  ;;  %v4465_v20 = vcombine.low %v280_v11, %v284_v13 }
  0xc4   :  { %v4415_v39 = vcombine.low %v231_v27, %v235_v28  ;;  %v4858_v23 = vld [vmem:[%s7042_s3 + $0x4] ss:$16 sps:$4 sm:$0xff]   ;;  %v4937_v11 = vld [vmem:[%s7042_s3 + $0x1a8] ss:$16 sps:$4 sm:$0xff]  }
  0xc5   :  { %1818 = vmatmul.mubr.bf16.vlgmr.msra.gmra.mrb[4].mxu0 %v5535_v12  ;;  %1900 = vmatmul.mubr.bf16.vlgmr.msra.gmra.mrb[4].mxu1 %v5535_v12  ;;  %v188_v12 = vld [vmem:[%s7040_s1 + $0x4f8] sm:$0xff]  ;;  %v4942_v13 = vld [vmem:[%s7042_s3 + $0x1c4] ss:$16 sps:$4 sm:$0xff]  }
  0xc6   :  { %1827 = vmatpush1.bf16.msra.mxu0 %v4343_v30  ;;  %1909 = vmatpush1.bf16.msra.mxu1 %v4345_v33  ;;  %v4370_v50 = vcombine.high %v184_v43, %v188_v12  ;;  %v4369_v55 = vcombine.low %v184_v43, %v188_v12  ;;  %v236_v30 = vld [vmem:[%s7040_s1 + $0x678] sm:$0xff]  ;;  %v4416_v33 = vcombine.high %v231_v27, %v235_v28  ;;  %v4864_v27 = vld [vmem:[%s7042_s3 + $0x24] ss:$16 sps:$4 sm:$0xff]  }
  0xc7   :  { %1828 = vmatprep.subr.bf16.mxu0 %v4352_v34  ;;  %1910 = vmatprep.subr.bf16.mxu1 %v4354_v37  ;;  %v239_v34 = vld [vmem:[%s7040_s1 + $0x690] sm:$0xff]  ;;  %v4418_v37 = vcombine.high %v232_v29, %v236_v30  ;;  %v248_v12 = vld [vmem:[%s7040_s1 + $0x6d8] sm:$0xff] }
  0xc8   :  { %1858 = vmatprep.mubr.bf16.mxu0 %v5556_v21  ;;  %1940 = vmatprep.mubr.bf16.mxu1 %v5556_v21  ;;  %v196_v21 = vld [vmem:[%s7040_s1 + $0x538] sm:$0xff]  ;;  %v4424_v43 = vcombine.high %v239_v34, %v243_v35  ;;  %v4423_v57 = vcombine.low %v239_v34, %v243_v35  ;;  %v4874_v35 = vld [vmem:[%s7042_s3 + $0x60] ss:$16 sps:$4 sm:$0xff]  }
  0xc9   :  { %v4378_v60 = vcombine.high %v192_v49, %v196_v21  ;;  %v4377_v0 = vcombine.low %v192_v49, %v196_v21  ;;  %v256_v21 = vld [vmem:[%s7040_s1 + $0x718] sm:$0xff] }
  0xca   :  { %1829 = vmatpush1.bf16.msra.mxu0 %v4351_v38  ;;  %1911 = vmatpush1.bf16.msra.mxu1 %v4353_v41  ;;  %v244_v38 = vld [vmem:[%s7040_s1 + $0x6b8] sm:$0xff]  ;;  %v251_v41 = vld [vmem:[%s7040_s1 + $0x6f0] sm:$0xff] }
  0xcb   :  { %1830 = vmatprep.subr.bf16.mxu0 %v4360_v42  ;;  %1912 = vmatprep.subr.bf16.mxu1 %v4362_v44  ;;  %v4417_v42 = vcombine.low %v232_v29, %v236_v30  ;;  %v252_v44 = vld [vmem:[%s7040_s1 + $0x6f8] sm:$0xff]  ;;  %v4432_v49 = vcombine.high %v247_v40, %v251_v41  ;;  %v4431_v52 = vcombine.low %v247_v40, %v251_v41  ;;  %v4870_v30 = vld [vmem:[%s7042_s3 + $0x44] ss:$16 sps:$4 sm:$0xff]  }
  0xcc   :  { %v4867_v28 = vld [vmem:[%s7042_s3 + $0x2c] ss:$16 sps:$4 sm:$0xff]   ;;  %v4865_v29 = vld [vmem:[%s7042_s3 + $0x28] ss:$16 sps:$4 sm:$0xff]   ;;  %v4888_v41 = vld [vmem:[%s7042_s3 + $0xa4] ss:$16 sps:$4 sm:$0xff]  }
  0xcd   :  { %v4879_v34 = vld [vmem:[%s7042_s3 + $0x6c] ss:$16 sps:$4 sm:$0xff]   ;;  %v4883_v40 = vld [vmem:[%s7042_s3 + $0x88] ss:$16 sps:$4 sm:$0xff]  }
  0xce   :  { %1831 = vmatpush1.bf16.msra.mxu0 %v4359_v45  ;;  %1913 = vmatpush1.bf16.msra.mxu1 %v4361_v47  ;;  %v4426_v45 = vcombine.high %v240_v36, %v244_v38  ;;  %v259_v47 = vld [vmem:[%s7040_s1 + $0x730] sm:$0xff] }
  0xcf   :  { %1832 = vmatprep.subr.bf16.mxu0 %v4368_v48  ;;  %1914 = vmatprep.subr.bf16.mxu1 %v4370_v50  ;;  %v4425_v48 = vcombine.low %v240_v36, %v244_v38  ;;  %v260_v50 = vld [vmem:[%s7040_s1 + $0x738] sm:$0xff]  ;;  %v4440_v58 = vcombine.high %v255_v46, %v259_v47  ;;  %v4439_v62 = vcombine.low %v255_v46, %v259_v47  ;;  %v4900_v47 = vld [vmem:[%s7042_s3 + $0xe4] ss:$16 sps:$4 sm:$0xff]  }
  0xd0   :  { %v4877_v36 = vld [vmem:[%s7042_s3 + $0x68] ss:$16 sps:$4 sm:$0xff]   ;;  %v4885_v38 = vld [vmem:[%s7042_s3 + $0x8c] ss:$16 sps:$4 sm:$0xff]  }
  0xd1   :  { %v4895_v46 = vld [vmem:[%s7042_s3 + $0xc8] ss:$16 sps:$4 sm:$0xff]  }
  0xd2   :  { %1833 = vmatpush1.bf16.msra.mxu0 %v4367_v51  ;;  %1915 = vmatpush1.bf16.msra.mxu1 %v4369_v55  ;;  %v4434_v51 = vcombine.high %v248_v12, %v252_v44  ;;  %v267_v55 = vld [vmem:[%s7040_s1 + $0x770] sm:$0xff] }
  0xd3   :  { %1834 = vmatprep.subr.bf16.mxu0 %v4376_v56  ;;  %1916 = vmatprep.subr.bf16.mxu1 %v4378_v60  ;;  %v4433_v56 = vcombine.low %v248_v12, %v252_v44  ;;  %v268_v60 = vld [vmem:[%s7040_s1 + $0x778] sm:$0xff]  ;;  %v4448_v2 = vcombine.high %v263_v54, %v267_v55  ;;  %v4894_v44 = vld [vmem:[%s7042_s3 + $0xc4] ss:$16 sps:$4 sm:$0xff]  }
  0xd4   :  { %v4449_v9 = vcombine.low %v264_v59, %v268_v60  ;;  %v4889_v12 = vld [vmem:[%s7042_s3 + $0xa8] ss:$16 sps:$4 sm:$0xff]  }
  0xd6   :  { %1835 = vmatpush1.bf16.msra.mxu0 %v4375_v61  ;;  %1917 = vmatpush1.bf16.msra.mxu1 %v4377_v0  ;;  %v4442_v61 = vcombine.high %v256_v21, %v260_v50  ;;  %v275_v0 = vld [vmem:[%s7040_s1 + $0x7b0] sm:$0xff] }
  0xd7   :  { %1836 = vmatprep.subr.bf16.mxu0 %v4384_v1  ;;  %1918 = vmatprep.subr.bf16.mxu1 %v4386_v4  ;;  %v4441_v1 = vcombine.low %v256_v21, %v260_v50  ;;  %v276_v4 = vld [vmem:[%s7040_s1 + $0x7b8] sm:$0xff]  ;;  %v4906_v50 = vld [vmem:[%s7042_s3 + $0x104] ss:$16 sps:$4 sm:$0xff]  }
  0xd8   :  { %v4901_v21 = vld [vmem:[%s7042_s3 + $0xe8] ss:$16 sps:$4 sm:$0xff]  }
  0xda   :  { %1837 = vmatpush1.bf16.msra.mxu0 %v4383_v5  ;;  %1919 = vmatpush1.bf16.msra.mxu1 %v4385_v6  ;;  %v4450_v5 = vcombine.high %v264_v59, %v268_v60  ;;  %v4447_v6 = vcombine.low %v263_v54, %v267_v55  ;;  %v4907_v54 = vld [vmem:[%s7042_s3 + $0x108] ss:$16 sps:$4 sm:$0xff]   ;;  %v4912_v55 = vld [vmem:[%s7042_s3 + $0x124] ss:$16 sps:$4 sm:$0xff]  }
  0xdb   :  { %1838 = vmatprep.subr.bf16.mxu0 %v4392_v7  ;;  %1920 = vmatprep.subr.bf16.mxu1 %v4394_v10  ;;  %v279_v7 = vld [vmem:[%s7040_s1 + $0x7d0] sm:$0xff]  ;;  %v4456_v10 = vcombine.high %v271_v63, %v275_v0  ;;  %v4913_v59 = vld [vmem:[%s7042_s3 + $0x128] ss:$16 sps:$4 sm:$0xff]  }
  0xdc   :  { %v4464_v53 = vcombine.high %v279_v7, %v283_v8  ;;  %v4918_v60 = vld [vmem:[%s7042_s3 + $0x144] ss:$16 sps:$4 sm:$0xff]  }
  0xde   :  { %1839 = vmatpush1.bf16.msra.mxu0 %v4391_v14  ;;  %1921 = vmatpush1.bf16.msra.mxu1 %v4393_v16  ;;  %v4458_v14 = vcombine.high %v272_v3, %v276_v4  ;;  %v4455_v16 = vcombine.low %v271_v63, %v275_v0  ;;  %v4919_v63 = vld [vmem:[%s7042_s3 + $0x148] ss:$16 sps:$4 sm:$0xff]   ;;  %v4924_v0 = vld [vmem:[%s7042_s3 + $0x164] ss:$16 sps:$4 sm:$0xff]  }
  0xdf   :  { %1840 = vmatprep.subr.bf16.mxu0 %v4400_v17  ;;  %1922 = vmatprep.subr.bf16.mxu1 %v4402_v19  ;;  %v4457_v17 = vcombine.low %v272_v3, %v276_v4  ;;  %v4463_v19 = vcombine.low %v279_v7, %v283_v8  ;;  %v4925_v3 = vld [vmem:[%s7042_s3 + $0x168] ss:$16 sps:$4 sm:$0xff]   ;;  %v4930_v4 = vld [vmem:[%s7042_s3 + $0x184] ss:$16 sps:$4 sm:$0xff]  }
  0xe0   :  { %v4931_v7 = vld [vmem:[%s7042_s3 + $0x188] ss:$16 sps:$4 sm:$0xff]   ;;  %v4936_v8 = vld [vmem:[%s7042_s3 + $0x1a4] ss:$16 sps:$4 sm:$0xff]  }
  0xe2   :  { %1841 = vmatpush1.bf16.msra.mxu0 %v4399_v24  ;;  %1923 = vmatpush1.bf16.msra.mxu1 %v4401_v25  ;;  %v4861_v24 = vld [vmem:[%s7042_s3 + $0xc] ss:$16 sps:$4 sm:$0xff]   ;;  %v4856_v25 = vld [vmem:[%s7042_s3] ss:$16 sps:$4 sm:$0xff]  }
  0xe3   :  { %1842 = vmatprep.subr.bf16.mxu0 %v4408_v26  ;;  %1924 = vmatprep.subr.bf16.mxu1 %v4410_v15  ;;  %v4859_v26 = vld [vmem:[%s7042_s3 + $0x8] ss:$16 sps:$4 sm:$0xff]   ;;  %v4862_v15 = vld [vmem:[%s7042_s3 + $0x20] ss:$16 sps:$4 sm:$0xff]  }
  0xe6   :  { %1843 = vmatpush1.bf16.msra.mxu0 %v4407_v31  ;;  %1925 = vmatpush1.bf16.msra.mxu1 %v4409_v32  ;;  %v4868_v31 = vld [vmem:[%s7042_s3 + $0x40] ss:$16 sps:$4 sm:$0xff]   ;;  %v4871_v32 = vld [vmem:[%s7042_s3 + $0x48] ss:$16 sps:$4 sm:$0xff]  }
  0xe7   :  { %1844 = vmatprep.subr.bf16.mxu0 %v4416_v33  ;;  %1926 = vmatprep.subr.bf16.mxu1 %v4418_v37  ;;  %v4876_v33 = vld [vmem:[%s7042_s3 + $0x64] ss:$16 sps:$4 sm:$0xff]  }
  0xe8   :  { %v4882_v37 = vld [vmem:[%s7042_s3 + $0x84] ss:$16 sps:$4 sm:$0xff]  }
  0xea   :  { %1845 = vmatpush1.bf16.msra.mxu0 %v4415_v39  ;;  %1927 = vmatpush1.bf16.msra.mxu1 %v4417_v42  ;;  %v4880_v39 = vld [vmem:[%s7042_s3 + $0x80] ss:$16 sps:$4 sm:$0xff]   ;;  %v4891_v42 = vld [vmem:[%s7042_s3 + $0xac] ss:$16 sps:$4 sm:$0xff]  }
  0xeb   :  { %1846 = vmatprep.subr.bf16.mxu0 %v4424_v43  ;;  %1928 = vmatprep.subr.bf16.mxu1 %v4426_v45  ;;  %v4886_v43 = vld [vmem:[%s7042_s3 + $0xa0] ss:$16 sps:$4 sm:$0xff]   ;;  %v4897_v45 = vld [vmem:[%s7042_s3 + $0xcc] ss:$16 sps:$4 sm:$0xff]  }
  0xee   :  { %1847 = vmatpush1.bf16.msra.mxu0 %v4423_v57  ;;  %1929 = vmatpush1.bf16.msra.mxu1 %v4425_v48  ;;  %v4892_v57 = vld [vmem:[%s7042_s3 + $0xc0] ss:$16 sps:$4 sm:$0xff]   ;;  %v4903_v48 = vld [vmem:[%s7042_s3 + $0xec] ss:$16 sps:$4 sm:$0xff]  }
  0xef   :  { %1848 = vmatprep.subr.bf16.mxu0 %v4432_v49  ;;  %1930 = vmatprep.subr.bf16.mxu1 %v4434_v51  ;;  %v4898_v49 = vld [vmem:[%s7042_s3 + $0xe0] ss:$16 sps:$4 sm:$0xff]   ;;  %v4909_v51 = vld [vmem:[%s7042_s3 + $0x10c] ss:$16 sps:$4 sm:$0xff]  }
  0xf2   :  { %1849 = vmatpush1.bf16.msra.mxu0 %v4431_v52  ;;  %1931 = vmatpush1.bf16.msra.mxu1 %v4433_v56  ;;  %v4904_v52 = vld [vmem:[%s7042_s3 + $0x100] ss:$16 sps:$4 sm:$0xff]   ;;  %v4915_v56 = vld [vmem:[%s7042_s3 + $0x12c] ss:$16 sps:$4 sm:$0xff]  }
  0xf3   :  { %1850 = vmatprep.subr.bf16.mxu0 %v4440_v58  ;;  %1932 = vmatprep.subr.bf16.mxu1 %v4442_v61  ;;  %v4910_v58 = vld [vmem:[%s7042_s3 + $0x120] ss:$16 sps:$4 sm:$0xff]   ;;  %v4921_v61 = vld [vmem:[%s7042_s3 + $0x14c] ss:$16 sps:$4 sm:$0xff]  }
  0xf6   :  { %1851 = vmatpush1.bf16.msra.mxu0 %v4439_v62  ;;  %1933 = vmatpush1.bf16.msra.mxu1 %v4441_v1  ;;  %v4916_v62 = vld [vmem:[%s7042_s3 + $0x140] ss:$16 sps:$4 sm:$0xff]   ;;  %v4927_v1 = vld [vmem:[%s7042_s3 + $0x16c] ss:$16 sps:$4 sm:$0xff]  }
  0xf7   :  { %1852 = vmatprep.subr.bf16.mxu0 %v4448_v2  ;;  %1934 = vmatprep.subr.bf16.mxu1 %v4450_v5  ;;  %v4922_v2 = vld [vmem:[%s7042_s3 + $0x160] ss:$16 sps:$4 sm:$0xff]   ;;  %v4933_v5 = vld [vmem:[%s7042_s3 + $0x18c] ss:$16 sps:$4 sm:$0xff]  }
  0xfa   :  { %1853 = vmatpush1.bf16.msra.mxu0 %v4447_v6  ;;  %1935 = vmatpush1.bf16.msra.mxu1 %v4449_v9  ;;  %v4928_v6 = vld [vmem:[%s7042_s3 + $0x180] ss:$16 sps:$4 sm:$0xff]   ;;  %v4939_v9 = vld [vmem:[%s7042_s3 + $0x1ac] ss:$16 sps:$4 sm:$0xff]  }
  0xfb   :  { %1854 = vmatprep.subr.bf16.mxu0 %v4456_v10  ;;  %1936 = vmatprep.subr.bf16.mxu1 %v4458_v14  ;;  %v4934_v10 = vld [vmem:[%s7042_s3 + $0x1a0] ss:$16 sps:$4 sm:$0xff]   ;;  %v4945_v14 = vld [vmem:[%s7042_s3 + $0x1cc] ss:$16 sps:$4 sm:$0xff]  }
  0xfe   :  { %1855 = vmatpush1.bf16.msra.mxu0 %v4455_v16  ;;  %1937 = vmatpush1.bf16.msra.mxu1 %v4457_v17  ;;  %v4940_v16 = vld [vmem:[%s7042_s3 + $0x1c0] ss:$16 sps:$4 sm:$0xff]   ;;  %v4943_v17 = vld [vmem:[%s7042_s3 + $0x1c8] ss:$16 sps:$4 sm:$0xff]  }
  0xff   :  { %1856 = vmatprep.subr.bf16.mxu0 %v4464_v53  ;;  %1938 = vmatprep.subr.bf16.mxu1 %v4466_v18  ;;  %v4948_v53 = vld [vmem:[%s7042_s3 + $0x1e4] ss:$16 sps:$4 sm:$0xff]   ;;  %v4951_v18 = vld [vmem:[%s7042_s3 + $0x1ec] ss:$16 sps:$4 sm:$0xff]  }
 0x102   :  { %1857 = vmatpush1.bf16.msra.mxu0 %v4463_v19  ;;  %1939 = vmatpush1.bf16.msra.mxu1 %v4465_v20  ;;  %v4946_v19 = vld [vmem:[%s7042_s3 + $0x1e0] ss:$16 sps:$4 sm:$0xff]   ;;  %v4949_v20 = vld [vmem:[%s7042_s3 + $0x1e8] ss:$16 sps:$4 sm:$0xff]  }
 0x103   :  { %3523 = vmatprep.subr.bf16.mxu0 %v4858_v23  ;;  %3687 = vmatprep.subr.bf16.mxu1 %v4861_v24  ;;  %v4954_v23 = vld [vmem:[%s7042_s3 + $0x204] ss:$16 sps:$4 sm:$0xff]   ;;  %v4957_v24 = vld [vmem:[%s7042_s3 + $0x20c] ss:$16 sps:$4 sm:$0xff]  }
 0x105   :  { %1859 = vmatmul.mubr.bf16.vlgmr.msra.gmra.mrb[4].mxu0 %v5744_v22  ;;  %1941 = vmatmul.mubr.bf16.vlgmr.msra.gmra.mrb[4].mxu1 %v5744_v22  ;;  %v4873_v22 = vld [vmem:[%s7042_s3 + $0x4c] ss:$16 sps:$4 sm:$0xff]  }
 0x106   :  { %3524 = vmatpush1.bf16.msra.mxu0 %v4856_v25  ;;  %3688 = vmatpush1.bf16.msra.mxu1 %v4859_v26  ;;  %v287_v25 = vlaneseq }
 0x107   :  { %3525 = vmatprep.subr.bf16.mxu0 %v4864_v27  ;;  %3689 = vmatprep.subr.bf16.mxu1 %v4867_v28  ;;  %v6326_v28 = vld [vmem:[%s7043_s2] sm:$0xff] }
 0x108   :  { %v6320_v26 = vshrl.u32 %v287_v25, 7  ;;  %v5014_v25 = vld [vmem:[%s7042_s3 + $0x344] ss:$16 sps:$4 sm:$0xff]  }
 0x10a   :  { %3526 = vmatpush1.bf16.msra.mxu0 %v4862_v15  ;;  %3690 = vmatpush1.bf16.msra.mxu1 %v4865_v29  ;;  %v289_v27 = vsub.s32 0, %v6320_v26  ;;  %v293_v15 = vsub.s32 1, %v6320_v26  ;;  %v301_v29 = vsub.s32 3, %v6320_v26 }
 0x10b   :  { %3527 = vmatprep.subr.bf16.mxu0 %v4870_v30  ;;  %3691 = vmatprep.subr.bf16.mxu1 %v4873_v22 }
 0x10c   :  { %v290_v30 = vrot.slane %v6326_v28, %v289_v27  ;;  %v294_v22 = vrot.slane %v6326_v28, %v293_v15 }
 0x10e   :  { %3528 = vmatpush1.bf16.msra.mxu0 %v4868_v31  ;;  %3692 = vmatpush1.bf16.msra.mxu1 %v4871_v32  ;;  %v302_v31 = vrot.slane %v6326_v28, %v301_v29 }
 0x10f   :  { %3529 = vmatprep.subr.bf16.mxu0 %v4876_v33  ;;  %3693 = vmatprep.subr.bf16.mxu1 %v4879_v34 }
 0x112   :  { %3530 = vmatpush1.bf16.msra.mxu0 %v4874_v35  ;;  %3694 = vmatpush1.bf16.msra.mxu1 %v4877_v36 }
 0x113   :  { %3531 = vmatprep.subr.bf16.mxu0 %v4882_v37  ;;  %3695 = vmatprep.subr.bf16.mxu1 %v4885_v38 }
 0x116   :  { %3532 = vmatpush1.bf16.msra.mxu0 %v4880_v39  ;;  %3696 = vmatpush1.bf16.msra.mxu1 %v4883_v40 }
 0x117   :  { %3533 = vmatprep.subr.bf16.mxu0 %v4888_v41  ;;  %3697 = vmatprep.subr.bf16.mxu1 %v4891_v42 }
 0x11a   :  { %3534 = vmatpush1.bf16.msra.mxu0 %v4886_v43  ;;  %3698 = vmatpush1.bf16.msra.mxu1 %v4889_v12 }
 0x11b   :  { %3535 = vmatprep.subr.bf16.mxu0 %v4894_v44  ;;  %3699 = vmatprep.subr.bf16.mxu1 %v4897_v45 }
 0x11e   :  { %3536 = vmatpush1.bf16.msra.mxu0 %v4892_v57  ;;  %3700 = vmatpush1.bf16.msra.mxu1 %v4895_v46  ;;  %v4952_v57 = vld [vmem:[%s7042_s3 + $0x200] ss:$16 sps:$4 sm:$0xff]   ;;  %v4955_v46 = vld [vmem:[%s7042_s3 + $0x208] ss:$16 sps:$4 sm:$0xff]  }
 0x11f   :  { %3537 = vmatprep.subr.bf16.mxu0 %v4900_v47  ;;  %3701 = vmatprep.subr.bf16.mxu1 %v4903_v48  ;;  %v4960_v48 = vld [vmem:[%s7042_s3 + $0x224] ss:$16 sps:$4 sm:$0xff]  }
 0x122   :  { %3538 = vmatpush1.bf16.msra.mxu0 %v4898_v49  ;;  %3702 = vmatpush1.bf16.msra.mxu1 %v4901_v21  ;;  %v4963_v49 = vld [vmem:[%s7042_s3 + $0x22c] ss:$16 sps:$4 sm:$0xff]  }
 0x123   :  { %3539 = vmatprep.subr.bf16.mxu0 %v4906_v50  ;;  %3703 = vmatprep.subr.bf16.mxu1 %v4909_v51  ;;  %v4958_v50 = vld [vmem:[%s7042_s3 + $0x220] ss:$16 sps:$4 sm:$0xff]   ;;  %v4961_v51 = vld [vmem:[%s7042_s3 + $0x228] ss:$16 sps:$4 sm:$0xff]  }
 0x126   :  { %3540 = vmatpush1.bf16.msra.mxu0 %v4904_v52  ;;  %3704 = vmatpush1.bf16.msra.mxu1 %v4907_v54  ;;  %v4966_v52 = vld [vmem:[%s7042_s3 + $0x244] ss:$16 sps:$4 sm:$0xff]   ;;  %v4969_v54 = vld [vmem:[%s7042_s3 + $0x24c] ss:$16 sps:$4 sm:$0xff]  }
 0x127   :  { %3541 = vmatprep.subr.bf16.mxu0 %v4912_v55  ;;  %3705 = vmatprep.subr.bf16.mxu1 %v4915_v56  ;;  %v4964_v55 = vld [vmem:[%s7042_s3 + $0x240] ss:$16 sps:$4 sm:$0xff]   ;;  %v4967_v56 = vld [vmem:[%s7042_s3 + $0x248] ss:$16 sps:$4 sm:$0xff]  }
 0x12a   :  { %3542 = vmatpush1.bf16.msra.mxu0 %v4910_v58  ;;  %3706 = vmatpush1.bf16.msra.mxu1 %v4913_v59  ;;  %v4972_v58 = vld [vmem:[%s7042_s3 + $0x264] ss:$16 sps:$4 sm:$0xff]   ;;  %v4975_v59 = vld [vmem:[%s7042_s3 + $0x26c] ss:$16 sps:$4 sm:$0xff]  }
 0x12b   :  { %3543 = vmatprep.subr.bf16.mxu0 %v4918_v60  ;;  %3707 = vmatprep.subr.bf16.mxu1 %v4921_v61  ;;  %v4970_v60 = vld [vmem:[%s7042_s3 + $0x260] ss:$16 sps:$4 sm:$0xff]   ;;  %v4973_v61 = vld [vmem:[%s7042_s3 + $0x268] ss:$16 sps:$4 sm:$0xff]  }
 0x12e   :  { %3544 = vmatpush1.bf16.msra.mxu0 %v4916_v62  ;;  %3708 = vmatpush1.bf16.msra.mxu1 %v4919_v63  ;;  %v4978_v62 = vld [vmem:[%s7042_s3 + $0x284] ss:$16 sps:$4 sm:$0xff]   ;;  %v4981_v63 = vld [vmem:[%s7042_s3 + $0x28c] ss:$16 sps:$4 sm:$0xff]  }
 0x12f   :  { %3545 = vmatprep.subr.bf16.mxu0 %v4924_v0  ;;  %3709 = vmatprep.subr.bf16.mxu1 %v4927_v1  ;;  %v4976_v0 = vld [vmem:[%s7042_s3 + $0x280] ss:$16 sps:$4 sm:$0xff]   ;;  %v4979_v1 = vld [vmem:[%s7042_s3 + $0x288] ss:$16 sps:$4 sm:$0xff]  }
 0x132   :  { %3546 = vmatpush1.bf16.msra.mxu0 %v4922_v2  ;;  %3710 = vmatpush1.bf16.msra.mxu1 %v4925_v3  ;;  %v4984_v2 = vld [vmem:[%s7042_s3 + $0x2a4] ss:$16 sps:$4 sm:$0xff]   ;;  %v4987_v3 = vld [vmem:[%s7042_s3 + $0x2ac] ss:$16 sps:$4 sm:$0xff]  }
 0x133   :  { %3547 = vmatprep.subr.bf16.mxu0 %v4930_v4  ;;  %3711 = vmatprep.subr.bf16.mxu1 %v4933_v5  ;;  %v4982_v4 = vld [vmem:[%s7042_s3 + $0x2a0] ss:$16 sps:$4 sm:$0xff]   ;;  %v4985_v5 = vld [vmem:[%s7042_s3 + $0x2a8] ss:$16 sps:$4 sm:$0xff]  }
 0x136   :  { %3548 = vmatpush1.bf16.msra.mxu0 %v4928_v6  ;;  %3712 = vmatpush1.bf16.msra.mxu1 %v4931_v7  ;;  %v4990_v6 = vld [vmem:[%s7042_s3 + $0x2c4] ss:$16 sps:$4 sm:$0xff]   ;;  %v4993_v7 = vld [vmem:[%s7042_s3 + $0x2cc] ss:$16 sps:$4 sm:$0xff]  }
 0x137   :  { %3549 = vmatprep.subr.bf16.mxu0 %v4936_v8  ;;  %3713 = vmatprep.subr.bf16.mxu1 %v4939_v9  ;;  %v4988_v8 = vld [vmem:[%s7042_s3 + $0x2c0] ss:$16 sps:$4 sm:$0xff]   ;;  %v4991_v9 = vld [vmem:[%s7042_s3 + $0x2c8] ss:$16 sps:$4 sm:$0xff]  }
 0x13a   :  { %3550 = vmatpush1.bf16.msra.mxu0 %v4934_v10  ;;  %3714 = vmatpush1.bf16.msra.mxu1 %v4937_v11  ;;  %v4996_v10 = vld [vmem:[%s7042_s3 + $0x2e4] ss:$16 sps:$4 sm:$0xff]   ;;  %v4999_v11 = vld [vmem:[%s7042_s3 + $0x2ec] ss:$16 sps:$4 sm:$0xff]  }
 0x13b   :  { %3551 = vmatprep.subr.bf16.mxu0 %v4942_v13  ;;  %3715 = vmatprep.subr.bf16.mxu1 %v4945_v14  ;;  %v4994_v13 = vld [vmem:[%s7042_s3 + $0x2e0] ss:$16 sps:$4 sm:$0xff]   ;;  %v4997_v14 = vld [vmem:[%s7042_s3 + $0x2e8] ss:$16 sps:$4 sm:$0xff]  }
 0x13e   :  { %3552 = vmatpush1.bf16.msra.mxu0 %v4940_v16  ;;  %3716 = vmatpush1.bf16.msra.mxu1 %v4943_v17  ;;  %v5002_v16 = vld [vmem:[%s7042_s3 + $0x304] ss:$16 sps:$4 sm:$0xff]   ;;  %v5005_v17 = vld [vmem:[%s7042_s3 + $0x30c] ss:$16 sps:$4 sm:$0xff]  }
 0x13f   :  { %3553 = vmatprep.subr.bf16.mxu0 %v4948_v53  ;;  %3717 = vmatprep.subr.bf16.mxu1 %v4951_v18  ;;  %v5000_v53 = vld [vmem:[%s7042_s3 + $0x300] ss:$16 sps:$4 sm:$0xff]   ;;  %v5003_v18 = vld [vmem:[%s7042_s3 + $0x308] ss:$16 sps:$4 sm:$0xff]  }
 0x142   :  { %3554 = vmatpush1.bf16.msra.mxu0 %v4946_v19  ;;  %3718 = vmatpush1.bf16.msra.mxu1 %v4949_v20  ;;  %v5008_v19 = vld [vmem:[%s7042_s3 + $0x324] ss:$16 sps:$4 sm:$0xff]   ;;  %v5011_v20 = vld [vmem:[%s7042_s3 + $0x32c] ss:$16 sps:$4 sm:$0xff]  }
 0x143   :  { %3564 = vmatprep.subr.bf16.mxu0 %v4954_v23  ;;  %3728 = vmatprep.subr.bf16.mxu1 %v4957_v24  ;;  %v5006_v23 = vld [vmem:[%s7042_s3 + $0x320] ss:$16 sps:$4 sm:$0xff]   ;;  %v5009_v24 = vld [vmem:[%s7042_s3 + $0x328] ss:$16 sps:$4 sm:$0xff]  }
 0x158   :  { %v1696_v32 = vpop.f32.mrb[0].mxu0  ;;  %v6339_v34 = vpop.f32.mrb[0].mxu1 }
 0x159   :  { %v4800_v33 = vadd.f32 %v1696_v32, %v290_v30  ;;  %v1698_v35 = vpop.f32.mrb[1].mxu0  ;;  %v1780_v37 = vpop.f32.mrb[1].mxu1  ;;  %v5017_v30 = vld [vmem:[%s7042_s3 + $0x34c] ss:$16 sps:$4 sm:$0xff]   ;;  %v5020_v32 = vld [vmem:[%s7042_s3 + $0x364] ss:$16 sps:$4 sm:$0xff]  }
 0x15a   :  { %v4801_v36 = vadd.f32 %v1698_v35, %v294_v22  ;;  %v1700_v38 = vpop.f32.mrb[2].mxu0  ;;  %v4803_v40 = vadd.f32 %v1780_v37, %v302_v31  ;;  %v1782_v41 = vpop.f32.mrb[2].mxu1  ;;  %v5012_v22 = vld [vmem:[%s7042_s3 + $0x340] ss:$16 sps:$4 sm:$0xff]   ;;  %v5015_v31 = vld [vmem:[%s7042_s3 + $0x348] ss:$16 sps:$4 sm:$0xff]  }
 0x15b   :  { %v1949_v39 = vmax.f32 %v4800_v33, 0.0  ;;  %v1701_v42 = vpop.f32.mrb[3].mxu0  ;;  %v1783_v12 = vpop.f32.mrb[3].mxu1  ;;  %v5023_v33 = vld [vmem:[%s7042_s3 + $0x36c] ss:$16 sps:$4 sm:$0xff]   ;;  %v297_v41 = vsub.s32 2, %v6320_v26 }
 0x15c   :  { %v1950_v43 = vmax.f32 %v4801_v36, 0.0  ;;  %v1952_v44 = vmax.f32 %v4803_v40, 0.0  ;;  %v5018_v35 = vld [vmem:[%s7042_s3 + $0x360] ss:$16 sps:$4 sm:$0xff]   ;;  %v5021_v36 = vld [vmem:[%s7042_s3 + $0x368] ss:$16 sps:$4 sm:$0xff]  }
 0x15d   :  { %v1957_v47 = vpack.c.bf16 %v1949_v39, %v1949_v39  ;;  %v5026_v37 = vld [vmem:[%s7042_s3 + $0x384] ss:$16 sps:$4 sm:$0xff]   ;;  %v5029_v38 = vld [vmem:[%s7042_s3 + $0x38c] ss:$16 sps:$4 sm:$0xff]   ;;  %v5024_v39 = vld [vmem:[%s7042_s3 + $0x380] ss:$16 sps:$4 sm:$0xff]  }
 0x15e   :  { %v1958_v45 = vpack.c.bf16 %v1950_v43, %v1950_v43  ;;  %v1960_v21 = vpack.c.bf16 %v1952_v44, %v1952_v44  ;;  %v5027_v40 = vld [vmem:[%s7042_s3 + $0x388] ss:$16 sps:$4 sm:$0xff]   ;;  %v5032_v42 = vld [vmem:[%s7042_s3 + $0x3a4] ss:$16 sps:$4 sm:$0xff]   ;;  %v5035_v43 = vld [vmem:[%s7042_s3 + $0x3ac] ss:$16 sps:$4 sm:$0xff]  }
 0x15f   :  { %v5030_v12 = vld [vmem:[%s7042_s3 + $0x3a0] ss:$16 sps:$4 sm:$0xff]   ;;  %v5033_v44 = vld [vmem:[%s7042_s3 + $0x3a8] ss:$16 sps:$4 sm:$0xff]  }
 0x160   :  { %3555 = vmatprep.mubr.bf16.mxu0 %v1958_v45  ;;  %3719 = vmatprep.mubr.bf16.mxu1 %v1958_v45  ;;  %v298_v45 = vrot.slane %v6326_v28, %v297_v41 }
 0x161   :  { %3556 = vmatmul.mubr.bf16.vlgmr.msra.gmra.mrb[8].mxu0 %v1957_v47  ;;  %3720 = vmatmul.mubr.bf16.vlgmr.msra.gmra.mrb[8].mxu1 %v1957_v47  ;;  %v5036_v47 = vld [vmem:[%s7042_s3 + $0x3c0] ss:$16 sps:$4 sm:$0xff]  }
 0x162   :  { %3565 = vmatpush1.bf16.msra.mxu0 %v4952_v57  ;;  %3729 = vmatpush1.bf16.msra.mxu1 %v4955_v46  ;;  %v5038_v57 = vld [vmem:[%s7042_s3 + $0x3c4] ss:$16 sps:$4 sm:$0xff]   ;;  %v5041_v46 = vld [vmem:[%s7042_s3 + $0x3cc] ss:$16 sps:$4 sm:$0xff]  }
 0x163   :  { %3596 = vmatprep.mubr.bf16.mxu0 %v1960_v21  ;;  %3760 = vmatprep.mubr.bf16.mxu1 %v1960_v21  ;;  %v5044_v21 = vld [vmem:[%s7042_s3 + $0x3e4] ss:$16 sps:$4 sm:$0xff]  }
 0x164   :  { %3566 = vmatprep.subr.bf16.mxu0 %v4960_v48  ;;  %3730 = vmatprep.subr.bf16.mxu1 %v4963_v49  ;;  %v5039_v48 = vld [vmem:[%s7042_s3 + $0x3c8] ss:$16 sps:$4 sm:$0xff]   ;;  %v4802_v49 = vadd.f32 %v6339_v34, %v298_v45  ;;  %v5114_v45 = vld [vmem:[%s7042_s3 + $0x560] ss:$16 sps:$4 sm:$0xff]  }
 0x165   :  { %v5045_v34 = vld [vmem:[%s7042_s3 + $0x3e8] ss:$16 sps:$4 sm:$0xff]  }
 0x166   :  { %3567 = vmatpush1.bf16.msra.mxu0 %v4958_v50  ;;  %3731 = vmatpush1.bf16.msra.mxu1 %v4961_v51  ;;  %v5047_v50 = vld [vmem:[%s7042_s3 + $0x3ec] ss:$16 sps:$4 sm:$0xff]   ;;  %v5042_v51 = vld [vmem:[%s7042_s3 + $0x3e0] ss:$16 sps:$4 sm:$0xff]  }
 0x167   :  { %3568 = vmatprep.subr.bf16.mxu0 %v4966_v52  ;;  %3732 = vmatprep.subr.bf16.mxu1 %v4969_v54  ;;  %v1951_v52 = vmax.f32 %v4802_v49, 0.0  ;;  %v5050_v54 = vld [vmem:[%s7042_s3 + $0x404] ss:$16 sps:$4 sm:$0xff]   ;;  %v5123_v49 = vld [vmem:[%s7042_s3 + $0x588] ss:$16 sps:$4 sm:$0xff]  }
 0x16a   :  { %3569 = vmatpush1.bf16.msra.mxu0 %v4964_v55  ;;  %3733 = vmatpush1.bf16.msra.mxu1 %v4967_v56  ;;  %v5053_v55 = vld [vmem:[%s7042_s3 + $0x40c] ss:$16 sps:$4 sm:$0xff]   ;;  %v5048_v56 = vld [vmem:[%s7042_s3 + $0x400] ss:$16 sps:$4 sm:$0xff]  }
 0x16b   :  { %3570 = vmatprep.subr.bf16.mxu0 %v4972_v58  ;;  %3734 = vmatprep.subr.bf16.mxu1 %v4975_v59  ;;  %v5051_v58 = vld [vmem:[%s7042_s3 + $0x408] ss:$16 sps:$4 sm:$0xff]   ;;  %v1959_v59 = vpack.c.bf16 %v1951_v52, %v1951_v52 }
 0x16c   :  { %v5129_v52 = vld [vmem:[%s7042_s3 + $0x5a8] ss:$16 sps:$4 sm:$0xff]  }
 0x16e   :  { %3571 = vmatpush1.bf16.msra.mxu0 %v4970_v60  ;;  %3735 = vmatpush1.bf16.msra.mxu1 %v4973_v61  ;;  %v5056_v60 = vld [vmem:[%s7042_s3 + $0x424] ss:$16 sps:$4 sm:$0xff]   ;;  %v5059_v61 = vld [vmem:[%s7042_s3 + $0x42c] ss:$16 sps:$4 sm:$0xff]  }
 0x16f   :  { %3572 = vmatprep.subr.bf16.mxu0 %v4978_v62  ;;  %3736 = vmatprep.subr.bf16.mxu1 %v4981_v63  ;;  %v5054_v62 = vld [vmem:[%s7042_s3 + $0x420] ss:$16 sps:$4 sm:$0xff]   ;;  %v5057_v63 = vld [vmem:[%s7042_s3 + $0x428] ss:$16 sps:$4 sm:$0xff]  }
 0x172   :  { %3573 = vmatpush1.bf16.msra.mxu0 %v4976_v0  ;;  %3737 = vmatpush1.bf16.msra.mxu1 %v4979_v1  ;;  %v5062_v0 = vld [vmem:[%s7042_s3 + $0x444] ss:$16 sps:$4 sm:$0xff]   ;;  %v5065_v1 = vld [vmem:[%s7042_s3 + $0x44c] ss:$16 sps:$4 sm:$0xff]  }
 0x173   :  { %3574 = vmatprep.subr.bf16.mxu0 %v4984_v2  ;;  %3738 = vmatprep.subr.bf16.mxu1 %v4987_v3  ;;  %v5060_v2 = vld [vmem:[%s7042_s3 + $0x440] ss:$16 sps:$4 sm:$0xff]   ;;  %v5063_v3 = vld [vmem:[%s7042_s3 + $0x448] ss:$16 sps:$4 sm:$0xff]  }
 0x176   :  { %3575 = vmatpush1.bf16.msra.mxu0 %v4982_v4  ;;  %3739 = vmatpush1.bf16.msra.mxu1 %v4985_v5  ;;  %v5068_v4 = vld [vmem:[%s7042_s3 + $0x464] ss:$16 sps:$4 sm:$0xff]   ;;  %v5071_v5 = vld [vmem:[%s7042_s3 + $0x46c] ss:$16 sps:$4 sm:$0xff]  }
 0x177   :  { %3576 = vmatprep.subr.bf16.mxu0 %v4990_v6  ;;  %3740 = vmatprep.subr.bf16.mxu1 %v4993_v7  ;;  %v5066_v6 = vld [vmem:[%s7042_s3 + $0x460] ss:$16 sps:$4 sm:$0xff]   ;;  %v5069_v7 = vld [vmem:[%s7042_s3 + $0x468] ss:$16 sps:$4 sm:$0xff]  }
 0x17a   :  { %3577 = vmatpush1.bf16.msra.mxu0 %v4988_v8  ;;  %3741 = vmatpush1.bf16.msra.mxu1 %v4991_v9  ;;  %v5074_v8 = vld [vmem:[%s7042_s3 + $0x484] ss:$16 sps:$4 sm:$0xff]   ;;  %v5077_v9 = vld [vmem:[%s7042_s3 + $0x48c] ss:$16 sps:$4 sm:$0xff]  }
 0x17b   :  { %3578 = vmatprep.subr.bf16.mxu0 %v4996_v10  ;;  %3742 = vmatprep.subr.bf16.mxu1 %v4999_v11  ;;  %v5072_v10 = vld [vmem:[%s7042_s3 + $0x480] ss:$16 sps:$4 sm:$0xff]   ;;  %v5075_v11 = vld [vmem:[%s7042_s3 + $0x488] ss:$16 sps:$4 sm:$0xff]  }
 0x17e   :  { %3579 = vmatpush1.bf16.msra.mxu0 %v4994_v13  ;;  %3743 = vmatpush1.bf16.msra.mxu1 %v4997_v14  ;;  %v5080_v13 = vld [vmem:[%s7042_s3 + $0x4a4] ss:$16 sps:$4 sm:$0xff]   ;;  %v5083_v14 = vld [vmem:[%s7042_s3 + $0x4ac] ss:$16 sps:$4 sm:$0xff]  }
 0x17f   :  { %3580 = vmatprep.subr.bf16.mxu0 %v5002_v16  ;;  %3744 = vmatprep.subr.bf16.mxu1 %v5005_v17  ;;  %v5078_v16 = vld [vmem:[%s7042_s3 + $0x4a0] ss:$16 sps:$4 sm:$0xff]   ;;  %v5081_v17 = vld [vmem:[%s7042_s3 + $0x4a8] ss:$16 sps:$4 sm:$0xff]  }
 0x182   :  { %3581 = vmatpush1.bf16.msra.mxu0 %v5000_v53  ;;  %3745 = vmatpush1.bf16.msra.mxu1 %v5003_v18  ;;  %v5086_v53 = vld [vmem:[%s7042_s3 + $0x4c4] ss:$16 sps:$4 sm:$0xff]   ;;  %v5089_v18 = vld [vmem:[%s7042_s3 + $0x4cc] ss:$16 sps:$4 sm:$0xff]  }
 0x183   :  { %3582 = vmatprep.subr.bf16.mxu0 %v5008_v19  ;;  %3746 = vmatprep.subr.bf16.mxu1 %v5011_v20  ;;  %v5084_v19 = vld [vmem:[%s7042_s3 + $0x4c0] ss:$16 sps:$4 sm:$0xff]   ;;  %v5087_v20 = vld [vmem:[%s7042_s3 + $0x4c8] ss:$16 sps:$4 sm:$0xff]  }
 0x186   :  { %3583 = vmatpush1.bf16.msra.mxu0 %v5006_v23  ;;  %3747 = vmatpush1.bf16.msra.mxu1 %v5009_v24  ;;  %v5092_v23 = vld [vmem:[%s7042_s3 + $0x4e4] ss:$16 sps:$4 sm:$0xff]   ;;  %v5095_v24 = vld [vmem:[%s7042_s3 + $0x4ec] ss:$16 sps:$4 sm:$0xff]  }
 0x187   :  { %3584 = vmatprep.subr.bf16.mxu0 %v5014_v25  ;;  %3748 = vmatprep.subr.bf16.mxu1 %v5017_v30  ;;  %v5090_v25 = vld [vmem:[%s7042_s3 + $0x4e0] ss:$16 sps:$4 sm:$0xff]   ;;  %v5093_v30 = vld [vmem:[%s7042_s3 + $0x4e8] ss:$16 sps:$4 sm:$0xff]  }
 0x18a   :  { %3585 = vmatpush1.bf16.msra.mxu0 %v5012_v22  ;;  %3749 = vmatpush1.bf16.msra.mxu1 %v5015_v31  ;;  %v5098_v22 = vld [vmem:[%s7042_s3 + $0x504] ss:$16 sps:$4 sm:$0xff]   ;;  %v5101_v31 = vld [vmem:[%s7042_s3 + $0x50c] ss:$16 sps:$4 sm:$0xff]  }
 0x18b   :  { %3586 = vmatprep.subr.bf16.mxu0 %v5020_v32  ;;  %3750 = vmatprep.subr.bf16.mxu1 %v5023_v33  ;;  %v5096_v32 = vld [vmem:[%s7042_s3 + $0x500] ss:$16 sps:$4 sm:$0xff]   ;;  %v5099_v33 = vld [vmem:[%s7042_s3 + $0x508] ss:$16 sps:$4 sm:$0xff]  }
 0x18e   :  { %3587 = vmatpush1.bf16.msra.mxu0 %v5018_v35  ;;  %3751 = vmatpush1.bf16.msra.mxu1 %v5021_v36  ;;  %v5104_v35 = vld [vmem:[%s7042_s3 + $0x524] ss:$16 sps:$4 sm:$0xff]   ;;  %v5107_v36 = vld [vmem:[%s7042_s3 + $0x52c] ss:$16 sps:$4 sm:$0xff]  }
 0x18f   :  { %3588 = vmatprep.subr.bf16.mxu0 %v5026_v37  ;;  %3752 = vmatprep.subr.bf16.mxu1 %v5029_v38  ;;  %v5102_v37 = vld [vmem:[%s7042_s3 + $0x520] ss:$16 sps:$4 sm:$0xff]   ;;  %v5105_v38 = vld [vmem:[%s7042_s3 + $0x528] ss:$16 sps:$4 sm:$0xff]  }
 0x192   :  { %3589 = vmatpush1.bf16.msra.mxu0 %v5024_v39  ;;  %3753 = vmatpush1.bf16.msra.mxu1 %v5027_v40  ;;  %v5110_v39 = vld [vmem:[%s7042_s3 + $0x544] ss:$16 sps:$4 sm:$0xff]   ;;  %v5113_v40 = vld [vmem:[%s7042_s3 + $0x54c] ss:$16 sps:$4 sm:$0xff]  }
 0x193   :  { %3590 = vmatprep.subr.bf16.mxu0 %v5032_v42  ;;  %3754 = vmatprep.subr.bf16.mxu1 %v5035_v43  ;;  %v5108_v42 = vld [vmem:[%s7042_s3 + $0x540] ss:$16 sps:$4 sm:$0xff]   ;;  %v5111_v43 = vld [vmem:[%s7042_s3 + $0x548] ss:$16 sps:$4 sm:$0xff]  }
 0x196   :  { %3591 = vmatpush1.bf16.msra.mxu0 %v5030_v12  ;;  %3755 = vmatpush1.bf16.msra.mxu1 %v5033_v44  ;;  %v5116_v12 = vld [vmem:[%s7042_s3 + $0x564] ss:$16 sps:$4 sm:$0xff]   ;;  %v5119_v44 = vld [vmem:[%s7042_s3 + $0x56c] ss:$16 sps:$4 sm:$0xff]  }
 0x197   :  { %3592 = vmatprep.subr.bf16.mxu0 %v5038_v57  ;;  %3756 = vmatprep.subr.bf16.mxu1 %v5041_v46  ;;  %v5117_v57 = vld [vmem:[%s7042_s3 + $0x568] ss:$16 sps:$4 sm:$0xff]   ;;  %v5122_v46 = vld [vmem:[%s7042_s3 + $0x584] ss:$16 sps:$4 sm:$0xff]  }
 0x19a   :  { %3593 = vmatpush1.bf16.msra.mxu0 %v5036_v47  ;;  %3757 = vmatpush1.bf16.msra.mxu1 %v5039_v48  ;;  %v5125_v47 = vld [vmem:[%s7042_s3 + $0x58c] ss:$16 sps:$4 sm:$0xff]   ;;  %v5120_v48 = vld [vmem:[%s7042_s3 + $0x580] ss:$16 sps:$4 sm:$0xff]  }
 0x19b   :  { %3594 = vmatprep.subr.bf16.mxu0 %v5044_v21  ;;  %3758 = vmatprep.subr.bf16.mxu1 %v5047_v50  ;;  %v5128_v21 = vld [vmem:[%s7042_s3 + $0x5a4] ss:$16 sps:$4 sm:$0xff]   ;;  %v5131_v50 = vld [vmem:[%s7042_s3 + $0x5ac] ss:$16 sps:$4 sm:$0xff]  }
 0x19e   :  { %3595 = vmatpush1.bf16.msra.mxu0 %v5042_v51  ;;  %3759 = vmatpush1.bf16.msra.mxu1 %v5045_v34  ;;  %v305_v51 = vsub.s32 4, %v6320_v26  ;;  %v5126_v34 = vld [vmem:[%s7042_s3 + $0x5a0] ss:$16 sps:$4 sm:$0xff]  }
 0x19f   :  { %3605 = vmatprep.subr.bf16.mxu0 %v5050_v54  ;;  %3769 = vmatprep.subr.bf16.mxu1 %v5053_v55  ;;  %v309_v54 = vsub.s32 5, %v6320_v26  ;;  %v5134_v55 = vld [vmem:[%s7042_s3 + $0x5c4] ss:$16 sps:$4 sm:$0xff]  }
 0x1a1   :  { %3597 = vmatmul.mubr.bf16.vlgmr.msra.gmra.mrb[8].mxu0 %v1959_v59  ;;  %3761 = vmatmul.mubr.bf16.vlgmr.msra.gmra.mrb[8].mxu1 %v1959_v59  ;;  %v306_v59 = vrot.slane %v6326_v28, %v305_v51  ;;  %v5185_v51 = vld [vmem:[%s7042_s3 + $0x6cc] ss:$16 sps:$4 sm:$0xff]  }
 0x1a2   :  { %3606 = vmatpush1.bf16.msra.mxu0 %v5048_v56  ;;  %3770 = vmatpush1.bf16.msra.mxu1 %v5051_v58  ;;  %v5137_v56 = vld [vmem:[%s7042_s3 + $0x5cc] ss:$16 sps:$4 sm:$0xff]   ;;  %v317_v58 = vsub.s32 7, %v6320_v26 }
 0x1a3   :  { %3607 = vmatprep.subr.bf16.mxu0 %v5056_v60  ;;  %3771 = vmatprep.subr.bf16.mxu1 %v5059_v61  ;;  %v5132_v60 = vld [vmem:[%s7042_s3 + $0x5c0] ss:$16 sps:$4 sm:$0xff]   ;;  %v5135_v61 = vld [vmem:[%s7042_s3 + $0x5c8] ss:$16 sps:$4 sm:$0xff]  }
 0x1a6   :  { %3608 = vmatpush1.bf16.msra.mxu0 %v5054_v62  ;;  %3772 = vmatpush1.bf16.msra.mxu1 %v5057_v63  ;;  %v310_v62 = vrot.slane %v6326_v28, %v309_v54  ;;  %v318_v63 = vrot.slane %v6326_v28, %v317_v58  ;;  %v5188_v54 = vld [vmem:[%s7042_s3 + $0x6e4] ss:$16 sps:$4 sm:$0xff]   ;;  %v5189_v58 = vld [vmem:[%s7042_s3 + $0x6e8] ss:$16 sps:$4 sm:$0xff]  }
 0x1a7   :  { %3609 = vmatprep.subr.bf16.mxu0 %v5062_v0  ;;  %3773 = vmatprep.subr.bf16.mxu1 %v5065_v1  ;;  %v5140_v0 = vld [vmem:[%s7042_s3 + $0x5e4] ss:$16 sps:$4 sm:$0xff]   ;;  %v5143_v1 = vld [vmem:[%s7042_s3 + $0x5ec] ss:$16 sps:$4 sm:$0xff]  }
 0x1aa   :  { %3610 = vmatpush1.bf16.msra.mxu0 %v5060_v2  ;;  %3774 = vmatpush1.bf16.msra.mxu1 %v5063_v3 }
 0x1ab   :  { %3611 = vmatprep.subr.bf16.mxu0 %v5068_v4  ;;  %3775 = vmatprep.subr.bf16.mxu1 %v5071_v5 }
 0x1ae   :  { %3612 = vmatpush1.bf16.msra.mxu0 %v5066_v6  ;;  %3776 = vmatpush1.bf16.msra.mxu1 %v5069_v7  ;;  %v5138_v6 = vld [vmem:[%s7042_s3 + $0x5e0] ss:$16 sps:$4 sm:$0xff]  }
 0x1af   :  { %3613 = vmatprep.subr.bf16.mxu0 %v5074_v8  ;;  %3777 = vmatprep.subr.bf16.mxu1 %v5077_v9 }
 0x1b2   :  { %3614 = vmatpush1.bf16.msra.mxu0 %v5072_v10  ;;  %3778 = vmatpush1.bf16.msra.mxu1 %v5075_v11  ;;  %v5141_v10 = vld [vmem:[%s7042_s3 + $0x5e8] ss:$16 sps:$4 sm:$0xff]   ;;  %v5146_v11 = vld [vmem:[%s7042_s3 + $0x604] ss:$16 sps:$4 sm:$0xff]  }
 0x1b3   :  { %3615 = vmatprep.subr.bf16.mxu0 %v5080_v13  ;;  %3779 = vmatprep.subr.bf16.mxu1 %v5083_v14 }
 0x1b6   :  { %3616 = vmatpush1.bf16.msra.mxu0 %v5078_v16  ;;  %3780 = vmatpush1.bf16.msra.mxu1 %v5081_v17 }
 0x1b7   :  { %3617 = vmatprep.subr.bf16.mxu0 %v5086_v53  ;;  %3781 = vmatprep.subr.bf16.mxu1 %v5089_v18  ;;  %v5149_v53 = vld [vmem:[%s7042_s3 + $0x60c] ss:$16 sps:$4 sm:$0xff]  }
 0x1ba   :  { %3618 = vmatpush1.bf16.msra.mxu0 %v5084_v19  ;;  %3782 = vmatpush1.bf16.msra.mxu1 %v5087_v20 }
 0x1bb   :  { %3619 = vmatprep.subr.bf16.mxu0 %v5092_v23  ;;  %3783 = vmatprep.subr.bf16.mxu1 %v5095_v24  ;;  %v5144_v24 = vld [vmem:[%s7042_s3 + $0x600] ss:$16 sps:$4 sm:$0xff]  }
 0x1be   :  { %3620 = vmatpush1.bf16.msra.mxu0 %v5090_v25  ;;  %3784 = vmatpush1.bf16.msra.mxu1 %v5093_v30  ;;  %v5147_v25 = vld [vmem:[%s7042_s3 + $0x608] ss:$16 sps:$4 sm:$0xff]  }
 0x1bf   :  { %3621 = vmatprep.subr.bf16.mxu0 %v5098_v22  ;;  %3785 = vmatprep.subr.bf16.mxu1 %v5101_v31  ;;  %v5152_v22 = vld [vmem:[%s7042_s3 + $0x624] ss:$16 sps:$4 sm:$0xff]   ;;  %v5155_v31 = vld [vmem:[%s7042_s3 + $0x62c] ss:$16 sps:$4 sm:$0xff]  }
 0x1c2   :  { %3622 = vmatpush1.bf16.msra.mxu0 %v5096_v32  ;;  %3786 = vmatpush1.bf16.msra.mxu1 %v5099_v33  ;;  %v5150_v33 = vld [vmem:[%s7042_s3 + $0x620] ss:$16 sps:$4 sm:$0xff]  }
 0x1c3   :  { %3623 = vmatprep.subr.bf16.mxu0 %v5104_v35  ;;  %3787 = vmatprep.subr.bf16.mxu1 %v5107_v36  ;;  %v5153_v35 = vld [vmem:[%s7042_s3 + $0x628] ss:$16 sps:$4 sm:$0xff]   ;;  %v5158_v36 = vld [vmem:[%s7042_s3 + $0x644] ss:$16 sps:$4 sm:$0xff]  }
 0x1c6   :  { %3624 = vmatpush1.bf16.msra.mxu0 %v5102_v37  ;;  %3788 = vmatpush1.bf16.msra.mxu1 %v5105_v38  ;;  %v5161_v37 = vld [vmem:[%s7042_s3 + $0x64c] ss:$16 sps:$4 sm:$0xff]   ;;  %v5156_v38 = vld [vmem:[%s7042_s3 + $0x640] ss:$16 sps:$4 sm:$0xff]  }
 0x1c7   :  { %3625 = vmatprep.subr.bf16.mxu0 %v5110_v39  ;;  %3789 = vmatprep.subr.bf16.mxu1 %v5113_v40  ;;  %v5159_v39 = vld [vmem:[%s7042_s3 + $0x648] ss:$16 sps:$4 sm:$0xff]   ;;  %v5164_v40 = vld [vmem:[%s7042_s3 + $0x664] ss:$16 sps:$4 sm:$0xff]  }
 0x1ca   :  { %3626 = vmatpush1.bf16.msra.mxu0 %v5108_v42  ;;  %3790 = vmatpush1.bf16.msra.mxu1 %v5111_v43  ;;  %v5167_v42 = vld [vmem:[%s7042_s3 + $0x66c] ss:$16 sps:$4 sm:$0xff]   ;;  %v5162_v43 = vld [vmem:[%s7042_s3 + $0x660] ss:$16 sps:$4 sm:$0xff]  }
 0x1cb   :  { %3627 = vmatprep.subr.bf16.mxu0 %v5116_v12  ;;  %3791 = vmatprep.subr.bf16.mxu1 %v5119_v44  ;;  %v5165_v12 = vld [vmem:[%s7042_s3 + $0x668] ss:$16 sps:$4 sm:$0xff]   ;;  %v5170_v44 = vld [vmem:[%s7042_s3 + $0x684] ss:$16 sps:$4 sm:$0xff]  }
 0x1ce   :  { %3628 = vmatpush1.bf16.msra.mxu0 %v5114_v45  ;;  %3792 = vmatpush1.bf16.msra.mxu1 %v5117_v57  ;;  %v5173_v45 = vld [vmem:[%s7042_s3 + $0x68c] ss:$16 sps:$4 sm:$0xff]   ;;  %v5168_v57 = vld [vmem:[%s7042_s3 + $0x680] ss:$16 sps:$4 sm:$0xff]  }
 0x1cf   :  { %3629 = vmatprep.subr.bf16.mxu0 %v5122_v46  ;;  %3793 = vmatprep.subr.bf16.mxu1 %v5125_v47  ;;  %v5171_v46 = vld [vmem:[%s7042_s3 + $0x688] ss:$16 sps:$4 sm:$0xff]   ;;  %v5176_v47 = vld [vmem:[%s7042_s3 + $0x6a4] ss:$16 sps:$4 sm:$0xff]  }
 0x1d2   :  { %3630 = vmatpush1.bf16.msra.mxu0 %v5120_v48  ;;  %3794 = vmatpush1.bf16.msra.mxu1 %v5123_v49  ;;  %v5179_v48 = vld [vmem:[%s7042_s3 + $0x6ac] ss:$16 sps:$4 sm:$0xff]   ;;  %v5174_v49 = vld [vmem:[%s7042_s3 + $0x6a0] ss:$16 sps:$4 sm:$0xff]  }
 0x1d3   :  { %3631 = vmatprep.subr.bf16.mxu0 %v5128_v21  ;;  %3795 = vmatprep.subr.bf16.mxu1 %v5131_v50  ;;  %v5177_v21 = vld [vmem:[%s7042_s3 + $0x6a8] ss:$16 sps:$4 sm:$0xff]   ;;  %v5182_v50 = vld [vmem:[%s7042_s3 + $0x6c4] ss:$16 sps:$4 sm:$0xff]  }
 0x1d6   :  { %3632 = vmatpush1.bf16.msra.mxu0 %v5126_v34  ;;  %3796 = vmatpush1.bf16.msra.mxu1 %v5129_v52  ;;  %v5180_v34 = vld [vmem:[%s7042_s3 + $0x6c0] ss:$16 sps:$4 sm:$0xff]   ;;  %v5183_v52 = vld [vmem:[%s7042_s3 + $0x6c8] ss:$16 sps:$4 sm:$0xff]  }
 0x1d7   :  { %3633 = vmatprep.subr.bf16.mxu0 %v5134_v55  ;;  %3797 = vmatprep.subr.bf16.mxu1 %v5137_v56  ;;  %v5191_v55 = vld [vmem:[%s7042_s3 + $0x6ec] ss:$16 sps:$4 sm:$0xff]   ;;  %v5186_v56 = vld [vmem:[%s7042_s3 + $0x6e0] ss:$16 sps:$4 sm:$0xff]  }
 0x1d8   :  { %v1860_v2 = vpop.f32.mrb[4].mxu0  ;;  %v6724_v4 = vpop.f32.mrb[4].mxu1 }
 0x1d9   :  { %v4804_v3 = vadd.f32 %v1860_v2, %v306_v59  ;;  %v1862_v5 = vpop.f32.mrb[5].mxu0  ;;  %v1944_v8 = vpop.f32.mrb[5].mxu1  ;;  %v5194_v59 = vld [vmem:[%s7042_s3 + $0x704] ss:$16 sps:$4 sm:$0xff]   ;;  %v5201_v2 = vld [vmem:[%s7042_s3 + $0x728] ss:$16 sps:$4 sm:$0xff]  }
 0x1da   :  { %v4805_v7 = vadd.f32 %v1862_v5, %v310_v62  ;;  %3634 = vmatpush1.bf16.msra.mxu0 %v5132_v60  ;;  %3798 = vmatpush1.bf16.msra.mxu1 %v5135_v61  ;;  %v1864_v9 = vpop.f32.mrb[6].mxu0  ;;  %v4807_v14 = vadd.f32 %v1944_v8, %v318_v63  ;;  %v1946_v16 = vpop.f32.mrb[6].mxu1  ;;  %v5197_v60 = vld [vmem:[%s7042_s3 + $0x70c] ss:$16 sps:$4 sm:$0xff]   ;;  %v5192_v61 = vld [vmem:[%s7042_s3 + $0x700] ss:$16 sps:$4 sm:$0xff]  }
 0x1db   :  { %v1953_v13 = vmax.f32 %v4804_v3, 0.0  ;;  %v1865_v17 = vpop.f32.mrb[7].mxu0  ;;  %3635 = vmatprep.subr.bf16.mxu0 %v5140_v0  ;;  %3799 = vmatprep.subr.bf16.mxu1 %v5143_v1  ;;  %v1947_v19 = vpop.f32.mrb[7].mxu1  ;;  %v5195_v62 = vld [vmem:[%s7042_s3 + $0x708] ss:$16 sps:$4 sm:$0xff]  }
 0x1dc   :  { %v1954_v18 = vmax.f32 %v4805_v7, 0.0  ;;  %v1956_v20 = vmax.f32 %v4807_v14, 0.0  ;;  %v5200_v63 = vld [vmem:[%s7042_s3 + $0x724] ss:$16 sps:$4 sm:$0xff]   ;;  %v5203_v0 = vld [vmem:[%s7042_s3 + $0x72c] ss:$16 sps:$4 sm:$0xff]  }
 0x1dd   :  { %v1961_v30 = vpack.c.bf16 %v1953_v13, %v1953_v13  ;;  %v5198_v1 = vld [vmem:[%s7042_s3 + $0x720] ss:$16 sps:$4 sm:$0xff]   ;;  %v5206_v3 = vld [vmem:[%s7042_s3 + $0x744] ss:$16 sps:$4 sm:$0xff]   ;;  %v5209_v5 = vld [vmem:[%s7042_s3 + $0x74c] ss:$16 sps:$4 sm:$0xff]  }
 0x1de   :  { %v1962_v23 = vpack.c.bf16 %v1954_v18, %v1954_v18  ;;  %3636 = vmatpush1.bf16.msra.mxu0 %v5138_v6  ;;  %3800 = vmatpush1.bf16.msra.mxu1 %v5141_v10  ;;  %v1964_v32 = vpack.c.bf16 %v1956_v20, %v1956_v20  ;;  %v5204_v6 = vld [vmem:[%s7042_s3 + $0x740] ss:$16 sps:$4 sm:$0xff]   ;;  %v5207_v7 = vld [vmem:[%s7042_s3 + $0x748] ss:$16 sps:$4 sm:$0xff]   ;;  %v5212_v8 = vld [vmem:[%s7042_s3 + $0x764] ss:$16 sps:$4 sm:$0xff]  }
 0x1df   :  { %3646 = vmatprep.subr.bf16.mxu0 %v5146_v11  ;;  %3810 = vmatprep.subr.bf16.mxu1 %v5149_v53  ;;  %v5215_v9 = vld [vmem:[%s7042_s3 + $0x76c] ss:$16 sps:$4 sm:$0xff]   ;;  %v5210_v10 = vld [vmem:[%s7042_s3 + $0x760] ss:$16 sps:$4 sm:$0xff]   ;;  %v5213_v11 = vld [vmem:[%s7042_s3 + $0x768] ss:$16 sps:$4 sm:$0xff]  }
 0x1e0   :  { %3637 = vmatprep.mubr.bf16.mxu0 %v1962_v23  ;;  %3801 = vmatprep.mubr.bf16.mxu1 %v1962_v23  ;;  %v5218_v13 = vld [vmem:[%s7042_s3 + $0x784] ss:$16 sps:$4 sm:$0xff]   ;;  %v5221_v14 = vld [vmem:[%s7042_s3 + $0x78c] ss:$16 sps:$4 sm:$0xff]   ;;  %v5216_v16 = vld [vmem:[%s7042_s3 + $0x780] ss:$16 sps:$4 sm:$0xff]  }
 0x1e1   :  { %3638 = vmatmul.mubr.bf16.vlgmr.msra.gmra.mrb[8].mxu0 %v1961_v30  ;;  %3802 = vmatmul.mubr.bf16.vlgmr.msra.gmra.mrb[8].mxu1 %v1961_v30  ;;  %v5219_v17 = vld [vmem:[%s7042_s3 + $0x788] ss:$16 sps:$4 sm:$0xff]   ;;  %v313_v53 = vsub.s32 6, %v6320_v26  ;;  %v5224_v18 = vld [vmem:[%s7042_s3 + $0x7a4] ss:$16 sps:$4 sm:$0xff]  }
 0x1e2   :  { %3647 = vmatpush1.bf16.msra.mxu0 %v5144_v24  ;;  %3811 = vmatpush1.bf16.msra.mxu1 %v5147_v25  ;;  %v5227_v19 = vld [vmem:[%s7042_s3 + $0x7ac] ss:$16 sps:$4 sm:$0xff]   ;;  %v5222_v20 = vld [vmem:[%s7042_s3 + $0x7a0] ss:$16 sps:$4 sm:$0xff]   ;;  %v5225_v23 = vld [vmem:[%s7042_s3 + $0x7a8] ss:$16 sps:$4 sm:$0xff]  }
 0x1e3   :  { %3678 = vmatprep.mubr.bf16.mxu0 %v1964_v32  ;;  %3842 = vmatprep.mubr.bf16.mxu1 %v1964_v32  ;;  %v314_v24 = vrot.slane %v6326_v28, %v313_v53  ;;  %v5230_v25 = vld [vmem:[%s7042_s3 + $0x7c4] ss:$16 sps:$4 sm:$0xff]   ;;  %v5233_v30 = vld [vmem:[%s7042_s3 + $0x7cc] ss:$16 sps:$4 sm:$0xff]   ;;  %v5231_v28 = vld [vmem:[%s7042_s3 + $0x7c8] ss:$16 sps:$4 sm:$0xff]  }
 0x1e4   :  { %3648 = vmatprep.subr.bf16.mxu0 %v5152_v22  ;;  %3812 = vmatprep.subr.bf16.mxu1 %v5155_v31  ;;  %v5228_v22 = vld [vmem:[%s7042_s3 + $0x7c0] ss:$16 sps:$4 sm:$0xff]   ;;  %v5236_v32 = vld [vmem:[%s7042_s3 + $0x7e4] ss:$16 sps:$4 sm:$0xff]  }
 0x1e5   :  { %v4806_v31 = vadd.f32 %v6724_v4, %v314_v24  ;;  %v5237_v4 = vld [vmem:[%s7042_s3 + $0x7e8] ss:$16 sps:$4 sm:$0xff]  }
 0x1e6   :  { %3649 = vmatpush1.bf16.msra.mxu0 %v5150_v33  ;;  %3813 = vmatpush1.bf16.msra.mxu1 %v5153_v35  ;;  %v5239_v33 = vld [vmem:[%s7042_s3 + $0x7ec] ss:$16 sps:$4 sm:$0xff]   ;;  %v5234_v35 = vld [vmem:[%s7042_s3 + $0x7e0] ss:$16 sps:$4 sm:$0xff]  }
 0x1e7   :  { %3650 = vmatprep.subr.bf16.mxu0 %v5158_v36  ;;  %3814 = vmatprep.subr.bf16.mxu1 %v5161_v37  ;;  %v1955_v36 = vmax.f32 %v4806_v31, 0.0  ;;  %v5240_v37 = vld [vmem:[%s7044_s5 + $0x40] sm:$0xff]  }
 0x1ea   :  { %3651 = vmatpush1.bf16.msra.mxu0 %v5156_v38  ;;  %3815 = vmatpush1.bf16.msra.mxu1 %v5159_v39  ;;  %v5241_v38 = vld [vmem:[%s7044_s5 + $0xc0] sm:$0xff]  }
 0x1eb   :  { %3652 = vmatprep.subr.bf16.mxu0 %v5164_v40  ;;  %3816 = vmatprep.subr.bf16.mxu1 %v5167_v42  ;;  %v5242_v39 = vld [vmem:[%s7044_s5] sm:$0xff]   ;;  %v1963_v42 = vpack.c.bf16 %v1955_v36, %v1955_v36 }
 0x1ec   :  { %v5243_v40 = vld [vmem:[%s7044_s5 + $0x80] sm:$0xff]  }
 0x1ee   :  { %3653 = vmatpush1.bf16.msra.mxu0 %v5162_v43  ;;  %3817 = vmatpush1.bf16.msra.mxu1 %v5165_v12  ;;  %v5244_v43 = vld [vmem:[%s7044_s5 + $0x48] sm:$0xff]  }
 0x1ef   :  { %3654 = vmatprep.subr.bf16.mxu0 %v5170_v44  ;;  %3818 = vmatprep.subr.bf16.mxu1 %v5173_v45  ;;  %v5245_v12 = vld [vmem:[%s7044_s5 + $0xc8] sm:$0xff]  }
 0x1f0   :  { %v5246_v44 = vld [vmem:[%s7044_s5 + $0x8] sm:$0xff]  }
 0x1f1   :  { %v5247_v45 = vld [vmem:[%s7044_s5 + $0x88] sm:$0xff]  }
 0x1f2   :  { %3655 = vmatpush1.bf16.msra.mxu0 %v5168_v57  ;;  %3819 = vmatpush1.bf16.msra.mxu1 %v5171_v46  ;;  %v5248_v57 = vld [vmem:[%s7044_s5 + $0x50] sm:$0xff]  }
 0x1f3   :  { %3656 = vmatprep.subr.bf16.mxu0 %v5176_v47  ;;  %3820 = vmatprep.subr.bf16.mxu1 %v5179_v48  ;;  %v5249_v46 = vld [vmem:[%s7044_s5 + $0xd0] sm:$0xff]  }
 0x1f4   :  { %v5250_v47 = vld [vmem:[%s7044_s5 + $0x10] sm:$0xff]  }
 0x1f5   :  { %v5251_v48 = vld [vmem:[%s7044_s5 + $0x90] sm:$0xff]  }
 0x1f6   :  { %3657 = vmatpush1.bf16.msra.mxu0 %v5174_v49  ;;  %3821 = vmatpush1.bf16.msra.mxu1 %v5177_v21  ;;  %v5252_v49 = vld [vmem:[%s7044_s5 + $0x58] sm:$0xff]  }
 0x1f7   :  { %3658 = vmatprep.subr.bf16.mxu0 %v5182_v50  ;;  %3822 = vmatprep.subr.bf16.mxu1 %v5185_v51  ;;  %v5253_v21 = vld [vmem:[%s7044_s5 + $0xd8] sm:$0xff]  }
 0x1f8   :  { %v5254_v50 = vld [vmem:[%s7044_s5 + $0x18] sm:$0xff]  }
 0x1f9   :  { %v5255_v51 = vld [vmem:[%s7044_s5 + $0x98] sm:$0xff]  }
 0x1fa   :  { %3659 = vmatpush1.bf16.msra.mxu0 %v5180_v34  ;;  %3823 = vmatpush1.bf16.msra.mxu1 %v5183_v52  ;;  %v5256_v34 = vld [vmem:[%s7044_s5 + $0x60] sm:$0xff]  }
 0x1fb   :  { %3660 = vmatprep.subr.bf16.mxu0 %v5188_v54  ;;  %3824 = vmatprep.subr.bf16.mxu1 %v5191_v55  ;;  %v5257_v52 = vld [vmem:[%s7044_s5 + $0xe0] sm:$0xff]  }
 0x1fc   :  { %v5258_v54 = vld [vmem:[%s7044_s5 + $0x20] sm:$0xff]  }
 0x1fd   :  { %v5259_v55 = vld [vmem:[%s7044_s5 + $0xa0] sm:$0xff]  }
 0x1fe   :  { %3661 = vmatpush1.bf16.msra.mxu0 %v5186_v56  ;;  %3825 = vmatpush1.bf16.msra.mxu1 %v5189_v58  ;;  %v5260_v56 = vld [vmem:[%s7044_s5 + $0x68] sm:$0xff]  }
 0x1ff   :  { %3662 = vmatprep.subr.bf16.mxu0 %v5194_v59  ;;  %3826 = vmatprep.subr.bf16.mxu1 %v5197_v60  ;;  %v5261_v58 = vld [vmem:[%s7044_s5 + $0xe8] sm:$0xff]  }
 0x200   :  { %v5262_v59 = vld [vmem:[%s7044_s5 + $0x28] sm:$0xff]  }
 0x201   :  { %v5263_v60 = vld [vmem:[%s7044_s5 + $0xa8] sm:$0xff]  }
 0x202   :  { %3663 = vmatpush1.bf16.msra.mxu0 %v5192_v61  ;;  %3827 = vmatpush1.bf16.msra.mxu1 %v5195_v62  ;;  %v5264_v61 = vld [vmem:[%s7044_s5 + $0x70] sm:$0xff]  }
 0x203   :  { %3664 = vmatprep.subr.bf16.mxu0 %v5200_v63  ;;  %3828 = vmatprep.subr.bf16.mxu1 %v5203_v0  ;;  %v5265_v62 = vld [vmem:[%s7044_s5 + $0xf0] sm:$0xff]  }
 0x204   :  { %v5266_v63 = vld [vmem:[%s7044_s5 + $0x30] sm:$0xff]  }
 0x205   :  { %v5267_v0 = vld [vmem:[%s7044_s5 + $0xb0] sm:$0xff]  }
 0x206   :  { %3665 = vmatpush1.bf16.msra.mxu0 %v5198_v1  ;;  %3829 = vmatpush1.bf16.msra.mxu1 %v5201_v2  ;;  %v5268_v1 = vld [vmem:[%s7044_s5 + $0x78] sm:$0xff]  }
 0x207   :  { %3666 = vmatprep.subr.bf16.mxu0 %v5206_v3  ;;  %3830 = vmatprep.subr.bf16.mxu1 %v5209_v5  ;;  %v5269_v2 = vld [vmem:[%s7044_s5 + $0xf8] sm:$0xff]  }
 0x208   :  { %v5270_v3 = vld [vmem:[%s7044_s5 + $0x38] sm:$0xff]  }
 0x209   :  { %v5271_v5 = vld [vmem:[%s7044_s5 + $0xb8] sm:$0xff]  }
 0x20a   :  { %3667 = vmatpush1.bf16.msra.mxu0 %v5204_v6  ;;  %3831 = vmatpush1.bf16.msra.mxu1 %v5207_v7  ;;  %v2221_v6 = vld [vmem:[%s7045_s4] sm:$0xf] }
 0x20b   :  { %3668 = vmatprep.subr.bf16.mxu0 %v5212_v8  ;;  %3832 = vmatprep.subr.bf16.mxu1 %v5215_v9  ;;  %v2226_v7 = vrot.slane %v2221_v6, %v289_v27  ;;  %v2234_v8 = vrot.slane %v2221_v6, %v297_v41  ;;  %v2230_v9 = vrot.slane %v2221_v6, %v293_v15 }
 0x20e   :  { %3669 = vmatpush1.bf16.msra.mxu0 %v5210_v10  ;;  %3833 = vmatpush1.bf16.msra.mxu1 %v5213_v11  ;;  %v2238_v10 = vrot.slane %v2221_v6, %v301_v29 }
 0x20f   :  { %3670 = vmatprep.subr.bf16.mxu0 %v5218_v13  ;;  %3834 = vmatprep.subr.bf16.mxu1 %v5221_v14 }
 0x212   :  { %3671 = vmatpush1.bf16.msra.mxu0 %v5216_v16  ;;  %3835 = vmatpush1.bf16.msra.mxu1 %v5219_v17 }
 0x213   :  { %3672 = vmatprep.subr.bf16.mxu0 %v5224_v18  ;;  %3836 = vmatprep.subr.bf16.mxu1 %v5227_v19 }
 0x216   :  { %3673 = vmatpush1.bf16.msra.mxu0 %v5222_v20  ;;  %3837 = vmatpush1.bf16.msra.mxu1 %v5225_v23 }
 0x217   :  { %3674 = vmatprep.subr.bf16.mxu0 %v5230_v25  ;;  %3838 = vmatprep.subr.bf16.mxu1 %v5233_v30 }
 0x21a   :  { %3675 = vmatpush1.bf16.msra.mxu0 %v5228_v22  ;;  %3839 = vmatpush1.bf16.msra.mxu1 %v5231_v28 }
 0x21b   :  { %3676 = vmatprep.subr.bf16.mxu0 %v5236_v32  ;;  %3840 = vmatprep.subr.bf16.mxu1 %v5239_v33  ;;  %v4723_v33 = vld [vmem:[%s7046_s6] ss:$0 sm:$0xff] }
 0x21e   :  { %3677 = vmatpush1.bf16.msra.mxu0 %v5234_v35  ;;  %3841 = vmatpush1.bf16.msra.mxu1 %v5237_v4 }
 0x21f   :  { %4756 = vmatprep.subr.bf16.mxu0 %v5240_v37  ;;  %4778 = vmatprep.subr.bf16.mxu1 %v5241_v38 }
 0x221   :  { %3679 = vmatmul.mubr.bf16.vlgmr.msra.gmra.mrb[8].mxu0 %v1963_v42  ;;  %3843 = vmatmul.mubr.bf16.vlgmr.msra.gmra.mrb[8].mxu1 %v1963_v42 }
 0x222   :  { %4757 = vmatpush3.bf16.msra.mxu0 %v5242_v39  ;;  %4779 = vmatpush3.bf16.msra.mxu1 %v5243_v40 }
 0x223   :  { %4758 = vmatprep.subr.bf16.mxu0 %v5244_v43  ;;  %4780 = vmatprep.subr.bf16.mxu1 %v5245_v12 }
 0x226   :  { %4759 = vmatpush3.bf16.msra.mxu0 %v5246_v44  ;;  %4781 = vmatpush3.bf16.msra.mxu1 %v5247_v45 }
 0x227   :  { %4760 = vmatprep.subr.bf16.mxu0 %v5248_v57  ;;  %4782 = vmatprep.subr.bf16.mxu1 %v5249_v46 }
 0x22a   :  { %4761 = vmatpush3.bf16.msra.mxu0 %v5250_v47  ;;  %4783 = vmatpush3.bf16.msra.mxu1 %v5251_v48 }
 0x22b   :  { %4762 = vmatprep.subr.bf16.mxu0 %v5252_v49  ;;  %4784 = vmatprep.subr.bf16.mxu1 %v5253_v21 }
 0x22e   :  { %4763 = vmatpush3.bf16.msra.mxu0 %v5254_v50  ;;  %4785 = vmatpush3.bf16.msra.mxu1 %v5255_v51 }
 0x22f   :  { %4764 = vmatprep.subr.bf16.mxu0 %v5256_v34  ;;  %4786 = vmatprep.subr.bf16.mxu1 %v5257_v52 }
 0x232   :  { %4765 = vmatpush3.bf16.msra.mxu0 %v5258_v54  ;;  %4787 = vmatpush3.bf16.msra.mxu1 %v5259_v55 }
 0x233   :  { %4766 = vmatprep.subr.bf16.mxu0 %v5260_v56  ;;  %4788 = vmatprep.subr.bf16.mxu1 %v5261_v58 }
 0x236   :  { %4767 = vmatpush3.bf16.msra.mxu0 %v5262_v59  ;;  %4789 = vmatpush3.bf16.msra.mxu1 %v5263_v60 }
 0x237   :  { %4768 = vmatprep.subr.bf16.mxu0 %v5264_v61  ;;  %4790 = vmatprep.subr.bf16.mxu1 %v5265_v62 }
 0x23a   :  { %4769 = vmatpush3.bf16.msra.mxu0 %v5266_v63  ;;  %4791 = vmatpush3.bf16.msra.mxu1 %v5267_v0 }
 0x23b   :  { %4770 = vmatprep.subr.bf16.mxu0 %v5268_v1  ;;  %4792 = vmatprep.subr.bf16.mxu1 %v5269_v2 }
 0x23e   :  { %4771 = vmatpush3.bf16.msra.mxu0 %v5270_v3  ;;  %4793 = vmatpush3.bf16.msra.mxu1 %v5271_v5 }
 0x2f4   :  { %v3680_v11 = vpop.f32.mrb[8].mxu0  ;;  %v3844_v13 = vpop.f32.mrb[8].mxu1 }
 0x2f5   :  { %v4808_v14 = vadd.f32 %v3680_v11, %v2226_v7  ;;  %v4810_v16 = vadd.f32 %v3844_v13, %v2234_v8  ;;  %v3682_v17 = vpop.f32.mrb[9].mxu0  ;;  %v3846_v53 = vpop.f32.mrb[9].mxu1 }
 0x2f6   :  { %v4809_v18 = vadd.f32 %v3682_v17, %v2230_v9  ;;  %v4811_v19 = vadd.f32 %v3846_v53, %v2238_v10  ;;  %v3684_v20 = vpop.f32.mrb[10].mxu0  ;;  %v3848_v23 = vpop.f32.mrb[10].mxu1 }
 0x2f7   :  { %v3851_v27 = vmax.f32 %v4808_v14, 0.0  ;;  %v3853_v24 = vmax.f32 %v4810_v16, 0.0  ;;  %v3685_v25 = vpop.f32.mrb[11].mxu0  ;;  %v3849_v41 = vpop.f32.mrb[11].mxu1 }
 0x2f8   :  { %v3852_v30 = vmax.f32 %v4809_v18, 0.0  ;;  %v3854_v22 = vmax.f32 %v4811_v19, 0.0 }
 0x2f9   :  { %v3855_v26 = vpack.c.bf16 %v3851_v27, %v3851_v27  ;;  %v3857_v29 = vpack.c.bf16 %v3853_v24, %v3853_v24 }
 0x2fa   :  { %v3856_v15 = vpack.c.bf16 %v3852_v30, %v3852_v30  ;;  %v3858_v28 = vpack.c.bf16 %v3854_v22, %v3854_v22 }
 0x2fc   :  { %4154 = vmatprep.mubr.bf16.mxu0 %v3856_v15  ;;  %4194 = vmatprep.mubr.bf16.mxu1 %v3858_v28 }
 0x2fd   :  { %4155 = vmatmul.mubr.bf16.vlgmr.msra.gmra.mrb[12].mxu0 %v3855_v26  ;;  %4195 = vmatmul.mubr.bf16.vlgmr.msra.gmra.mrb[12].mxu1 %v3857_v29 }
 0x3d0   :  { %v4772_v31 = vpop.f32.mrb[12].mxu0  ;;  %v4794_v32 = vpop.f32.mrb[12].mxu1 }
 0x3d1   :  { %v4773_v35 = vpop.f32.mrb[13].mxu0  ;;  %v4795_v4 = vpop.f32.mrb[13].mxu1 }
 0x3d2   :  { %v4774_v36 = vadd.f32 %v4773_v35, %v4772_v31  ;;  %v4796_v37 = vadd.f32 %v4795_v4, %v4794_v32  ;;  %v4775_v38 = vpop.f32.mrb[14].mxu0  ;;  %v4797_v39 = vpop.f32.mrb[14].mxu1 }
 0x3d3   :  { %v4776_v40 = vpop.f32.mrb[15].mxu0  ;;  %v4798_v42 = vpop.f32.mrb[15].mxu1 }
 0x3d4   :  { %v4157_v43 = vadd.f32 %v4774_v36, %v4723_v33 }
 0x3d6   :  { %v4197_v12 = vadd.f32 %v4796_v37, %v4157_v43 }
 0x3d8   :  { %4202 = vst [vmem:[%s7047_s7] sm:$0xff] %v4197_v12 }

</bundles_post_ra>
